<compile_context>
chip_gen: v7x
topology: tpu7x:2x2x1
jax: 0.10.0
libtpu: 0.0.40
codegen_flags: <defaults>
</compile_context>

<pallas_src>
import numpy as np
import jax
import jax.numpy as jnp
from jax.experimental import pallas as pl
from jax.experimental.pallas import tpu as pltpu


def split_int_into_n(value, n):
    q, r = divmod(value, n)
    return [q + 1 if i < r else q for i in range(n)]


# ---------------------------------------------------------------------------
# One-time host-side parameter packing (cache/reuse across calls in practice).
# ---------------------------------------------------------------------------
def pack_rfb3d_params(params, W, Cin, matmul_dtype=jnp.float32):
    md = matmul_dtype
    wf = np.asarray(params["wf"], np.float32)            # (bottleneck, Cin)

    def toeplitz(w_k, k, o, dil, plo):
        # (k,k,k,o,o) -> (k*k, W*o, W*o); dx taps + W-direction 'same'
        # padding folded into the weight (PyTorch left = total//2 convention
        # is handled by the valid-range check).
        big = np.zeros((k * k, W * o, W * o), np.float32)
        for dz in range(k):
            for dy in range(k):
                for dx in range(k):
                    for wo_ in range(W):
                        wi = wo_ + dx * dil - plo
                        if 0 <= wi < W:
                            big[dz * k + dy,
                                wi * o:(wi + 1) * o,
                                wo_ * o:(wo_ + 1) * o] += w_k[dz, dy, dx]
        return big

    w1_cols, b1_cols, packed_branches = [], [], []
    off = 0
    for br in params["branches"]:
        o, r = int(br["o"]), int(br["rate"])
        k2 = 3 if r == 1 else r
        tot2 = k2 - 1
        plo2 = tot2 // 2

        # fused first 1x1x1 conv block (branch-contiguous columns)
        w1 = np.asarray(br["w1"], np.float32)             # (Cin, o)
        blk = np.zeros((W * Cin, W * o), np.float32)
        for w in range(W):
            blk[w * Cin:(w + 1) * Cin, w * o:(w + 1) * o] = w1
        w1_cols.append(blk)
        b1_cols.append(np.tile(np.asarray(br["b1"], np.float32).reshape(1, o),
                               (1, W)))

        bd = dict(
            rate=r, o=o, k2=k2, tot2=tot2, plo2=plo2,
            w2big=jnp.asarray(
                toeplitz(np.asarray(br["w2"], np.float32), k2, o, 1, plo2), md),
            b2big=jnp.asarray(
                np.tile(np.asarray(br["b2"], np.float32).reshape(1, o), (1, W))))
        if r != 1:
            bd["w3big"] = jnp.asarray(
                toeplitz(np.asarray(br["w3"], np.float32), 3, o, r, r), md)
            bd["b3big"] = jnp.asarray(
                np.tile(np.asarray(br["b3"], np.float32).reshape(1, o), (1, W)))

        # per-branch block of the final 1x1x1 conv (block-diagonal over W)
        wf_b = wf[off:off + o, :]
        wfbig = np.zeros((W * o, W * Cin), np.float32)
        for w in range(W):
            wfbig[w * o:(w + 1) * o, w * Cin:(w + 1) * Cin] = wf_b
        bd["wfbig"] = jnp.asarray(wfbig, md)
        off += o
        packed_branches.append(bd)
    assert off == wf.shape[0]

    return dict(
        W=W, Cin=Cin, matmul_dtype=md,
        w1big=jnp.asarray(np.concatenate(w1_cols, axis=1), md),
        b1big=jnp.asarray(np.concatenate(b1_cols, axis=1)),
        bfbig=jnp.asarray(np.tile(np.asarray(params["bf"], np.float32)
                                  .reshape(1, Cin), (1, W))),
        branches=packed_branches)


# ---------------------------------------------------------------------------
# Fused kernel
# ---------------------------------------------------------------------------
def _build_rfb3d_kernel(branch_meta, D, H, W, Cin, matmul_dtype):
    DH = D * H
    md = matmul_dtype

    def kernel(*refs):
        it = iter(refs)
        x_ref, w1_ref, b1_ref = next(it), next(it), next(it)
        branch_refs = []
        for meta in branch_meta:
            n = 5 if meta["has_third"] else 3
            branch_refs.append(tuple(next(it) for _ in range(n)))
        bf_ref = next(it)
        out_ref = next(it)
        scratches = tuple(it)

        # Zero the D/H-halo scratches once (W 'same' padding is folded into
        # the Toeplitz weights, so there is no W halo).  Later grid steps only
        # rewrite the interior -> halos stay zero.  Requires sequential batch.
        @pl.when(pl.program_id(0) == 0)
        def _init_halos():
            for s_ref in scratches:
                s_ref[...] = jnp.zeros(s_ref.shape, s_ref.dtype)

        x_slab = x_ref[...]                               # (DH, W*Cin)

        # All branch first 1x1x1 convs fused into one lane-dense matmul.
        z = jnp.dot(x_slab.astype(md), w1_ref[...],
                    preferred_element_type=jnp.float32) + b1_ref[...]

        # Fused "concat -> final 1x1x1 conv" accumulator (lane-dense layout).
        acc = jnp.zeros((DH, W * Cin), jnp.float32)

        col = 0
        si = 0
        for meta, prefs in zip(branch_meta, branch_refs):
            o = meta["o"]
            Wo = W * o
            if meta["has_third"]:
                w2_ref, b2_ref, w3_ref, b3_ref, wf_ref = prefs
            else:
                w2_ref, b2_ref, wf_ref = prefs

            y = z[:, col:col + Wo]                        # (DH, W*o), f32
            col += Wo

            # ---- Conv3d(o, o, k2, 'same') as k2^2 Toeplitz matmuls ---------
            k2, plo = meta["k2"], meta["plo2"]
            pad2 = scratches[si]
            si += 1
            pad2[plo:plo + D, plo:plo + H, :] = (
                y.reshape(D, H, Wo).astype(pad2.dtype))
            acc2 = jnp.zeros((DH, Wo), jnp.float32)
            for dz in range(k2):
                for dy in range(k2):
                    win = pad2[dz:dz + D, dy:dy + H, :].reshape(DH, Wo)
                    acc2 = acc2 + jnp.dot(win, w2_ref[dz * k2 + dy],
                                          preferred_element_type=jnp.float32)
            y = acc2 + b2_ref[...]                        # bias outside loop

            # ---- Conv3d(o, o, 3, dilation=r, 'same') -----------------------
            if meta["has_third"]:
                r = meta["rate"]
                pad3 = scratches[si]
                si += 1
                pad3[r:r + D, r:r + H, :] = (
                    y.reshape(D, H, Wo).astype(pad3.dtype))
                acc3 = jnp.zeros((DH, Wo), jnp.float32)
                for dz in range(3):
                    for dy in range(3):
                        win = pad3[dz * r:dz * r + D,
                                   dy * r:dy * r + H, :].reshape(DH, Wo)
                        acc3 = acc3 + jnp.dot(win, w3_ref[dz * 3 + dy],
                                              preferred_element_type=jnp.float32)
                y = acc3 + b3_ref[...]

            # ---- fused (concat + final 1x1x1 conv) contribution ------------
            acc = acc + jnp.dot(y.astype(md), wf_ref[...],
                                preferred_element_type=jnp.float32)

        # Final bias + residual; single lane-dense (DH, W*Cin) store.
        out_ref[...] = (acc + bf_ref[...]
                        + x_slab.astype(jnp.float32)).astype(out_ref.dtype)

    return kernel


# ---------------------------------------------------------------------------
# Wrapper
# ---------------------------------------------------------------------------
def receptive_field_block_3d(x_ncdhw, packed, *,
                             vmem_limit_bytes=32 * 1024 * 1024):
    """Forward pass of ReceptiveFieldBlock3d.  Input/output are NCDHW."""
    N, Cin, D, H, W = x_ncdhw.shape
    assert packed["W"] == W and packed["Cin"] == Cin
    DH, WC = D * H, W * Cin
    # Lane-dense slab: last dim W*Cin (=128 at demo sizes) -> unmasked stores.
    x_slab = jnp.transpose(x_ncdhw, (0, 2, 3, 4, 1)).reshape(N, DH, WC)

    def _const_spec(arr):
        return pl.BlockSpec(arr.shape, lambda n, nd=arr.ndim: (0,) * nd)

    inputs = [x_slab, packed["w1big"], packed["b1big"]]
    in_specs = [pl.BlockSpec((None, DH, WC), lambda n: (n, 0, 0)),
                _const_spec(packed["w1big"]), _const_spec(packed["b1big"])]

    branch_meta, scratch_shapes = [], []
    for bd in packed["branches"]:
        o, r, k2, tot2 = bd["o"], bd["rate"], bd["k2"], bd["tot2"]
        branch_meta.append(dict(o=o, rate=r, k2=k2, plo2=bd["plo2"],
                                has_third=(r != 1)))
        tensors = [bd["w2big"], bd["b2big"]]
        if r != 1:
            tensors += [bd["w3big"], bd["b3big"]]
        tensors.append(bd["wfbig"])
        for t in tensors:
            inputs.append(t)
            in_specs.append(_const_spec(t))
        # D/H-halo intermediates live in persistent VMEM scratch, in matmul
        # dtype so every conv window is already MXU-ready.
        scratch_shapes.append(
            pltpu.VMEM((D + tot2, H + tot2, W * o), packed["matmul_dtype"]))
        if r != 1:
            scratch_shapes.append(
                pltpu.VMEM((D + 2 * r, H + 2 * r, W * o),
                           packed["matmul_dtype"]))

    inputs.append(packed["bfbig"])
    in_specs.append(_const_spec(packed["bfbig"]))

    kernel = _build_rfb3d_kernel(branch_meta, D, H, W, Cin,
                                 packed["matmul_dtype"])

    out_slab = pl.pallas_call(
        kernel,
        out_shape=jax.ShapeDtypeStruct((N, DH, WC), x_ncdhw.dtype),
        grid=(N,),
        in_specs=in_specs,
        out_specs=pl.BlockSpec((None, DH, WC), lambda n: (n, 0, 0)),
        scratch_shapes=scratch_shapes,
        compiler_params=pltpu.CompilerParams(
            # Sequential batch axis: required by the zero-once scratch init.
            dimension_semantics=("arbitrary",),
            vmem_limit_bytes=vmem_limit_bytes),
    )(*inputs)

    return jnp.transpose(out_slab.reshape(N, D, H, W, Cin), (0, 4, 1, 2, 3))


# --------------------------- pure-JAX reference -----------------------------
def _conv3d_same_ref(x, w_dhwio, b, dilation=1):
    k = w_dhwio.shape[0]
    tot = dilation * (k - 1)
    plo, phi = tot // 2, tot - tot // 2          # PyTorch 'same' convention
    y = jax.lax.conv_general_dilated(
        x, w_dhwio, window_strides=(1, 1, 1), padding=[(plo, phi)] * 3,
        rhs_dilation=(dilation,) * 3,
        dimension_numbers=("NDHWC", "DHWIO", "NDHWC"),
        precision=jax.lax.Precision.HIGHEST)
    return y + b.reshape(1, 1, 1, 1, -1)


def receptive_field_block_3d_ref(x_ncdhw, params):
    x = jnp.transpose(x_ncdhw, (0, 2, 3, 4, 1))  # NDHWC
    outs = []
    for br in params["branches"]:
        y = jnp.einsum("ndhwc,co->ndhwo", x, br["w1"],
                       precision=jax.lax.Precision.HIGHEST)
        y = y + br["b1"].reshape(1, 1, 1, 1, -1)
        y = _conv3d_same_ref(y, br["w2"], br["b2"])
        if br["rate"] != 1:
            y = _conv3d_same_ref(y, br["w3"], br["b3"], dilation=br["rate"])
        outs.append(y)
    cat = jnp.concatenate(outs, axis=-1)
    final = jnp.einsum("ndhwc,co->ndhwo", cat, params["wf"],
                       precision=jax.lax.Precision.HIGHEST)
    final = final + params["bf"].reshape(1, 1, 1, 1, -1)
    return jnp.transpose(x + final, (0, 4, 1, 2, 3))


# --------------------------- parameter construction -------------------------
def make_params(key, in_channels, bottleneck_channels, rates):
    """Deterministic synthetic parameters (shapes defined by the module)."""
    out_c_list = split_int_into_n(bottleneck_channels, len(rates))
    branches = []
    for rate, o in zip(rates, out_c_list):
        k2 = 3 if rate == 1 else rate
        key, ka, kb, kc, kd, ke, kf_ = jax.random.split(key, 7)
        br = dict(
            rate=rate, o=o,
            w1=0.1 * jax.random.normal(ka, (in_channels, o), jnp.float32),
            b1=0.1 * jax.random.normal(kb, (1, o), jnp.float32),
            w2=0.1 * jax.random.normal(kc, (k2, k2, k2, o, o), jnp.float32),
            b2=0.1 * jax.random.normal(kd, (1, o), jnp.float32))
        if rate != 1:
            br["w3"] = 0.1 * jax.random.normal(ke, (3, 3, 3, o, o),
                                               jnp.float32)
            br["b3"] = 0.1 * jax.random.normal(kf_, (1, o), jnp.float32)
        branches.append(br)
    key, kw, kbf = jax.random.split(key, 3)
    return dict(
        branches=branches,
        wf=0.1 * jax.random.normal(kw, (bottleneck_channels, in_channels),
                                   jnp.float32),
        bf=0.1 * jax.random.normal(kbf, (1, in_channels), jnp.float32))


if __name__ == "__main__":
    in_channels, bottleneck_channels = 16, 32
    rates = [1, 2]                      # exercises both branch structures
    N, D, H, W = 2, 4, 8, 8

    key = jax.random.PRNGKey(0)
    key, kx = jax.random.split(key)
    x = jax.random.normal(kx, (N, in_channels, D, H, W), jnp.float32)  # NCDHW

    params = make_params(key, in_channels, bottleneck_channels, rates)
    packed = pack_rfb3d_params(params, W, in_channels,
                               matmul_dtype=jnp.float32)

    out = jax.block_until_ready(receptive_field_block_3d(x, packed))
    assert out.shape == x.shape, out.shape
    assert out.dtype == x.dtype

    ref = jax.block_until_ready(receptive_field_block_3d_ref(x, params))
    # Kernel matmuls run at default MXU precision while the reference uses
    # Precision.HIGHEST; use a looser tolerance if matmul_dtype=bfloat16.
    np.testing.assert_allclose(np.asarray(out), np.asarray(ref),
                               rtol=2e-3, atol=2e-3)
    print("KERNEL_OK")
</pallas_src>

<mosaic_0001>
module attributes {stable_mosaic.version = 11 : i64} {
  func.func @kernel(%arg0: i32, %arg1: memref<1x32x128xf32, #tpu.memory_space<vmem>>, %arg2: memref<128x256xf32, #tpu.memory_space<vmem>>, %arg3: memref<1x256xf32, #tpu.memory_space<vmem>>, %arg4: memref<9x128x128xf32, #tpu.memory_space<vmem>>, %arg5: memref<1x128xf32, #tpu.memory_space<vmem>>, %arg6: memref<128x128xf32, #tpu.memory_space<vmem>>, %arg7: memref<4x128x128xf32, #tpu.memory_space<vmem>>, %arg8: memref<1x128xf32, #tpu.memory_space<vmem>>, %arg9: memref<9x128x128xf32, #tpu.memory_space<vmem>>, %arg10: memref<1x128xf32, #tpu.memory_space<vmem>>, %arg11: memref<128x128xf32, #tpu.memory_space<vmem>>, %arg12: memref<1x128xf32, #tpu.memory_space<vmem>>, %arg13: memref<1x32x128xf32, #tpu.memory_space<vmem>>, %arg14: memref<6x10x128xf32, #tpu.memory_space<vmem>>, %arg15: memref<5x9x128xf32, #tpu.memory_space<vmem>>, %arg16: memref<8x12x128xf32, #tpu.memory_space<vmem>>) attributes {dimension_semantics = [#tpu.dimension_semantics<arbitrary>], iteration_bounds = array<i64: 2>, scalar_prefetch = 0 : i64, scratch_operands = 3 : i64, tpu.core_type = #tpu.core_type<tc>, window_params = [{transform_indices = @transform_0, window_bounds = array<i64: 1, 32, 128>}, {pipeline_mode = #tpu.pipeline_mode<synchronous>, transform_indices = @transform_1, window_bounds = array<i64: 128, 256>}, {pipeline_mode = #tpu.pipeline_mode<synchronous>, transform_indices = @transform_2, window_bounds = array<i64: 1, 256>}, {pipeline_mode = #tpu.pipeline_mode<synchronous>, transform_indices = @transform_3, window_bounds = array<i64: 9, 128, 128>}, {pipeline_mode = #tpu.pipeline_mode<synchronous>, transform_indices = @transform_4, window_bounds = array<i64: 1, 128>}, {pipeline_mode = #tpu.pipeline_mode<synchronous>, transform_indices = @transform_5, window_bounds = array<i64: 128, 128>}, {pipeline_mode = #tpu.pipeline_mode<synchronous>, transform_indices = @transform_6, window_bounds = array<i64: 4, 128, 128>}, {pipeline_mode = #tpu.pipeline_mode<synchronous>, transform_indices = @transform_7, window_bounds = array<i64: 1, 128>}, {pipeline_mode = #tpu.pipeline_mode<synchronous>, transform_indices = @transform_8, window_bounds = array<i64: 9, 128, 128>}, {pipeline_mode = #tpu.pipeline_mode<synchronous>, transform_indices = @transform_9, window_bounds = array<i64: 1, 128>}, {pipeline_mode = #tpu.pipeline_mode<synchronous>, transform_indices = @transform_10, window_bounds = array<i64: 128, 128>}, {pipeline_mode = #tpu.pipeline_mode<synchronous>, transform_indices = @transform_11, window_bounds = array<i64: 1, 128>}, {transform_indices = @transform_12, window_bounds = array<i64: 1, 32, 128>}]} {
    %c0_i32 = arith.constant 0 : i32
    %0 = arith.cmpi eq, %arg0, %c0_i32 : i32
    %1 = arith.extui %0 : i1 to i32
    %c0_i32_0 = arith.constant 0 : i32
    %2 = arith.cmpi ne, %1, %c0_i32_0 : i32
    scf.if %2 {
      %cst_183 = arith.constant 0.000000e+00 : f32
      %176 = vector.broadcast %cst_183 : f32 to vector<6x10x128xf32>
      %c0_184 = arith.constant 0 : index
      %c0_185 = arith.constant 0 : index
      %c0_186 = arith.constant 0 : index
      %177 = vector.load %arg14[%c0_184, %c0_185, %c0_186] : memref<6x10x128xf32, #tpu.memory_space<vmem>>, vector<6x10x128xf32>
      tpu.vector_store %arg14[%c0_184, %c0_185, %c0_186], %176 {strides = array<i32>} : memref<6x10x128xf32, #tpu.memory_space<vmem>>, vector<6x10x128xf32>,
      %cst_187 = arith.constant 0.000000e+00 : f32
      %178 = vector.broadcast %cst_187 : f32 to vector<5x9x128xf32>
      %c0_188 = arith.constant 0 : index
      %c0_189 = arith.constant 0 : index
      %c0_190 = arith.constant 0 : index
      %179 = vector.load %arg15[%c0_188, %c0_189, %c0_190] : memref<5x9x128xf32, #tpu.memory_space<vmem>>, vector<5x9x128xf32>
      tpu.vector_store %arg15[%c0_188, %c0_189, %c0_190], %178 {strides = array<i32>} : memref<5x9x128xf32, #tpu.memory_space<vmem>>, vector<5x9x128xf32>,
      %cst_191 = arith.constant 0.000000e+00 : f32
      %180 = vector.broadcast %cst_191 : f32 to vector<8x12x128xf32>
      %c0_192 = arith.constant 0 : index
      %c0_193 = arith.constant 0 : index
      %c0_194 = arith.constant 0 : index
      %181 = vector.load %arg16[%c0_192, %c0_193, %c0_194] : memref<8x12x128xf32, #tpu.memory_space<vmem>>, vector<8x12x128xf32>
      tpu.vector_store %arg16[%c0_192, %c0_193, %c0_194], %180 {strides = array<i32>} : memref<8x12x128xf32, #tpu.memory_space<vmem>>, vector<8x12x128xf32>,
    } else {
    }
    %c0 = arith.constant 0 : index
    %c0_1 = arith.constant 0 : index
    %c0_2 = arith.constant 0 : index
    %3 = vector.load %arg1[%c0, %c0_1, %c0_2] : memref<1x32x128xf32, #tpu.memory_space<vmem>>, vector<1x32x128xf32>
    %4 = vector.shape_cast %3 : vector<1x32x128xf32> to vector<32x128xf32>
    %c0_3 = arith.constant 0 : index
    %c0_4 = arith.constant 0 : index
    %5 = vector.load %arg2[%c0_3, %c0_4] : memref<128x256xf32, #tpu.memory_space<vmem>>, vector<128x256xf32>
    %cst = arith.constant dense<0.000000e+00> : vector<32x256xf32>
    %6 = tpu.matmul %4, %5, %cst {dimension_numbers = #tpu.dot_dimension_numbers<[1], [0], [0], [1], [0, 0, 1, 1], [], []>} : vector<32x128xf32>, vector<128x256xf32>, vector<32x256xf32> -> vector<32x256xf32>
    %c0_5 = arith.constant 0 : index
    %c0_6 = arith.constant 0 : index
    %7 = vector.load %arg3[%c0_5, %c0_6] : memref<1x256xf32, #tpu.memory_space<vmem>>, vector<1x256xf32>
    %8 = vector.broadcast %7 : vector<1x256xf32> to vector<32x256xf32>
    %9 = arith.addf %6, %8 : vector<32x256xf32>
    %cst_7 = arith.constant 0.000000e+00 : f32
    %10 = vector.broadcast %cst_7 : f32 to vector<32x128xf32>
    %11 = vector.extract_strided_slice %9 {offsets = [0, 0], sizes = [32, 128], strides = [1, 1]} : vector<32x256xf32> to vector<32x128xf32>
    %12 = vector.shape_cast %11 : vector<32x128xf32> to vector<4x8x128xf32>
    %c1 = arith.constant 1 : index
    %c1_8 = arith.constant 1 : index
    %c0_9 = arith.constant 0 : index
    %13 = vector.load %arg14[%c1, %c1_8, %c0_9] : memref<6x10x128xf32, #tpu.memory_space<vmem>>, vector<4x8x128xf32>
    tpu.vector_store %arg14[%c1, %c1_8, %c0_9], %12 {strides = array<i32>} : memref<6x10x128xf32, #tpu.memory_space<vmem>>, vector<4x8x128xf32>,
    %cst_10 = arith.constant 0.000000e+00 : f32
    %14 = vector.broadcast %cst_10 : f32 to vector<32x128xf32>
    %c0_11 = arith.constant 0 : index
    %c0_12 = arith.constant 0 : index
    %c0_13 = arith.constant 0 : index
    %15 = vector.load %arg14[%c0_11, %c0_12, %c0_13] : memref<6x10x128xf32, #tpu.memory_space<vmem>>, vector<4x8x128xf32>
    %16 = vector.shape_cast %15 : vector<4x8x128xf32> to vector<32x128xf32>
    %c0_14 = arith.constant 0 : index
    %c0_15 = arith.constant 0 : index
    %c0_16 = arith.constant 0 : index
    %17 = vector.load %arg4[%c0_14, %c0_15, %c0_16] : memref<9x128x128xf32, #tpu.memory_space<vmem>>, vector<1x128x128xf32>
    %18 = vector.shape_cast %17 : vector<1x128x128xf32> to vector<128x128xf32>
    %cst_17 = arith.constant dense<0.000000e+00> : vector<32x128xf32>
    %19 = tpu.matmul %16, %18, %cst_17 {dimension_numbers = #tpu.dot_dimension_numbers<[1], [0], [0], [1], [0, 0, 1, 1], [], []>} : vector<32x128xf32>, vector<128x128xf32>, vector<32x128xf32> -> vector<32x128xf32>
    %20 = arith.addf %14, %19 : vector<32x128xf32>
    %c0_18 = arith.constant 0 : index
    %c1_19 = arith.constant 1 : index
    %c0_20 = arith.constant 0 : index
    %21 = vector.load %arg14[%c0_18, %c1_19, %c0_20] : memref<6x10x128xf32, #tpu.memory_space<vmem>>, vector<4x8x128xf32>
    %22 = vector.shape_cast %21 : vector<4x8x128xf32> to vector<32x128xf32>
    %c1_21 = arith.constant 1 : index
    %c0_22 = arith.constant 0 : index
    %c0_23 = arith.constant 0 : index
    %23 = vector.load %arg4[%c1_21, %c0_22, %c0_23] : memref<9x128x128xf32, #tpu.memory_space<vmem>>, vector<1x128x128xf32>
    %24 = vector.shape_cast %23 : vector<1x128x128xf32> to vector<128x128xf32>
    %cst_24 = arith.constant dense<0.000000e+00> : vector<32x128xf32>
    %25 = tpu.matmul %22, %24, %cst_24 {dimension_numbers = #tpu.dot_dimension_numbers<[1], [0], [0], [1], [0, 0, 1, 1], [], []>} : vector<32x128xf32>, vector<128x128xf32>, vector<32x128xf32> -> vector<32x128xf32>
    %26 = arith.addf %20, %25 : vector<32x128xf32>
    %c0_25 = arith.constant 0 : index
    %c2 = arith.constant 2 : index
    %c0_26 = arith.constant 0 : index
    %27 = vector.load %arg14[%c0_25, %c2, %c0_26] : memref<6x10x128xf32, #tpu.memory_space<vmem>>, vector<4x8x128xf32>
    %28 = vector.shape_cast %27 : vector<4x8x128xf32> to vector<32x128xf32>
    %c2_27 = arith.constant 2 : index
    %c0_28 = arith.constant 0 : index
    %c0_29 = arith.constant 0 : index
    %29 = vector.load %arg4[%c2_27, %c0_28, %c0_29] : memref<9x128x128xf32, #tpu.memory_space<vmem>>, vector<1x128x128xf32>
    %30 = vector.shape_cast %29 : vector<1x128x128xf32> to vector<128x128xf32>
    %cst_30 = arith.constant dense<0.000000e+00> : vector<32x128xf32>
    %31 = tpu.matmul %28, %30, %cst_30 {dimension_numbers = #tpu.dot_dimension_numbers<[1], [0], [0], [1], [0, 0, 1, 1], [], []>} : vector<32x128xf32>, vector<128x128xf32>, vector<32x128xf32> -> vector<32x128xf32>
    %32 = arith.addf %26, %31 : vector<32x128xf32>
    %c1_31 = arith.constant 1 : index
    %c0_32 = arith.constant 0 : index
    %c0_33 = arith.constant 0 : index
    %33 = vector.load %arg14[%c1_31, %c0_32, %c0_33] : memref<6x10x128xf32, #tpu.memory_space<vmem>>, vector<4x8x128xf32>
    %34 = vector.shape_cast %33 : vector<4x8x128xf32> to vector<32x128xf32>
    %c3 = arith.constant 3 : index
    %c0_34 = arith.constant 0 : index
    %c0_35 = arith.constant 0 : index
    %35 = vector.load %arg4[%c3, %c0_34, %c0_35] : memref<9x128x128xf32, #tpu.memory_space<vmem>>, vector<1x128x128xf32>
    %36 = vector.shape_cast %35 : vector<1x128x128xf32> to vector<128x128xf32>
    %cst_36 = arith.constant dense<0.000000e+00> : vector<32x128xf32>
    %37 = tpu.matmul %34, %36, %cst_36 {dimension_numbers = #tpu.dot_dimension_numbers<[1], [0], [0], [1], [0, 0, 1, 1], [], []>} : vector<32x128xf32>, vector<128x128xf32>, vector<32x128xf32> -> vector<32x128xf32>
    %38 = arith.addf %32, %37 : vector<32x128xf32>
    %c1_37 = arith.constant 1 : index
    %c1_38 = arith.constant 1 : index
    %c0_39 = arith.constant 0 : index
    %39 = vector.load %arg14[%c1_37, %c1_38, %c0_39] : memref<6x10x128xf32, #tpu.memory_space<vmem>>, vector<4x8x128xf32>
    %40 = vector.shape_cast %39 : vector<4x8x128xf32> to vector<32x128xf32>
    %c4 = arith.constant 4 : index
    %c0_40 = arith.constant 0 : index
    %c0_41 = arith.constant 0 : index
    %41 = vector.load %arg4[%c4, %c0_40, %c0_41] : memref<9x128x128xf32, #tpu.memory_space<vmem>>, vector<1x128x128xf32>
    %42 = vector.shape_cast %41 : vector<1x128x128xf32> to vector<128x128xf32>
    %cst_42 = arith.constant dense<0.000000e+00> : vector<32x128xf32>
    %43 = tpu.matmul %40, %42, %cst_42 {dimension_numbers = #tpu.dot_dimension_numbers<[1], [0], [0], [1], [0, 0, 1, 1], [], []>} : vector<32x128xf32>, vector<128x128xf32>, vector<32x128xf32> -> vector<32x128xf32>
    %44 = arith.addf %38, %43 : vector<32x128xf32>
    %c1_43 = arith.constant 1 : index
    %c2_44 = arith.constant 2 : index
    %c0_45 = arith.constant 0 : index
    %45 = vector.load %arg14[%c1_43, %c2_44, %c0_45] : memref<6x10x128xf32, #tpu.memory_space<vmem>>, vector<4x8x128xf32>
    %46 = vector.shape_cast %45 : vector<4x8x128xf32> to vector<32x128xf32>
    %c5 = arith.constant 5 : index
    %c0_46 = arith.constant 0 : index
    %c0_47 = arith.constant 0 : index
    %47 = vector.load %arg4[%c5, %c0_46, %c0_47] : memref<9x128x128xf32, #tpu.memory_space<vmem>>, vector<1x128x128xf32>
    %48 = vector.shape_cast %47 : vector<1x128x128xf32> to vector<128x128xf32>
    %cst_48 = arith.constant dense<0.000000e+00> : vector<32x128xf32>
    %49 = tpu.matmul %46, %48, %cst_48 {dimension_numbers = #tpu.dot_dimension_numbers<[1], [0], [0], [1], [0, 0, 1, 1], [], []>} : vector<32x128xf32>, vector<128x128xf32>, vector<32x128xf32> -> vector<32x128xf32>
    %50 = arith.addf %44, %49 : vector<32x128xf32>
    %c2_49 = arith.constant 2 : index
    %c0_50 = arith.constant 0 : index
    %c0_51 = arith.constant 0 : index
    %51 = vector.load %arg14[%c2_49, %c0_50, %c0_51] : memref<6x10x128xf32, #tpu.memory_space<vmem>>, vector<4x8x128xf32>
    %52 = vector.shape_cast %51 : vector<4x8x128xf32> to vector<32x128xf32>
    %c6 = arith.constant 6 : index
    %c0_52 = arith.constant 0 : index
    %c0_53 = arith.constant 0 : index
    %53 = vector.load %arg4[%c6, %c0_52, %c0_53] : memref<9x128x128xf32, #tpu.memory_space<vmem>>, vector<1x128x128xf32>
    %54 = vector.shape_cast %53 : vector<1x128x128xf32> to vector<128x128xf32>
    %cst_54 = arith.constant dense<0.000000e+00> : vector<32x128xf32>
    %55 = tpu.matmul %52, %54, %cst_54 {dimension_numbers = #tpu.dot_dimension_numbers<[1], [0], [0], [1], [0, 0, 1, 1], [], []>} : vector<32x128xf32>, vector<128x128xf32>, vector<32x128xf32> -> vector<32x128xf32>
    %56 = arith.addf %50, %55 : vector<32x128xf32>
    %c2_55 = arith.constant 2 : index
    %c1_56 = arith.constant 1 : index
    %c0_57 = arith.constant 0 : index
    %57 = vector.load %arg14[%c2_55, %c1_56, %c0_57] : memref<6x10x128xf32, #tpu.memory_space<vmem>>, vector<4x8x128xf32>
    %58 = vector.shape_cast %57 : vector<4x8x128xf32> to vector<32x128xf32>
    %c7 = arith.constant 7 : index
    %c0_58 = arith.constant 0 : index
    %c0_59 = arith.constant 0 : index
    %59 = vector.load %arg4[%c7, %c0_58, %c0_59] : memref<9x128x128xf32, #tpu.memory_space<vmem>>, vector<1x128x128xf32>
    %60 = vector.shape_cast %59 : vector<1x128x128xf32> to vector<128x128xf32>
    %cst_60 = arith.constant dense<0.000000e+00> : vector<32x128xf32>
    %61 = tpu.matmul %58, %60, %cst_60 {dimension_numbers = #tpu.dot_dimension_numbers<[1], [0], [0], [1], [0, 0, 1, 1], [], []>} : vector<32x128xf32>, vector<128x128xf32>, vector<32x128xf32> -> vector<32x128xf32>
    %62 = arith.addf %56, %61 : vector<32x128xf32>
    %c2_61 = arith.constant 2 : index
    %c2_62 = arith.constant 2 : index
    %c0_63 = arith.constant 0 : index
    %63 = vector.load %arg14[%c2_61, %c2_62, %c0_63] : memref<6x10x128xf32, #tpu.memory_space<vmem>>, vector<4x8x128xf32>
    %64 = vector.shape_cast %63 : vector<4x8x128xf32> to vector<32x128xf32>
    %c8 = arith.constant 8 : index
    %c0_64 = arith.constant 0 : index
    %c0_65 = arith.constant 0 : index
    %65 = vector.load %arg4[%c8, %c0_64, %c0_65] : memref<9x128x128xf32, #tpu.memory_space<vmem>>, vector<1x128x128xf32>
    %66 = vector.shape_cast %65 : vector<1x128x128xf32> to vector<128x128xf32>
    %cst_66 = arith.constant dense<0.000000e+00> : vector<32x128xf32>
    %67 = tpu.matmul %64, %66, %cst_66 {dimension_numbers = #tpu.dot_dimension_numbers<[1], [0], [0], [1], [0, 0, 1, 1], [], []>} : vector<32x128xf32>, vector<128x128xf32>, vector<32x128xf32> -> vector<32x128xf32>
    %68 = arith.addf %62, %67 : vector<32x128xf32>
    %c0_67 = arith.constant 0 : index
    %c0_68 = arith.constant 0 : index
    %69 = vector.load %arg5[%c0_67, %c0_68] : memref<1x128xf32, #tpu.memory_space<vmem>>, vector<1x128xf32>
    %70 = vector.broadcast %69 : vector<1x128xf32> to vector<32x128xf32>
    %71 = arith.addf %68, %70 : vector<32x128xf32>
    %c0_69 = arith.constant 0 : index
    %c0_70 = arith.constant 0 : index
    %72 = vector.load %arg6[%c0_69, %c0_70] : memref<128x128xf32, #tpu.memory_space<vmem>>, vector<128x128xf32>
    %cst_71 = arith.constant dense<0.000000e+00> : vector<32x128xf32>
    %73 = tpu.matmul %71, %72, %cst_71 {dimension_numbers = #tpu.dot_dimension_numbers<[1], [0], [0], [1], [0, 0, 1, 1], [], []>} : vector<32x128xf32>, vector<128x128xf32>, vector<32x128xf32> -> vector<32x128xf32>
    %74 = arith.addf %10, %73 : vector<32x128xf32>
    %75 = vector.extract_strided_slice %9 {offsets = [0, 128], sizes = [32, 128], strides = [1, 1]} : vector<32x256xf32> to vector<32x128xf32>
    %76 = vector.shape_cast %75 : vector<32x128xf32> to vector<4x8x128xf32>
    %c0_72 = arith.constant 0 : index
    %c0_73 = arith.constant 0 : index
    %c0_74 = arith.constant 0 : index
    %77 = vector.load %arg15[%c0_72, %c0_73, %c0_74] : memref<5x9x128xf32, #tpu.memory_space<vmem>>, vector<4x8x128xf32>
    tpu.vector_store %arg15[%c0_72, %c0_73, %c0_74], %76 {strides = array<i32>} : memref<5x9x128xf32, #tpu.memory_space<vmem>>, vector<4x8x128xf32>,
    %cst_75 = arith.constant 0.000000e+00 : f32
    %78 = vector.broadcast %cst_75 : f32 to vector<32x128xf32>
    %c0_76 = arith.constant 0 : index
    %c0_77 = arith.constant 0 : index
    %c0_78 = arith.constant 0 : index
    %79 = vector.load %arg15[%c0_76, %c0_77, %c0_78] : memref<5x9x128xf32, #tpu.memory_space<vmem>>, vector<4x8x128xf32>
    %80 = vector.shape_cast %79 : vector<4x8x128xf32> to vector<32x128xf32>
    %c0_79 = arith.constant 0 : index
    %c0_80 = arith.constant 0 : index
    %c0_81 = arith.constant 0 : index
    %81 = vector.load %arg7[%c0_79, %c0_80, %c0_81] : memref<4x128x128xf32, #tpu.memory_space<vmem>>, vector<1x128x128xf32>
    %82 = vector.shape_cast %81 : vector<1x128x128xf32> to vector<128x128xf32>
    %cst_82 = arith.constant dense<0.000000e+00> : vector<32x128xf32>
    %83 = tpu.matmul %80, %82, %cst_82 {dimension_numbers = #tpu.dot_dimension_numbers<[1], [0], [0], [1], [0, 0, 1, 1], [], []>} : vector<32x128xf32>, vector<128x128xf32>, vector<32x128xf32> -> vector<32x128xf32>
    %84 = arith.addf %78, %83 : vector<32x128xf32>
    %c0_83 = arith.constant 0 : index
    %c1_84 = arith.constant 1 : index
    %c0_85 = arith.constant 0 : index
    %85 = vector.load %arg15[%c0_83, %c1_84, %c0_85] : memref<5x9x128xf32, #tpu.memory_space<vmem>>, vector<4x8x128xf32>
    %86 = vector.shape_cast %85 : vector<4x8x128xf32> to vector<32x128xf32>
    %c1_86 = arith.constant 1 : index
    %c0_87 = arith.constant 0 : index
    %c0_88 = arith.constant 0 : index
    %87 = vector.load %arg7[%c1_86, %c0_87, %c0_88] : memref<4x128x128xf32, #tpu.memory_space<vmem>>, vector<1x128x128xf32>
    %88 = vector.shape_cast %87 : vector<1x128x128xf32> to vector<128x128xf32>
    %cst_89 = arith.constant dense<0.000000e+00> : vector<32x128xf32>
    %89 = tpu.matmul %86, %88, %cst_89 {dimension_numbers = #tpu.dot_dimension_numbers<[1], [0], [0], [1], [0, 0, 1, 1], [], []>} : vector<32x128xf32>, vector<128x128xf32>, vector<32x128xf32> -> vector<32x128xf32>
    %90 = arith.addf %84, %89 : vector<32x128xf32>
    %c1_90 = arith.constant 1 : index
    %c0_91 = arith.constant 0 : index
    %c0_92 = arith.constant 0 : index
    %91 = vector.load %arg15[%c1_90, %c0_91, %c0_92] : memref<5x9x128xf32, #tpu.memory_space<vmem>>, vector<4x8x128xf32>
    %92 = vector.shape_cast %91 : vector<4x8x128xf32> to vector<32x128xf32>
    %c2_93 = arith.constant 2 : index
    %c0_94 = arith.constant 0 : index
    %c0_95 = arith.constant 0 : index
    %93 = vector.load %arg7[%c2_93, %c0_94, %c0_95] : memref<4x128x128xf32, #tpu.memory_space<vmem>>, vector<1x128x128xf32>
    %94 = vector.shape_cast %93 : vector<1x128x128xf32> to vector<128x128xf32>
    %cst_96 = arith.constant dense<0.000000e+00> : vector<32x128xf32>
    %95 = tpu.matmul %92, %94, %cst_96 {dimension_numbers = #tpu.dot_dimension_numbers<[1], [0], [0], [1], [0, 0, 1, 1], [], []>} : vector<32x128xf32>, vector<128x128xf32>, vector<32x128xf32> -> vector<32x128xf32>
    %96 = arith.addf %90, %95 : vector<32x128xf32>
    %c1_97 = arith.constant 1 : index
    %c1_98 = arith.constant 1 : index
    %c0_99 = arith.constant 0 : index
    %97 = vector.load %arg15[%c1_97, %c1_98, %c0_99] : memref<5x9x128xf32, #tpu.memory_space<vmem>>, vector<4x8x128xf32>
    %98 = vector.shape_cast %97 : vector<4x8x128xf32> to vector<32x128xf32>
    %c3_100 = arith.constant 3 : index
    %c0_101 = arith.constant 0 : index
    %c0_102 = arith.constant 0 : index
    %99 = vector.load %arg7[%c3_100, %c0_101, %c0_102] : memref<4x128x128xf32, #tpu.memory_space<vmem>>, vector<1x128x128xf32>
    %100 = vector.shape_cast %99 : vector<1x128x128xf32> to vector<128x128xf32>
    %cst_103 = arith.constant dense<0.000000e+00> : vector<32x128xf32>
    %101 = tpu.matmul %98, %100, %cst_103 {dimension_numbers = #tpu.dot_dimension_numbers<[1], [0], [0], [1], [0, 0, 1, 1], [], []>} : vector<32x128xf32>, vector<128x128xf32>, vector<32x128xf32> -> vector<32x128xf32>
    %102 = arith.addf %96, %101 : vector<32x128xf32>
    %c0_104 = arith.constant 0 : index
    %c0_105 = arith.constant 0 : index
    %103 = vector.load %arg8[%c0_104, %c0_105] : memref<1x128xf32, #tpu.memory_space<vmem>>, vector<1x128xf32>
    %104 = vector.broadcast %103 : vector<1x128xf32> to vector<32x128xf32>
    %105 = arith.addf %102, %104 : vector<32x128xf32>
    %106 = vector.shape_cast %105 : vector<32x128xf32> to vector<4x8x128xf32>
    %c2_106 = arith.constant 2 : index
    %c2_107 = arith.constant 2 : index
    %c0_108 = arith.constant 0 : index
    %107 = vector.load %arg16[%c2_106, %c2_107, %c0_108] : memref<8x12x128xf32, #tpu.memory_space<vmem>>, vector<4x8x128xf32>
    tpu.vector_store %arg16[%c2_106, %c2_107, %c0_108], %106 {strides = array<i32>} : memref<8x12x128xf32, #tpu.memory_space<vmem>>, vector<4x8x128xf32>,
    %cst_109 = arith.constant 0.000000e+00 : f32
    %108 = vector.broadcast %cst_109 : f32 to vector<32x128xf32>
    %c0_110 = arith.constant 0 : index
    %c0_111 = arith.constant 0 : index
    %c0_112 = arith.constant 0 : index
    %109 = vector.load %arg16[%c0_110, %c0_111, %c0_112] : memref<8x12x128xf32, #tpu.memory_space<vmem>>, vector<4x8x128xf32>
    %110 = vector.shape_cast %109 : vector<4x8x128xf32> to vector<32x128xf32>
    %c0_113 = arith.constant 0 : index
    %c0_114 = arith.constant 0 : index
    %c0_115 = arith.constant 0 : index
    %111 = vector.load %arg9[%c0_113, %c0_114, %c0_115] : memref<9x128x128xf32, #tpu.memory_space<vmem>>, vector<1x128x128xf32>
    %112 = vector.shape_cast %111 : vector<1x128x128xf32> to vector<128x128xf32>
    %cst_116 = arith.constant dense<0.000000e+00> : vector<32x128xf32>
    %113 = tpu.matmul %110, %112, %cst_116 {dimension_numbers = #tpu.dot_dimension_numbers<[1], [0], [0], [1], [0, 0, 1, 1], [], []>} : vector<32x128xf32>, vector<128x128xf32>, vector<32x128xf32> -> vector<32x128xf32>
    %114 = arith.addf %108, %113 : vector<32x128xf32>
    %c0_117 = arith.constant 0 : index
    %c2_118 = arith.constant 2 : index
    %c0_119 = arith.constant 0 : index
    %115 = vector.load %arg16[%c0_117, %c2_118, %c0_119] : memref<8x12x128xf32, #tpu.memory_space<vmem>>, vector<4x8x128xf32>
    %116 = vector.shape_cast %115 : vector<4x8x128xf32> to vector<32x128xf32>
    %c1_120 = arith.constant 1 : index
    %c0_121 = arith.constant 0 : index
    %c0_122 = arith.constant 0 : index
    %117 = vector.load %arg9[%c1_120, %c0_121, %c0_122] : memref<9x128x128xf32, #tpu.memory_space<vmem>>, vector<1x128x128xf32>
    %118 = vector.shape_cast %117 : vector<1x128x128xf32> to vector<128x128xf32>
    %cst_123 = arith.constant dense<0.000000e+00> : vector<32x128xf32>
    %119 = tpu.matmul %116, %118, %cst_123 {dimension_numbers = #tpu.dot_dimension_numbers<[1], [0], [0], [1], [0, 0, 1, 1], [], []>} : vector<32x128xf32>, vector<128x128xf32>, vector<32x128xf32> -> vector<32x128xf32>
    %120 = arith.addf %114, %119 : vector<32x128xf32>
    %c0_124 = arith.constant 0 : index
    %c4_125 = arith.constant 4 : index
    %c0_126 = arith.constant 0 : index
    %121 = vector.load %arg16[%c0_124, %c4_125, %c0_126] : memref<8x12x128xf32, #tpu.memory_space<vmem>>, vector<4x8x128xf32>
    %122 = vector.shape_cast %121 : vector<4x8x128xf32> to vector<32x128xf32>
    %c2_127 = arith.constant 2 : index
    %c0_128 = arith.constant 0 : index
    %c0_129 = arith.constant 0 : index
    %123 = vector.load %arg9[%c2_127, %c0_128, %c0_129] : memref<9x128x128xf32, #tpu.memory_space<vmem>>, vector<1x128x128xf32>
    %124 = vector.shape_cast %123 : vector<1x128x128xf32> to vector<128x128xf32>
    %cst_130 = arith.constant dense<0.000000e+00> : vector<32x128xf32>
    %125 = tpu.matmul %122, %124, %cst_130 {dimension_numbers = #tpu.dot_dimension_numbers<[1], [0], [0], [1], [0, 0, 1, 1], [], []>} : vector<32x128xf32>, vector<128x128xf32>, vector<32x128xf32> -> vector<32x128xf32>
    %126 = arith.addf %120, %125 : vector<32x128xf32>
    %c2_131 = arith.constant 2 : index
    %c0_132 = arith.constant 0 : index
    %c0_133 = arith.constant 0 : index
    %127 = vector.load %arg16[%c2_131, %c0_132, %c0_133] : memref<8x12x128xf32, #tpu.memory_space<vmem>>, vector<4x8x128xf32>
    %128 = vector.shape_cast %127 : vector<4x8x128xf32> to vector<32x128xf32>
    %c3_134 = arith.constant 3 : index
    %c0_135 = arith.constant 0 : index
    %c0_136 = arith.constant 0 : index
    %129 = vector.load %arg9[%c3_134, %c0_135, %c0_136] : memref<9x128x128xf32, #tpu.memory_space<vmem>>, vector<1x128x128xf32>
    %130 = vector.shape_cast %129 : vector<1x128x128xf32> to vector<128x128xf32>
    %cst_137 = arith.constant dense<0.000000e+00> : vector<32x128xf32>
    %131 = tpu.matmul %128, %130, %cst_137 {dimension_numbers = #tpu.dot_dimension_numbers<[1], [0], [0], [1], [0, 0, 1, 1], [], []>} : vector<32x128xf32>, vector<128x128xf32>, vector<32x128xf32> -> vector<32x128xf32>
    %132 = arith.addf %126, %131 : vector<32x128xf32>
    %c2_138 = arith.constant 2 : index
    %c2_139 = arith.constant 2 : index
    %c0_140 = arith.constant 0 : index
    %133 = vector.load %arg16[%c2_138, %c2_139, %c0_140] : memref<8x12x128xf32, #tpu.memory_space<vmem>>, vector<4x8x128xf32>
    %134 = vector.shape_cast %133 : vector<4x8x128xf32> to vector<32x128xf32>
    %c4_141 = arith.constant 4 : index
    %c0_142 = arith.constant 0 : index
    %c0_143 = arith.constant 0 : index
    %135 = vector.load %arg9[%c4_141, %c0_142, %c0_143] : memref<9x128x128xf32, #tpu.memory_space<vmem>>, vector<1x128x128xf32>
    %136 = vector.shape_cast %135 : vector<1x128x128xf32> to vector<128x128xf32>
    %cst_144 = arith.constant dense<0.000000e+00> : vector<32x128xf32>
    %137 = tpu.matmul %134, %136, %cst_144 {dimension_numbers = #tpu.dot_dimension_numbers<[1], [0], [0], [1], [0, 0, 1, 1], [], []>} : vector<32x128xf32>, vector<128x128xf32>, vector<32x128xf32> -> vector<32x128xf32>
    %138 = arith.addf %132, %137 : vector<32x128xf32>
    %c2_145 = arith.constant 2 : index
    %c4_146 = arith.constant 4 : index
    %c0_147 = arith.constant 0 : index
    %139 = vector.load %arg16[%c2_145, %c4_146, %c0_147] : memref<8x12x128xf32, #tpu.memory_space<vmem>>, vector<4x8x128xf32>
    %140 = vector.shape_cast %139 : vector<4x8x128xf32> to vector<32x128xf32>
    %c5_148 = arith.constant 5 : index
    %c0_149 = arith.constant 0 : index
    %c0_150 = arith.constant 0 : index
    %141 = vector.load %arg9[%c5_148, %c0_149, %c0_150] : memref<9x128x128xf32, #tpu.memory_space<vmem>>, vector<1x128x128xf32>
    %142 = vector.shape_cast %141 : vector<1x128x128xf32> to vector<128x128xf32>
    %cst_151 = arith.constant dense<0.000000e+00> : vector<32x128xf32>
    %143 = tpu.matmul %140, %142, %cst_151 {dimension_numbers = #tpu.dot_dimension_numbers<[1], [0], [0], [1], [0, 0, 1, 1], [], []>} : vector<32x128xf32>, vector<128x128xf32>, vector<32x128xf32> -> vector<32x128xf32>
    %144 = arith.addf %138, %143 : vector<32x128xf32>
    %c4_152 = arith.constant 4 : index
    %c0_153 = arith.constant 0 : index
    %c0_154 = arith.constant 0 : index
    %145 = vector.load %arg16[%c4_152, %c0_153, %c0_154] : memref<8x12x128xf32, #tpu.memory_space<vmem>>, vector<4x8x128xf32>
    %146 = vector.shape_cast %145 : vector<4x8x128xf32> to vector<32x128xf32>
    %c6_155 = arith.constant 6 : index
    %c0_156 = arith.constant 0 : index
    %c0_157 = arith.constant 0 : index
    %147 = vector.load %arg9[%c6_155, %c0_156, %c0_157] : memref<9x128x128xf32, #tpu.memory_space<vmem>>, vector<1x128x128xf32>
    %148 = vector.shape_cast %147 : vector<1x128x128xf32> to vector<128x128xf32>
    %cst_158 = arith.constant dense<0.000000e+00> : vector<32x128xf32>
    %149 = tpu.matmul %146, %148, %cst_158 {dimension_numbers = #tpu.dot_dimension_numbers<[1], [0], [0], [1], [0, 0, 1, 1], [], []>} : vector<32x128xf32>, vector<128x128xf32>, vector<32x128xf32> -> vector<32x128xf32>
    %150 = arith.addf %144, %149 : vector<32x128xf32>
    %c4_159 = arith.constant 4 : index
    %c2_160 = arith.constant 2 : index
    %c0_161 = arith.constant 0 : index
    %151 = vector.load %arg16[%c4_159, %c2_160, %c0_161] : memref<8x12x128xf32, #tpu.memory_space<vmem>>, vector<4x8x128xf32>
    %152 = vector.shape_cast %151 : vector<4x8x128xf32> to vector<32x128xf32>
    %c7_162 = arith.constant 7 : index
    %c0_163 = arith.constant 0 : index
    %c0_164 = arith.constant 0 : index
    %153 = vector.load %arg9[%c7_162, %c0_163, %c0_164] : memref<9x128x128xf32, #tpu.memory_space<vmem>>, vector<1x128x128xf32>
    %154 = vector.shape_cast %153 : vector<1x128x128xf32> to vector<128x128xf32>
    %cst_165 = arith.constant dense<0.000000e+00> : vector<32x128xf32>
    %155 = tpu.matmul %152, %154, %cst_165 {dimension_numbers = #tpu.dot_dimension_numbers<[1], [0], [0], [1], [0, 0, 1, 1], [], []>} : vector<32x128xf32>, vector<128x128xf32>, vector<32x128xf32> -> vector<32x128xf32>
    %156 = arith.addf %150, %155 : vector<32x128xf32>
    %c4_166 = arith.constant 4 : index
    %c4_167 = arith.constant 4 : index
    %c0_168 = arith.constant 0 : index
    %157 = vector.load %arg16[%c4_166, %c4_167, %c0_168] : memref<8x12x128xf32, #tpu.memory_space<vmem>>, vector<4x8x128xf32>
    %158 = vector.shape_cast %157 : vector<4x8x128xf32> to vector<32x128xf32>
    %c8_169 = arith.constant 8 : index
    %c0_170 = arith.constant 0 : index
    %c0_171 = arith.constant 0 : index
    %159 = vector.load %arg9[%c8_169, %c0_170, %c0_171] : memref<9x128x128xf32, #tpu.memory_space<vmem>>, vector<1x128x128xf32>
    %160 = vector.shape_cast %159 : vector<1x128x128xf32> to vector<128x128xf32>
    %cst_172 = arith.constant dense<0.000000e+00> : vector<32x128xf32>
    %161 = tpu.matmul %158, %160, %cst_172 {dimension_numbers = #tpu.dot_dimension_numbers<[1], [0], [0], [1], [0, 0, 1, 1], [], []>} : vector<32x128xf32>, vector<128x128xf32>, vector<32x128xf32> -> vector<32x128xf32>
    %162 = arith.addf %156, %161 : vector<32x128xf32>
    %c0_173 = arith.constant 0 : index
    %c0_174 = arith.constant 0 : index
    %163 = vector.load %arg10[%c0_173, %c0_174] : memref<1x128xf32, #tpu.memory_space<vmem>>, vector<1x128xf32>
    %164 = vector.broadcast %163 : vector<1x128xf32> to vector<32x128xf32>
    %165 = arith.addf %162, %164 : vector<32x128xf32>
    %c0_175 = arith.constant 0 : index
    %c0_176 = arith.constant 0 : index
    %166 = vector.load %arg11[%c0_175, %c0_176] : memref<128x128xf32, #tpu.memory_space<vmem>>, vector<128x128xf32>
    %cst_177 = arith.constant dense<0.000000e+00> : vector<32x128xf32>
    %167 = tpu.matmul %165, %166, %cst_177 {dimension_numbers = #tpu.dot_dimension_numbers<[1], [0], [0], [1], [0, 0, 1, 1], [], []>} : vector<32x128xf32>, vector<128x128xf32>, vector<32x128xf32> -> vector<32x128xf32>
    %168 = arith.addf %74, %167 : vector<32x128xf32>
    %c0_178 = arith.constant 0 : index
    %c0_179 = arith.constant 0 : index
    %169 = vector.load %arg12[%c0_178, %c0_179] : memref<1x128xf32, #tpu.memory_space<vmem>>, vector<1x128xf32>
    %170 = vector.broadcast %169 : vector<1x128xf32> to vector<32x128xf32>
    %171 = arith.addf %168, %170 : vector<32x128xf32>
    %172 = arith.addf %171, %4 : vector<32x128xf32>
    %c0_180 = arith.constant 0 : index
    %c0_181 = arith.constant 0 : index
    %c0_182 = arith.constant 0 : index
    %173 = vector.load %arg13[%c0_180, %c0_181, %c0_182] : memref<1x32x128xf32, #tpu.memory_space<vmem>>, vector<1x32x128xf32>
    %174 = vector.shape_cast %173 : vector<1x32x128xf32> to vector<32x128xf32>
    %175 = vector.shape_cast %172 : vector<32x128xf32> to vector<1x32x128xf32>
    tpu.vector_store %arg13[%c0_180, %c0_181, %c0_182], %175 {strides = array<i32>} : memref<1x32x128xf32, #tpu.memory_space<vmem>>, vector<1x32x128xf32>,
    return
  }
  func.func @transform_0(%arg0: i32) -> (i32, i32, i32) {
    %c0_i32 = arith.constant 0 : i32
    %c0_i32_0 = arith.constant 0 : i32
    %c0_i32_1 = arith.constant 0 : i32
    return %arg0, %c0_i32, %c0_i32_0 : i32, i32, i32
  }
  func.func @transform_1(%arg0: i32) -> (i32, i32) {
    %c0_i32 = arith.constant 0 : i32
    %c0_i32_0 = arith.constant 0 : i32
    %c0_i32_1 = arith.constant 0 : i32
    return %c0_i32, %c0_i32_0 : i32, i32
  }
  func.func @transform_2(%arg0: i32) -> (i32, i32) {
    %c0_i32 = arith.constant 0 : i32
    %c0_i32_0 = arith.constant 0 : i32
    %c0_i32_1 = arith.constant 0 : i32
    return %c0_i32, %c0_i32_0 : i32, i32
  }
  func.func @transform_3(%arg0: i32) -> (i32, i32, i32) {
    %c0_i32 = arith.constant 0 : i32
    %c0_i32_0 = arith.constant 0 : i32
    %c0_i32_1 = arith.constant 0 : i32
    %c0_i32_2 = arith.constant 0 : i32
    return %c0_i32, %c0_i32_0, %c0_i32_1 : i32, i32, i32
  }
  func.func @transform_4(%arg0: i32) -> (i32, i32) {
    %c0_i32 = arith.constant 0 : i32
    %c0_i32_0 = arith.constant 0 : i32
    %c0_i32_1 = arith.constant 0 : i32
    return %c0_i32, %c0_i32_0 : i32, i32
  }
  func.func @transform_5(%arg0: i32) -> (i32, i32) {
    %c0_i32 = arith.constant 0 : i32
    %c0_i32_0 = arith.constant 0 : i32
    %c0_i32_1 = arith.constant 0 : i32
    return %c0_i32, %c0_i32_0 : i32, i32
  }
  func.func @transform_6(%arg0: i32) -> (i32, i32, i32) {
    %c0_i32 = arith.constant 0 : i32
    %c0_i32_0 = arith.constant 0 : i32
    %c0_i32_1 = arith.constant 0 : i32
    %c0_i32_2 = arith.constant 0 : i32
    return %c0_i32, %c0_i32_0, %c0_i32_1 : i32, i32, i32
  }
  func.func @transform_7(%arg0: i32) -> (i32, i32) {
    %c0_i32 = arith.constant 0 : i32
    %c0_i32_0 = arith.constant 0 : i32
    %c0_i32_1 = arith.constant 0 : i32
    return %c0_i32, %c0_i32_0 : i32, i32
  }
  func.func @transform_8(%arg0: i32) -> (i32, i32, i32) {
    %c0_i32 = arith.constant 0 : i32
    %c0_i32_0 = arith.constant 0 : i32
    %c0_i32_1 = arith.constant 0 : i32
    %c0_i32_2 = arith.constant 0 : i32
    return %c0_i32, %c0_i32_0, %c0_i32_1 : i32, i32, i32
  }
  func.func @transform_9(%arg0: i32) -> (i32, i32) {
    %c0_i32 = arith.constant 0 : i32
    %c0_i32_0 = arith.constant 0 : i32
    %c0_i32_1 = arith.constant 0 : i32
    return %c0_i32, %c0_i32_0 : i32, i32
  }
  func.func @transform_10(%arg0: i32) -> (i32, i32) {
    %c0_i32 = arith.constant 0 : i32
    %c0_i32_0 = arith.constant 0 : i32
    %c0_i32_1 = arith.constant 0 : i32
    return %c0_i32, %c0_i32_0 : i32, i32
  }
  func.func @transform_11(%arg0: i32) -> (i32, i32) {
    %c0_i32 = arith.constant 0 : i32
    %c0_i32_0 = arith.constant 0 : i32
    %c0_i32_1 = arith.constant 0 : i32
    return %c0_i32, %c0_i32_0 : i32, i32
  }
  func.func @transform_12(%arg0: i32) -> (i32, i32, i32) {
    %c0_i32 = arith.constant 0 : i32
    %c0_i32_0 = arith.constant 0 : i32
    %c0_i32_1 = arith.constant 0 : i32
    return %arg0, %c0_i32, %c0_i32_0 : i32, i32, i32
  }
}

</mosaic_0001>

<bundles_post_ra>
// kernel: tpu_custom_call.1
= control target key start
LH: loop header
LB: loop body
LE: loop exit
PB: predicated region body
PF: predicated region fallthrough
CT: control target
= control target key end

     0   :  { %s6824_s0 = inlined_call_operand.hbm [shape: f32[2,32,128], index: 0, kind: input, shape index: {}]   ;;  %s6825_s1 = inlined_call_operand.hbm [shape: f32[128,256], index: 1, kind: input, shape index: {}]   ;;  %s6826_s2 = inlined_call_operand.vmem [shape: f32[1,256], index: 2, kind: input, shape index: {}]   ;;  %s6827_s3 = inlined_call_operand.hbm [shape: f32[9,128,128], index: 3, kind: input, shape index: {}]   ;;  %s6828_s4 = inlined_call_operand.vmem [shape: f32[1,128], index: 4, kind: input, shape index: {}]   ;;  %s6829_s5 = inlined_call_operand.hbm [shape: f32[128,128], index: 5, kind: input, shape index: {}]   ;;  %s6830_s6 = inlined_call_operand.hbm [shape: f32[4,128,128], index: 6, kind: input, shape index: {}]   ;;  %s6831_s7 = inlined_call_operand.vmem [shape: f32[1,128], index: 7, kind: input, shape index: {}]   ;;  %s6832_s8 = inlined_call_operand.hbm [shape: f32[9,128,128], index: 8, kind: input, shape index: {}]   ;;  %s6833_s9 = inlined_call_operand.vmem [shape: f32[1,128], index: 9, kind: input, shape index: {}]   ;;  %s6834_s10 = inlined_call_operand.hbm [shape: f32[128,128], index: 10, kind: input, shape index: {}]   ;;  %s6835_s11 = inlined_call_operand.vmem [shape: f32[1,128], index: 11, kind: input, shape index: {}]   ;;  %s6836_s12 = inlined_call_operand.hbm [shape: f32[2,32,128], index: 12, kind: output, shape index: {}]  }
   0x1   :  { %6842 = sst [smem:[#allocation23_spill]] %s6825_s1 }
   0x2   :  { %6843 = sst [smem:[#allocation24_spill]] %s6828_s4 }
   0x3   :  { %6844 = sst [smem:[#allocation25_spill]] %s6833_s9 }
   0x4   :  { %6845 = sst [smem:[#allocation26_spill]] %s6835_s11 }
   0x5   :  { %6846 = sst [smem:[#allocation27_spill]] %s6836_s12 }
   0x6   :  { %17 = vsyncpa [#allocation6], 0 }
   0x7   :  { %19 = vsyncpa [#allocation6 + $0x1], 0 }
   0x8   :  { %20 = vsyncpa [#allocation9], 0 }
   0x9   :  { %21 = vsyncpa [#allocation12], 0 }
   0xa   :  { %22 = vsyncpa [#allocation15], 0 }
   0xb   :  { %23 = vsyncpa [#allocation7], 0 }
   0xc   :  { %25 = vsyncpa [#allocation7 + $0x1], 0  ;;  %s6292_s21 = smov 0   ;;  %s6294_s22 = smov 0  }
   0xd   :  { %s6296_s23 = smov 0   ;;  %s6298_s24 = smov 0  }
   0xe LB: > { %s6211_s25 = smov [#allocation8]   ;;  %s6313_s27 = sadd.s32 4294967295, %s6209_s24   ;;  %s6209_s24 = sphi %s6298_s24, %s6876_s24   ;;  %s6205_s23 = sphi %s6296_s23, %s6875_s23   ;;  %s6201_s22 = sphi %s6294_s22, %s6874_s22   ;;  %s6197_s21 = sphi %s6292_s21, %s6873_s21  }
   0xf   : > { %s331_s26 = sshll.u32 %s6211_s25, 4  ;;  %p3507_p0 = scmp.ge.s32.totalorder %s6209_s24, 1  ;;  %s6319_s26 = int_to_ptr.vmem [resolvable:$true] %s331_s26 }
  0x10   : > { %p6838_p1 = scmp.eq.s32.totalorder %s6313_s27, 0  ;;  %p319_p2 = scmp.lt.s32.totalorder %s6209_s24, 3 }
  0x11   : > { %s6212_s30 = smov [#allocation11]   ;;  %s6213_s14 = smov [#allocation14]  }
  0x12   : > { %p6321_p4 = pnand %p3507_p0, %p319_p2  ;;  %s363_s13 = sshll.u32 %s6212_s30, 4  ;;  %s6334_s13 = int_to_ptr.vmem [resolvable:$true] %s363_s13 }
  0x13   : > { %s6336_s15 = sshll.u32 %s6213_s14, 4  ;;  %s6849_s1 = sld [smem:[#allocation23_spill]]  ;;  %s393_s15 = int_to_ptr.vmem [resolvable:$true] %s6336_s15 }
  0x14   : > { %s6847_s28 = scalar_select %p6321_p4, 1, 0 }
  0x15   : > { %p5839_p6 = pneg %p6321_p4 }
  0x17   : > { %p6330_p7 = pnand %p5839_p6, %p6838_p1 }
  0x19   : > { %s5933_s18 = scalar_lea.hbm %s6849_s1, 4096  ;;  %p6346_p9 = pneg %p6330_p7 }
  0x1a   : > { %p5934_p8 = scmp.ne.s32.totalorder %s6849_s1, %s5933_s18  ;;  %p5940_p12 = scmp.lt.u32.totalorder %s5933_s18, %s6849_s1 }
  0x1c   : > { %p5936_p10 = pnand %p6346_p9, %p5934_p8 }
  0x1e   : > { %p5937_p11 = pneg %p5936_p10 }
  0x20   : > { %p5942_p13 = pnand %p5940_p12, %p5937_p11 }
  0x22   : > { %5945 = shalt.err (!%p5942_p13)
}
  0x23   : > { %s5946_s16 = scalar_lea.vmem %s6319_s26, 4096  ;;  %p5954_p5 = scmp.lt.s32.totalorder %s6319_s26, %s6319_s26 }
  0x24   : > { %p5947_p0 = scmp.ne.s32.totalorder %s6319_s26, %s5946_s16  ;;  %p5955_p3 = scmp.lt.s32.totalorder %s5946_s16, %s5946_s16 }
  0x26   : > { %p5949_p2 = pnand %p5947_p0, %p6346_p9  ;;  %p5956_p8 = por %p5955_p3, %p5954_p5 }
  0x28   : > { %p5950_p6 = pneg %p5949_p2 }
  0x2a   : > { %p5957_p10 = pnand %p5956_p8, %p5950_p6 }
  0x2c   : > { %5960 = shalt.err (!%p5957_p10)
}
  0x2d   : > { %s6214_s17 = smov 256   ;;  %s6215_s18 = smov 16  }
  0x2e   : > { %5842 = dma.hbm_to_vmem [thread:$0]  (!%p6330_p7), %s6849_s1, 4096, %s6319_s26, [#allocation9], %s6214_s17, %s6214_s17, %s6215_s18  }
  0x2f   : > { %s5961_s12 = scalar_lea.hbm %s6829_s5, 2048 }
  0x30   : > { %p5962_p3 = scmp.ne.s32.totalorder %s6829_s5, %s5961_s12  ;;  %p5968_p12 = scmp.lt.u32.totalorder %s5961_s12, %s6829_s5 }
  0x32   : > { %p5964_p5 = pnand %p5962_p3, %p6346_p9 }
  0x34   : > { %p5965_p11 = pneg %p5964_p5 }
  0x36   : > { %p5970_p13 = pnand %p5968_p12, %p5965_p11 }
  0x38   : > { %5973 = shalt.err (!%p5970_p13)
}
  0x39   : > { %s5974_s26 = scalar_lea.vmem %s6334_s13, 2048  ;;  %p5982_p8 = scmp.lt.s32.totalorder %s6334_s13, %s6334_s13 }
  0x3a   : > { %p5975_p0 = scmp.ne.s32.totalorder %s6334_s13, %s5974_s26  ;;  %p5983_p10 = scmp.lt.s32.totalorder %s5974_s26, %s5974_s26 }
  0x3c   : > { %p5977_p2 = pnand %p5975_p0, %p6346_p9  ;;  %p5984_p3 = por %p5983_p10, %p5982_p8 }
  0x3e   : > { %p5978_p6 = pneg %p5977_p2 }
  0x40   : > { %p5985_p5 = pnand %p5984_p3, %p5978_p6 }
  0x42   : > { %5988 = shalt.err (!%p5985_p5)
}
  0x43   : > { %s6840_s4 = smov 128   ;;  %s6217_s9 = smov 8  }
  0x44   : > { %5848 = dma.hbm_to_vmem [thread:$0]  (!%p6330_p7), %s6829_s5, 2048, %s6334_s13, [#allocation12], %s6840_s4, %s6840_s4, %s6217_s9  }
  0x45   : > { %s5989_s19 = scalar_lea.hbm %s6832_s8, 18432 }
  0x46   : > { %p5990_p11 = scmp.ne.s32.totalorder %s6832_s8, %s5989_s19  ;;  %p5996_p0 = scmp.lt.u32.totalorder %s5989_s19, %s6832_s8 }
  0x48   : > { %p5992_p12 = pnand %p5990_p11, %p6346_p9 }
  0x4a   : > { %p5993_p13 = pneg %p5992_p12 }
  0x4c   : > { %p5998_p2 = pnand %p5996_p0, %p5993_p13 }
  0x4e   : > { %6001 = shalt.err (!%p5998_p2)
}
  0x4f   : > { %s6002_s26 = scalar_lea.vmem %s393_s15, 18432  ;;  %p6010_p3 = scmp.lt.s32.totalorder %s393_s15, %s393_s15 }
  0x50   : > { %p6003_p6 = scmp.ne.s32.totalorder %s393_s15, %s6002_s26  ;;  %p6011_p5 = scmp.lt.s32.totalorder %s6002_s26, %s6002_s26 }
  0x52   : > { %p6005_p8 = pnand %p6003_p6, %p6346_p9  ;;  %p6012_p1 = por %p6011_p5, %p6010_p3 }
  0x54   : > { %p6006_p10 = pneg %p6005_p8 }
  0x56   : > { %p6013_p4 = pnand %p6012_p1, %p6006_p10 }
  0x58   : > { %6016 = shalt.err (!%p6013_p4)
}
  0x59   : > { %5854 = dma.hbm_to_vmem [thread:$0]  (!%p6330_p7), %s6832_s8, 18432, %s393_s15, [#allocation15], %s6840_s4, %s6840_s4, %s6217_s9  }
  0x5a   : > { %s6218_s12 = smov [#allocation10]   ;;  %s6219_s18 = smov [#allocation13]  }
  0x5b   : > { %s347_s17 = sshll.u32 %s6218_s12, 4  ;;  %s376_s19 = sshll.u32 %s6219_s18, 4  ;;  %s348_s17 = int_to_ptr.vmem [resolvable:$true] %s347_s17  ;;  %s377_s19 = int_to_ptr.vmem [resolvable:$true] %s376_s19 }
  0x5c   : > { %s6017_s14 = scalar_lea.hbm %s6827_s3, 18432 }
  0x5d   : > { %p6018_p1 = scmp.ne.s32.totalorder %s6827_s3, %s6017_s14  ;;  %p6024_p12 = scmp.lt.u32.totalorder %s6017_s14, %s6827_s3 }
  0x5f   : > { %p6020_p4 = pnand %p6018_p1, %p6346_p9 }
  0x61   : > { %p6021_p11 = pneg %p6020_p4 }
  0x63   : > { %p6026_p13 = pnand %p6024_p12, %p6021_p11 }
  0x65   : > { %6029 = shalt.err (!%p6026_p13)
}
  0x66   : > { %s6030_s15 = scalar_lea.vmem %s348_s17, 18432  ;;  %p6038_p8 = scmp.lt.s32.totalorder %s348_s17, %s348_s17 }
  0x67   : > { %p6031_p0 = scmp.ne.s32.totalorder %s348_s17, %s6030_s15  ;;  %p6039_p10 = scmp.lt.s32.totalorder %s6030_s15, %s6030_s15 }
  0x69   : > { %p6033_p2 = pnand %p6031_p0, %p6346_p9  ;;  %p6040_p3 = por %p6039_p10, %p6038_p8 }
  0x6b   : > { %p6034_p6 = pneg %p6033_p2 }
  0x6d   : > { %p6041_p5 = pnand %p6040_p3, %p6034_p6 }
  0x6f   : > { %6044 = shalt.err (!%p6041_p5)
}
  0x70   : > { %5845 = dma.hbm_to_vmem [thread:$0]  (!%p6330_p7), %s6827_s3, 18432, %s348_s17, [#allocation9], %s6840_s4, %s6840_s4, %s6217_s9  }
  0x71   : > { %s6045_s20 = scalar_lea.hbm %s6830_s6, 8192 }
  0x72   : > { %p6046_p1 = scmp.ne.s32.totalorder %s6830_s6, %s6045_s20  ;;  %p6052_p12 = scmp.lt.u32.totalorder %s6045_s20, %s6830_s6 }
  0x74   : > { %p6048_p4 = pnand %p6046_p1, %p6346_p9 }
  0x76   : > { %p6049_p11 = pneg %p6048_p4 }
  0x78   : > { %p6054_p13 = pnand %p6052_p12, %p6049_p11 }
  0x7a   : > { %6057 = shalt.err (!%p6054_p13)
}
  0x7b   : > { %s6058_s13 = scalar_lea.vmem %s377_s19, 8192  ;;  %p6066_p8 = scmp.lt.s32.totalorder %s377_s19, %s377_s19 }
  0x7c   : > { %p6059_p0 = scmp.ne.s32.totalorder %s377_s19, %s6058_s13  ;;  %p6067_p10 = scmp.lt.s32.totalorder %s6058_s13, %s6058_s13 }
  0x7e   : > { %p6061_p2 = pnand %p6059_p0, %p6346_p9  ;;  %p6068_p3 = por %p6067_p10, %p6066_p8 }
  0x80   : > { %p6062_p6 = pneg %p6061_p2 }
  0x82   : > { %p6069_p5 = pnand %p6068_p3, %p6062_p6 }
  0x84   : > { %6072 = shalt.err (!%p6069_p5)
}
  0x85   : > { %5851 = dma.hbm_to_vmem [thread:$0]  (!%p6330_p7), %s6830_s6, 8192, %s377_s19, [#allocation12], %s6840_s4, %s6840_s4, %s6217_s9  }
  0x86   : > { %s6220_s1 = smov [#allocation16]   ;;  %s6073_s20 = scalar_lea.hbm %s6834_s10, 2048 }
  0x87   : > { %s408_s11 = sshll.u32 %s6220_s1, 4  ;;  %p6074_p1 = scmp.ne.s32.totalorder %s6834_s10, %s6073_s20  ;;  %s409_s11 = int_to_ptr.vmem [resolvable:$true] %s408_s11 }
  0x88   : > { %p6080_p12 = scmp.lt.u32.totalorder %s6073_s20, %s6834_s10 }
  0x89   : > { %p6076_p4 = pnand %p6074_p1, %p6346_p9 }
  0x8b   : > { %p6077_p11 = pneg %p6076_p4 }
  0x8d   : > { %p6082_p13 = pnand %p6080_p12, %p6077_p11 }
  0x8f   : > { %6085 = shalt.err (!%p6082_p13)
}
  0x90   : > { %s6086_s19 = scalar_lea.vmem %s409_s11, 2048  ;;  %p6094_p8 = scmp.lt.s32.totalorder %s409_s11, %s409_s11 }
  0x91   : > { %p6087_p0 = scmp.ne.s32.totalorder %s409_s11, %s6086_s19  ;;  %p6095_p10 = scmp.lt.s32.totalorder %s6086_s19, %s6086_s19 }
  0x93   : > { %p6089_p2 = pnand %p6087_p0, %p6346_p9  ;;  %p6096_p3 = por %p6095_p10, %p6094_p8 }
  0x95   : > { %p6090_p6 = pneg %p6089_p2 }
  0x97   : > { %p6097_p5 = pnand %p6096_p3, %p6090_p6 }
  0x99   : > { %6100 = shalt.err (!%p6097_p5)
}
  0x9a   : > { %5857 = dma.hbm_to_vmem [thread:$0]  (!%p6330_p7), %s6834_s10, 2048, %s409_s11, [#allocation15], %s6840_s4, %s6840_s4, %s6217_s9  }
  0x9b   : > { %s3506_s29 = sadd.s32 4294967294, %s6209_s24   ;;  %s6480_s25 = sadd.s32 1, %s6209_s24  }
  0x9c   : > { %s35_s15 = ssub.s32 %s6209_s24, %s6480_s25  ;;  %s38_s1 = sadd.s32 1, %s6205_s23 }
  0x9d   : > { %p36_p9 = scmp.eq.s32.totalorder %s35_s15, 0  ;;  %p45_p1 = scmp.ne.s32.totalorder %s6205_s23, %s6201_s22 }
  0x9e   : > { %p46_p4 = scmp.eq.s32.totalorder %s6209_s24, 0  ;;  %p51_p11 = scmp.ne.s32.totalorder %s6201_s22, %s6197_s21 }
  0x9f   : > { %s6491_s12 = scalar_select %p36_p9, %s6205_s23, %s38_s1  }
  0xa0   : > { %p6493_p12 = por %p46_p4, %p45_p1  ;;  %p6852_p13 = scmp.eq.s32.totalorder %s6313_s27, 0 }
  0xa1   : > { %p306_p0 = scmp.eq.s32.totalorder %s6313_s27, 1  ;;  %p312_p2 = scmp.eq.s32.totalorder %s3506_s29, 1 }
  0xa2   : > { %p6499_p7 = por %p6852_p13, %p51_p11  ;;  %p5872_p6 = scmp.lt.s32.totalorder %s6209_s24, 2 }
  0xa3   : > { %s425_s20 = sand.u32 1, %s6205_s23   ;;  %p6506_p8 = por %p306_p0, %p45_p1 }
  0xa4   : > { %p6510_p10 = por %p312_p2, %p51_p11  ;;  %s3515_s16 = sshll.u32 %s425_s20, 5 }
  0xa5   : > { %s6854_s30 = scalar_select %p6506_p8, 1, 0 }
  0xa6   : > { %s6855_s14 = scalar_select %p6510_p10, 1, 0 }
  0xa7   : > { %s3537_s26 = sshll.u32 %s6209_s24, 9  ;;  %s429_s29 = scalar_lea.vmem [#allocation5], %s3515_s16 }
  0xa8   : > { %s6518_s17 = scalar_lea.hbm %s6824_s0, %s3537_s26  ;;  %s436_s15 = sshll.u32 %s429_s29, 4  ;;  %s6520_s15 = int_to_ptr.vmem [resolvable:$true] %s436_s15 }
  0xa9   : > { %p6524_p3 = pnand %p5872_p6, %p6493_p12  ;;  %s6528_s4 = scalar_lea.sflag [#allocation6], %s425_s20 }
  0xaa   : > { %s6101_s19 = scalar_lea.hbm %s6518_s17, 512  ;;  %s6106_s18 = scalar_lea.hbm %s6824_s0, 1024 }
  0xab   : > { %p6102_p5 = scmp.ne.s32.totalorder %s6518_s17, %s6101_s19  ;;  %p6103_p9 = pneg %p6524_p3 }
  0xac   : > { %p6107_p11 = scmp.lt.u32.totalorder %s6518_s17, %s6824_s0  ;;  %p6108_p12 = scmp.lt.u32.totalorder %s6106_s18, %s6101_s19 }
  0xad   : > { %p6104_p1 = pnand %p6103_p9, %p6102_p5  ;;  %p6110_p0 = scmp.lt.u32.totalorder %s6101_s19, %s6518_s17 }
  0xae   : > { %p6109_p13 = por %p6108_p12, %p6107_p11 }
  0xaf   : > { %p6105_p4 = pneg %p6104_p1 }
  0xb0   : > { %p6111_p2 = por %p6110_p0, %p6109_p13 }
  0xb2   : > { %p6112_p6 = pnand %p6111_p2, %p6105_p4 }
  0xb4   : > { %6115 = shalt.err (!%p6112_p6)
}
  0xb5   : > { %s6116_s20 = scalar_lea.vmem %s6520_s15, 512  ;;  %s6221_s16 = smov [#allocation5]  }
  0xb6   : > { %p6117_p5 = scmp.ne.s32.totalorder %s6520_s15, %s6116_s20  ;;  %s6121_s26 = sshll.u32 %s6221_s16, 4  ;;  %s6122_s26 = int_to_ptr.vmem [resolvable:$false] %s6121_s26 }
  0xb7   : > { %s6123_s13 = scalar_lea.vmem %s6122_s26, 1024  ;;  %p6124_p8 = scmp.lt.s32.totalorder %s6520_s15, %s6122_s26 }
  0xb8   : > { %p6119_p1 = pnand %p6117_p5, %p6103_p9  ;;  %p6125_p11 = scmp.lt.s32.totalorder %s6123_s13, %s6116_s20 }
  0xba   : > { %p6120_p10 = pneg %p6119_p1  ;;  %p6126_p12 = por %p6125_p11, %p6124_p8 }
  0xbc   : > { %p6127_p13 = pnand %p6126_p12, %p6120_p10 }
  0xbe   : > { %6130 = shalt.err (!%p6127_p13)
}
  0xbf   : > { %s6857_s19 = smov 128   ;;  %p6858_p9 = scmp.ne.s32.totalorder %s6847_s28, 0 }
  0xc0   : > { %5861 = dma.hbm_to_vmem [thread:$0]  (!%p6524_p3), %s6518_s17, 512, %s6520_s15, %s6528_s4, %s6857_s19, %s6857_s19, %s6217_s9  }
  0xc1   : > { %448 = sbr.rel (%p6858_p9) target bundleno = 1517 (0x5ed), region = 68  ;;  %s6562_s18 = sand.u32 (!%p6858_p9), 1, %s6201_s22  }
  0xc2   : > { %s3519_s29 = sshll.u32 (!%p6858_p9), %s6562_s18, 5  ;;  %s451_s20 = scalar_lea.sflag (!%p6858_p9), [#allocation6], %s6562_s18 }
  0xc3   : > { %s6566_s16 = scalar_lea.vmem (!%p6858_p9), [#allocation5], %s3519_s29 }
  0xc8   : > { %6176 = dma.done.wait (%p6499_p7), %s451_s20, 512  }
  0xc9   : > { %6178 = vsyncadd (%p6499_p7), %s451_s20, 4294966784  ;;  %p6859_p8 = scmp.eq.s32.totalorder %s6313_s27, 0 }
  0xcb   : > { %6180 = dma.done.wait (%p6859_p8), [#allocation9], 22528   ;;  %p6860_p10 = pmov %p6859_p8 }
  0xcc   : > { %p6861_p3 = pmov %p6859_p8 }
  0xcd   : > { %6182 = vsyncadd (%p6860_p10), [#allocation9], 4294944768 }
  0xce   : > { %6184 = dma.done.wait (%p6861_p3), [#allocation12], 10240   ;;  %p6862_p4 = pmov %p6861_p3 }
  0xcf   : > { %p6863_p0 = pmov %p6861_p3 }
  0xd0   : > { %6186 = vsyncadd (%p6862_p4), [#allocation12], 4294957056 }
  0xd1   : > { %6188 = dma.done.wait (%p6863_p0), [#allocation15], 20480   ;;  %p6864_p2 = pmov %p6863_p0 }
  0xd2   : > { %s6584_s28 = scalar_lea.vmem [#allocation17], %s3519_s29  ;;  %p6865_p7 = scmp.ne.s32.totalorder %s6313_s27, 0 }
  0xd3   : > { %6190 = vsyncadd (%p6864_p2), [#allocation15], 4294946816  ;;  %v6222_v0 = vmov (!%p6865_p7), 0.0  }
  0xd4   : > { %522 = sbr.rel (%p6865_p7) target bundleno = 231 (0xe7), region = 100  ;;  %523 = vst [vmem:[#allocation2] sm:$0xff] (!%p6865_p7), %v6222_v0  ;;  %524 = vst [vmem:[#allocation2 + $0x8] sm:$0x3] (!%p6865_p7), %v6222_v0 }
  0xd5   : > { %525 = vst [vmem:[#allocation2 + $0x10] sm:$0xff] (!%p6865_p7), %v6222_v0  ;;  %526 = vst [vmem:[#allocation2 + $0x18] sm:$0x3] (!%p6865_p7), %v6222_v0 }
  0xd6   : > { %527 = vst [vmem:[#allocation2 + $0x20] sm:$0xff] (!%p6865_p7), %v6222_v0  ;;  %528 = vst [vmem:[#allocation2 + $0x28] sm:$0x3] (!%p6865_p7), %v6222_v0 }
  0xd7   : > { %529 = vst [vmem:[#allocation2 + $0x30] sm:$0xff] (!%p6865_p7), %v6222_v0  ;;  %530 = vst [vmem:[#allocation2 + $0x38] sm:$0x3] (!%p6865_p7), %v6222_v0 }
  0xd8   : > { %531 = vst [vmem:[#allocation2 + $0x40] sm:$0xff] (!%p6865_p7), %v6222_v0  ;;  %532 = vst [vmem:[#allocation2 + $0x48] sm:$0x3] (!%p6865_p7), %v6222_v0 }
  0xd9   : > { %533 = vst [vmem:[#allocation2 + $0x50] sm:$0xff] (!%p6865_p7), %v6222_v0  ;;  %534 = vst [vmem:[#allocation2 + $0x58] sm:$0x3] (!%p6865_p7), %v6222_v0 }
  0xda   : > { %535 = vst [vmem:[#allocation3] sm:$0xff] (!%p6865_p7), %v6222_v0  ;;  %536 = vst [vmem:[#allocation3 + $0x8] sm:$0x1] (!%p6865_p7), %v6222_v0 }
  0xdb   : > { %537 = vst [vmem:[#allocation3 + $0x10] sm:$0xff] %v6222_v0  ;;  %538 = vst [vmem:[#allocation3 + $0x18] sm:$0x1] %v6222_v0 }
  0xdc   : > { %539 = vst [vmem:[#allocation3 + $0x20] sm:$0xff] %v6222_v0  ;;  %540 = vst [vmem:[#allocation3 + $0x28] sm:$0x1] %v6222_v0 }
  0xdd   : > { %541 = vst [vmem:[#allocation3 + $0x30] sm:$0xff] %v6222_v0  ;;  %542 = vst [vmem:[#allocation3 + $0x38] sm:$0x1] %v6222_v0 }
  0xde   : > { %543 = vst [vmem:[#allocation3 + $0x40] sm:$0xff] %v6222_v0  ;;  %544 = vst [vmem:[#allocation3 + $0x48] sm:$0x1] %v6222_v0 }
  0xdf   : > { %545 = vst [vmem:[#allocation4] sm:$0xff] %v6222_v0  ;;  %546 = vst [vmem:[#allocation4 + $0x8] sm:$0xf] %v6222_v0 }
  0xe0   : > { %547 = vst [vmem:[#allocation4 + $0x10] sm:$0xff] %v6222_v0  ;;  %548 = vst [vmem:[#allocation4 + $0x18] sm:$0xf] %v6222_v0 }
  0xe1   : > { %549 = vst [vmem:[#allocation4 + $0x20] sm:$0xff] %v6222_v0  ;;  %550 = vst [vmem:[#allocation4 + $0x28] sm:$0xf] %v6222_v0 }
  0xe2   : > { %551 = vst [vmem:[#allocation4 + $0x30] sm:$0xff] %v6222_v0  ;;  %552 = vst [vmem:[#allocation4 + $0x38] sm:$0xf] %v6222_v0 }
  0xe3   : > { %553 = vst [vmem:[#allocation4 + $0x40] sm:$0xff] %v6222_v0  ;;  %554 = vst [vmem:[#allocation4 + $0x48] sm:$0xf] %v6222_v0 }
  0xe4   : > { %555 = vst [vmem:[#allocation4 + $0x50] sm:$0xff] %v6222_v0  ;;  %556 = vst [vmem:[#allocation4 + $0x58] sm:$0xf] %v6222_v0 }
  0xe5   : > { %557 = vst [vmem:[#allocation4 + $0x60] sm:$0xff] %v6222_v0  ;;  %558 = vst [vmem:[#allocation4 + $0x68] sm:$0xf] %v6222_v0 }
  0xe6   : > { %559 = vst [vmem:[#allocation4 + $0x70] sm:$0xff] %v6222_v0  ;;  %560 = vst [vmem:[#allocation4 + $0x78] sm:$0xf] %v6222_v0 }
  0xe7 PF: > { %v566_v1 = vld [vmem:[#allocation8 + $0x8] sm:$0xff]  ;;  %v568_v2 = vld [vmem:[#allocation8 + $0x18] sm:$0xff]  ;;  %v565_v3 = vld [vmem:[#allocation8] sm:$0xff]  ;;  %v6223_v8 = vmov 0.0   ;;  %s6866_s26 = sld [smem:[#allocation25_spill]]  ;;  %s6867_s29 = sld [smem:[#allocation24_spill]] }
  0xe8   : > { %v4931_v4 = vpack.c.bf16 %v568_v2, %v566_v1  ;;  %v567_v5 = vld [vmem:[#allocation8 + $0x10] sm:$0xff]  ;;  %v570_v6 = vld [vmem:[#allocation8 + $0x28] sm:$0xff]  ;;  %v572_v7 = vld [vmem:[#allocation8 + $0x38] sm:$0xff]  ;;  %673 = vmatprep.mubr.f32.mxu1 %v6223_v8  ;;  %s6868_s9 = sld [smem:[#allocation26_spill]]  ;;  %s3538_s11 = sshll.u32 %s6313_s27, 9 }
  0xe9   : > { %v4933_v9 = vpack.c.bf16 %v567_v5, %v565_v3  ;;  %v4935_v10 = vpack.c.bf16 %v572_v7, %v570_v6  ;;  %v569_v11 = vld [vmem:[#allocation8 + $0x20] sm:$0xff]  ;;  %v571_v12 = vld [vmem:[#allocation8 + $0x30] sm:$0xff]  ;;  %v574_v13 = vld [vmem:[#allocation8 + $0x48] sm:$0xff]  ;;  %s3376_s17 = sshll.u32 %s6584_s28, 4  ;;  %s3363_s27 = scalar_lea.sflag [#allocation7], %s6562_s18  ;;  %s6777_s17 = int_to_ptr.vmem [resolvable:$true] %s3376_s17 }
  0xea   : > { %4932 = vmatprep.subr.bf16.mxu1 %v4931_v4  ;;  %v576_v14 = vld [vmem:[#allocation8 + $0x58] sm:$0xff]  ;;  %v4937_v15 = vpack.c.bf16 %v571_v12, %v569_v11  ;;  %v573_v17 = vld [vmem:[#allocation8 + $0x40] sm:$0xff]  ;;  %v575_v18 = vld [vmem:[#allocation8 + $0x50] sm:$0xff]  ;;  %s6131_s19 = scalar_lea.vmem %s6777_s17, 512  ;;  %p6870_p5 = scmp.ne.s32.totalorder %s6854_s30, 0 }
  0xeb   : > { %4934 = vmatpush1.bf16.msra.mxu1 %v4933_v9  ;;  %v4939_v16 = vpack.c.bf16 %v576_v14, %v574_v13  ;;  %v578_v19 = vld [vmem:[#allocation8 + $0x68] sm:$0xff]  ;;  %v580_v20 = vld [vmem:[#allocation8 + $0x78] sm:$0xff]  ;;  %v4941_v21 = vpack.c.bf16 %v575_v18, %v573_v17  ;;  %v577_v23 = vld [vmem:[#allocation8 + $0x60] sm:$0xff]  ;;  %p6132_p6 = scmp.ne.s32.totalorder %s6777_s17, %s6131_s19 }
  0xec   : > { %4936 = vmatprep.subr.bf16.mxu1 %v4935_v10  ;;  %v4943_v22 = vpack.c.bf16 %v580_v20, %v578_v19  ;;  %v579_v24 = vld [vmem:[#allocation8 + $0x70] sm:$0xff]  ;;  %v582_v25 = vld [vmem:[#allocation8 + $0x88] sm:$0xff]  ;;  %v584_v26 = vld [vmem:[#allocation8 + $0x98] sm:$0xff] }
  0xed   : > { %v4945_v27 = vpack.c.bf16 %v579_v24, %v577_v23  ;;  %v581_v28 = vld [vmem:[#allocation8 + $0x80] sm:$0xff]  ;;  %v4947_v29 = vpack.c.bf16 %v584_v26, %v582_v25  ;;  %v583_v30 = vld [vmem:[#allocation8 + $0x90] sm:$0xff]  ;;  %v1742_v32 = vld [vmem:[#allocation13 + $0x88] sm:$0xff]  ;;  %p6133_p1 = pnand %p6132_p6, %p6870_p5 }
  0xee   : > { %v1741_v31 = vld [vmem:[#allocation13 + $0x80] sm:$0xff]  ;;  %v586_v33 = vld [vmem:[#allocation8 + $0xa8] sm:$0xff]  ;;  %v588_v34 = vld [vmem:[#allocation8 + $0xb8] sm:$0xff]  ;;  %v4949_v38 = vpack.c.bf16 %v583_v30, %v581_v28 }
  0xef   : > { %4938 = vmatpush1.bf16.msra.mxu1 %v4937_v15  ;;  %v5251_v35 = vpack.c.bf16 %v1742_v32, %v1741_v31  ;;  %v1743_v36 = vld [vmem:[#allocation13 + $0x90] sm:$0xff]  ;;  %v1744_v37 = vld [vmem:[#allocation13 + $0x98] sm:$0xff]  ;;  %v1745_v40 = vld [vmem:[#allocation13 + $0xa0] sm:$0xff]  ;;  %v4951_v42 = vpack.c.bf16 %v588_v34, %v586_v33  ;;  %p6134_p11 = pneg %p6133_p1 }
  0xf0   : > { %4940 = vmatprep.subr.bf16.mxu1 %v4939_v16  ;;  %v5255_v39 = vpack.c.bf16 %v1744_v37, %v1743_v36  ;;  %v1746_v41 = vld [vmem:[#allocation13 + $0xa8] sm:$0xff]  ;;  %v585_v43 = vld [vmem:[#allocation8 + $0xa0] sm:$0xff]  ;;  %v587_v44 = vld [vmem:[#allocation8 + $0xb0] sm:$0xff] }
  0xf1   : > { %5252 = vmatprep.subr.bf16.mxu0 %v5251_v35  ;;  %v590_v45 = vld [vmem:[#allocation8 + $0xc8] sm:$0xff]  ;;  %v592_v46 = vld [vmem:[#allocation8 + $0xd8] sm:$0xff]  ;;  %v5259_v47 = vpack.c.bf16 %v1746_v41, %v1745_v40  ;;  %v1747_v48 = vld [vmem:[#allocation13 + $0xb0] sm:$0xff]  ;;  %v4953_v50 = vpack.c.bf16 %v587_v44, %v585_v43 }
  0xf2   : > { %5254 = vmatpush3.bf16.msra.mxu0 %v5251_v35  ;;  %v1748_v49 = vld [vmem:[#allocation13 + $0xb8] sm:$0xff]  ;;  %v4955_v51 = vpack.c.bf16 %v592_v46, %v590_v45  ;;  %v589_v52 = vld [vmem:[#allocation8 + $0xc0] sm:$0xff]  ;;  %v591_v53 = vld [vmem:[#allocation8 + $0xd0] sm:$0xff]  ;;  %v599_v45 = vlaneseq }
  0xf3   : > { %4942 = vmatpush1.bf16.msra.mxu1 %v4941_v21  ;;  %5256 = vmatprep.subr.bf16.mxu0 %v5255_v39  ;;  %v594_v54 = vld [vmem:[#allocation8 + $0xe8] sm:$0xff]  ;;  %v596_v55 = vld [vmem:[#allocation8 + $0xf8] sm:$0xff]  ;;  %v5263_v56 = vpack.c.bf16 %v1748_v49, %v1747_v48  ;;  %v1749_v57 = vld [vmem:[#allocation13 + $0xc0] sm:$0xff]  ;;  %v4957_v59 = vpack.c.bf16 %v591_v53, %v589_v52 }
  0xf4   : > { %4944 = vmatprep.subr.bf16.mxu1 %v4943_v22  ;;  %v1750_v58 = vld [vmem:[#allocation13 + $0xc8] sm:$0xff]  ;;  %v4959_v60 = vpack.c.bf16 %v596_v55, %v594_v54  ;;  %v593_v61 = vld [vmem:[#allocation8 + $0xe0] sm:$0xff]  ;;  %v595_v62 = vld [vmem:[#allocation8 + $0xf0] sm:$0xff]  ;;  %v600_v46 = vshrl.u32 %v599_v45, 7 }
  0xf5   : > { %v728_v63 = vld [vmem:[#allocation10 + $0x80] sm:$0xff]  ;;  %v729_v0 = vld [vmem:[#allocation10 + $0x88] sm:$0xff]  ;;  %v5267_v1 = vpack.c.bf16 %v1750_v58, %v1749_v57  ;;  %v4961_v2 = vpack.c.bf16 %v595_v62, %v593_v61  ;;  %v730_v4 = vld [vmem:[#allocation10 + $0x90] sm:$0xff] }
  0xf6   : > { %5258 = vmatpush3.bf16.msra.mxu0 %v5255_v39  ;;  %v4963_v3 = vpack.c.bf16 %v729_v0, %v728_v63  ;;  %v731_v5 = vld [vmem:[#allocation10 + $0x98] sm:$0xff]  ;;  %v561_v6 = vld [vmem:[%s6566_s16] sm:$0xff]  ;;  %v733_v10 = vld [vmem:[#allocation10 + $0xa8] sm:$0xff]  ;;  %v605_v49 = vsub.s32 1, %v600_v46 }
  0xf7   : > { %4946 = vmatpush1.bf16.msra.mxu1 %v4945_v27  ;;  %5260 = vmatprep.subr.bf16.mxu0 %v5259_v47  ;;  %v4967_v7 = vpack.c.bf16 %v731_v5, %v730_v4  ;;  %v732_v9 = vld [vmem:[#allocation10 + $0xa0] sm:$0xff]  ;;  %v562_v11 = vld [vmem:[%s6566_s16 + $0x8] sm:$0xff]  ;;  %v734_v13 = vld [vmem:[#allocation10 + $0xb0] sm:$0xff] }
  0xf8   : > { %4948 = vmatprep.subr.bf16.mxu1 %v4947_v29  ;;  %v4971_v12 = vpack.c.bf16 %v733_v10, %v732_v9  ;;  %v735_v14 = vld [vmem:[#allocation10 + $0xb8] sm:$0xff]  ;;  %v563_v15 = vld [vmem:[%s6566_s16 + $0x10] sm:$0xff]  ;;  %v736_v17 = vld [vmem:[#allocation10 + $0xc0] sm:$0xff] }
  0xf9   : > { %v4975_v16 = vpack.c.bf16 %v735_v14, %v734_v13  ;;  %v737_v18 = vld [vmem:[#allocation10 + $0xc8] sm:$0xff]  ;;  %v564_v19 = vld [vmem:[%s6566_s16 + $0x18] sm:$0xff]  ;;  %v738_v21 = vld [vmem:[#allocation10 + $0xd0] sm:$0xff] }
  0xfa   : > { %5262 = vmatpush3.bf16.msra.mxu0 %v5259_v47  ;;  %v4979_v20 = vpack.c.bf16 %v737_v18, %v736_v17  ;;  %v739_v22 = vld [vmem:[#allocation10 + $0xd8] sm:$0xff]  ;;  %v740_v24 = vld [vmem:[#allocation10 + $0xe0] sm:$0xff]  ;;  %v741_v25 = vld [vmem:[#allocation10 + $0xe8] sm:$0xff]  ;;  %v601_v47 = vsub.s32 0, %v600_v46 }
  0xfb   : > { %4950 = vmatpush1.bf16.msra.mxu1 %v4949_v38  ;;  %5264 = vmatprep.subr.bf16.mxu0 %v5263_v56  ;;  %v4983_v23 = vpack.c.bf16 %v739_v22, %v738_v21  ;;  %v4987_v26 = vpack.c.bf16 %v741_v25, %v740_v24  ;;  %v742_v27 = vld [vmem:[#allocation10 + $0xf0] sm:$0xff]  ;;  %v707_v29 = vld [vmem:[#allocation10] sm:$0xff]  ;;  %v708_v30 = vld [vmem:[#allocation10 + $0x8] sm:$0xff] }
  0xfc   : > { %4952 = vmatprep.subr.bf16.mxu1 %v4951_v42  ;;  %v1751_v31 = vld [vmem:[#allocation13 + $0xd0] sm:$0xff]  ;;  %v1752_v32 = vld [vmem:[#allocation13 + $0xd8] sm:$0xff]  ;;  %v4995_v33 = vpack.c.bf16 %v708_v30, %v707_v29  ;;  %v1753_v36 = vld [vmem:[#allocation13 + $0xe0] sm:$0xff] }
  0xfd   : > { %v5271_v34 = vpack.c.bf16 %v1752_v32, %v1751_v31  ;;  %v723_v35 = vld [vmem:[#allocation2 + $0x1] sm:$0xff]  ;;  %v1754_v37 = vld [vmem:[#allocation13 + $0xe8] sm:$0xff]  ;;  %v1720_v42 = vld [vmem:[#allocation13] sm:$0xff] }
  0xfe   : > { %5266 = vmatpush3.bf16.msra.mxu0 %v5263_v56  ;;  %v5275_v38 = vpack.c.bf16 %v1754_v37, %v1753_v36  ;;  %v1755_v39 = vld [vmem:[#allocation13 + $0xf0] sm:$0xff]  ;;  %v1756_v40 = vld [vmem:[#allocation13 + $0xf8] sm:$0xff]  ;;  %v1721_v43 = vld [vmem:[#allocation13 + $0x8] sm:$0xff] }
  0xff   : > { %4954 = vmatpush1.bf16.msra.mxu1 %v4953_v50  ;;  %5268 = vmatprep.subr.bf16.mxu0 %v5267_v1  ;;  %v5279_v41 = vpack.c.bf16 %v1756_v40, %v1755_v39  ;;  %v6596_v44 = vpack.c.bf16 %v1721_v43, %v1720_v42  ;;  %v597_v48 = vld [vmem:[%s6826_s2] sm:$0x3]  ;;  %v710_v53 = vld [vmem:[#allocation10 + $0x18] sm:$0xff]  ;;  %v715_v10 = vld [vmem:[#allocation10 + $0x40] sm:$0xff] }
 0x100   : > { %4956 = vmatprep.subr.bf16.mxu1 %v4955_v51  ;;  %v602_v50 = vrot.slane %v597_v48, %v601_v47  ;;  %v606_v51 = vrot.slane %v597_v48, %v605_v49  ;;  %v709_v52 = vld [vmem:[#allocation10 + $0x10] sm:$0xff]  ;;  %v1724_v25 = vld [vmem:[#allocation13 + $0x20] sm:$0xff]  ;;  %v720_v29 = vld [vmem:[#allocation10 + $0x68] sm:$0xff] }
 0x101   : > { %v4999_v57 = vpack.c.bf16 %v710_v53, %v709_v52  ;;  %v1722_v14 = vld [vmem:[#allocation13 + $0x10] sm:$0xff]  ;;  %v1727_v32 = vld [vmem:[#allocation13 + $0x38] sm:$0xff]  ;;  %v1729_v39 = vld [vmem:[#allocation13 + $0x48] sm:$0xff] }
 0x102   : > { %5270 = vmatpush3.bf16.msra.mxu0 %v5267_v1  ;;  %v717_v22 = vld [vmem:[#allocation10 + $0x50] sm:$0xff]  ;;  %v722_v36 = vld [vmem:[#allocation10 + $0x78] sm:$0xff]  ;;  %v919_v42 = vld [vmem:[#allocation10 + $0x100] sm:$0xff] }
 0x103   : > { %4958 = vmatpush1.bf16.msra.mxu1 %v4957_v59  ;;  %5272 = vmatprep.subr.bf16.mxu0 %v5271_v34  ;;  %v711_v59 = vld [vmem:[#allocation10 + $0x20] sm:$0xff]  ;;  %v1726_v31 = vld [vmem:[#allocation13 + $0x30] sm:$0xff]  ;;  %v920_v43 = vld [vmem:[#allocation10 + $0x108] sm:$0xff] }
 0x104   : > { %4960 = vmatprep.subr.bf16.mxu1 %v4959_v60  ;;  %v712_v60 = vld [vmem:[#allocation10 + $0x28] sm:$0xff]  ;;  %v1731_v45 = vld [vmem:[#allocation13 + $0x58] sm:$0xff]  ;;  %v5027_v46 = vpack.c.bf16 %v920_v43, %v919_v42  ;;  %v921_v48 = vld [vmem:[#allocation10 + $0x110] sm:$0xff] }
 0x105   : > { %v5003_v0 = vpack.c.bf16 %v712_v60, %v711_v59  ;;  %v922_v49 = vld [vmem:[#allocation10 + $0x118] sm:$0xff]  ;;  %v1734_v59 = vld [vmem:[#allocation13 + $0x70] sm:$0xff] }
 0x106   : > { %5274 = vmatpush3.bf16.msra.mxu0 %v5271_v34  ;;  %v5031_v52 = vpack.c.bf16 %v922_v49, %v921_v48  ;;  %v1735_v60 = vld [vmem:[#allocation13 + $0x78] sm:$0xff]  ;;  %v1943_v42 = vld [vmem:[#allocation13 + $0x150] sm:$0xff]  ;;  %v1946_v48 = vld [vmem:[#allocation13 + $0x168] sm:$0xff] }
 0x107   : > { %4962 = vmatpush1.bf16.msra.mxu1 %v4961_v2  ;;  %5276 = vmatprep.subr.bf16.mxu0 %v5275_v38  ;;  %v713_v2 = vld [vmem:[#allocation10 + $0x30] sm:$0xff]  ;;  %v1944_v43 = vld [vmem:[#allocation13 + $0x158] sm:$0xff] }
 0x108   : > { %4964 = vmatprep.subr.bf16.mxu1 %v4963_v3 }
 0x10a   : > { %674 = vmatmul.mubr.f32.vlgmr.msra.gmra.mrb[0].mxu1 %v561_v6  ;;  %5278 = vmatpush3.bf16.msra.mxu0 %v5275_v38  ;;  %v1728_v38 = vld [vmem:[#allocation13 + $0x40] sm:$0xff] }
 0x10b   : > { %679 = vmatprep.mubr.f32.mxu1 %v6223_v8  ;;  %4966 = vmatpush3.bf16.msra.mxu1 %v4963_v3  ;;  %v714_v3 = vld [vmem:[#allocation10 + $0x38] sm:$0xff] }
 0x10c   : > { %4968 = vmatprep.subr.bf16.mxu1 %v4967_v7  ;;  %5280 = vmatprep.subr.bf16.mxu0 %v5279_v41 }
 0x10e   : > { %680 = vmatmul.mubr.f32.gmra.mrb[2].mxu1 %v562_v11  ;;  %5282 = vmatpush3.bf16.msra.mxu0 %v5279_v41  ;;  %v716_v11 = vld [vmem:[#allocation10 + $0x48] sm:$0xff]  ;;  %v5299_v41 = vpack.c.bf16 %v1729_v39, %v1728_v38 }
 0x10f   : > { %685 = vmatprep.mubr.f32.mxu1 %v6223_v8  ;;  %4970 = vmatpush3.bf16.msra.mxu1 %v4967_v7  ;;  %v5007_v7 = vpack.c.bf16 %v714_v3, %v713_v2  ;;  %v5311_v2 = vpack.c.bf16 %v1735_v60, %v1734_v59  ;;  %v925_v3 = vld [vmem:[#allocation10 + $0x130] sm:$0xff]  ;;  %v1948_v59 = vld [vmem:[#allocation13 + $0x178] sm:$0xff] }
 0x110   : > { %4972 = vmatprep.subr.bf16.mxu1 %v4971_v12  ;;  %5284 = vmatprep.subr.bf16.mxu0 %v6596_v44 }
 0x112   : > { %686 = vmatmul.mubr.f32.gmra.mrb[4].mxu1 %v563_v15  ;;  %v1723_v15 = vld [vmem:[#allocation13 + $0x18] sm:$0xff] }
 0x113   : > { %691 = vmatprep.mubr.f32.mxu1 %v6223_v8  ;;  %4974 = vmatpush3.bf16.msra.mxu1 %v4971_v12  ;;  %v743_v8 = vld [vmem:[#allocation10 + $0xf8] sm:$0xff]  ;;  %v703_v12 = vld [vmem:[#allocation2] sm:$0xff]  ;;  %v5287_v21 = vpack.c.bf16 %v1723_v15, %v1722_v14  ;;  %v928_v15 = vld [vmem:[#allocation10 + $0x148] sm:$0xff] }
 0x114   : > { %4976 = vmatprep.subr.bf16.mxu1 %v4975_v16  ;;  %v4991_v28 = vpack.c.bf16 %v743_v8, %v742_v27  ;;  %v1936_v14 = vld [vmem:[#allocation13 + $0x118] sm:$0xff] }
 0x116   : > { %692 = vmatmul.mubr.f32.gmra.mrb[6].mxu1 %v564_v19  ;;  %v5011_v19 = vpack.c.bf16 %v716_v11, %v715_v10 }
 0x117   : > { %4978 = vmatpush3.bf16.msra.mxu1 %v4975_v16  ;;  %4051 = vmatprep.mubr.f32.mxu1 %v723_v35  ;;  %v721_v35 = vld [vmem:[#allocation10 + $0x70] sm:$0xff] }
 0x118   : > { %4980 = vmatprep.subr.bf16.mxu1 %v4979_v20  ;;  %v5023_v40 = vpack.c.bf16 %v722_v36, %v721_v35  ;;  %v1941_v35 = vld [vmem:[#allocation13 + $0x140] sm:$0xff]  ;;  %v1942_v36 = vld [vmem:[#allocation13 + $0x148] sm:$0xff] }
 0x119   : > { %v5331_v39 = vpack.c.bf16 %v1942_v36, %v1941_v35  ;;  %v1139_v36 = vld [vmem:[#allocation10 + $0x200] sm:$0xff] }
 0x11b   : > { %4982 = vmatpush3.bf16.msra.mxu1 %v4979_v20 }
 0x11c   : > { %4984 = vmatprep.subr.bf16.mxu1 %v4983_v23 }
 0x11f   : > { %4986 = vmatpush3.bf16.msra.mxu1 %v4983_v23  ;;  %v718_v23 = vld [vmem:[#allocation10 + $0x58] sm:$0xff] }
 0x120   : > { %4988 = vmatprep.subr.bf16.mxu1 %v4987_v26  ;;  %v5015_v27 = vpack.c.bf16 %v718_v23, %v717_v22  ;;  %v1938_v22 = vld [vmem:[#allocation13 + $0x128] sm:$0xff]  ;;  %v930_v23 = vld [vmem:[#allocation10 + $0x158] sm:$0xff] }
 0x123   : > { %4990 = vmatpush3.bf16.msra.mxu1 %v4987_v26  ;;  %v1725_v26 = vld [vmem:[#allocation13 + $0x28] sm:$0xff] }
 0x124   : > { %4992 = vmatprep.subr.bf16.mxu1 %v4991_v28  ;;  %v5291_v8 = vpack.c.bf16 %v1725_v26, %v1724_v25 }
 0x127   : > { %4994 = vmatpush3.bf16.msra.mxu1 %v4991_v28  ;;  %v719_v28 = vld [vmem:[#allocation10 + $0x60] sm:$0xff] }
 0x128   : > { %4996 = vmatprep.subr.bf16.mxu1 %v4995_v33  ;;  %v5019_v34 = vpack.c.bf16 %v720_v29, %v719_v28  ;;  %v1939_v28 = vld [vmem:[#allocation13 + $0x130] sm:$0xff]  ;;  %v1940_v29 = vld [vmem:[#allocation13 + $0x138] sm:$0xff] }
 0x1dd   : > { %v675_v54 = vpop.f32.mrb[0].mxu1 }
 0x1de   : > { %v6602_v55 = vadd.f32 %v675_v54, %v602_v50  ;;  %v677_v56 = vpop.f32.mrb[1].mxu1 }
 0x1df   : > { %v6604_v58 = vadd.f32 %v677_v56, %v606_v51  ;;  %v923_v56 = vld [vmem:[#allocation10 + $0x120] sm:$0xff] }
 0x1e0   : > { %699 = vst [vmem:[#allocation2 + $0x11] sm:$0xff] %v6602_v55  ;;  %4052 = vmatmul.mubr.f32.vlgmr.msra.gmra.mrb[8].mxu1 %v6602_v55 }
 0x1e1   : > { %1712 = vst [vmem:[#allocation3] sm:$0xff] %v6604_v58  ;;  %v681_v61 = vpop.f32.mrb[2].mxu1  ;;  %4998 = vmatpush3.bf16.msra.mxu1 %v4995_v33  ;;  %v5295_v33 = vpack.c.bf16 %v1727_v32, %v1726_v31  ;;  %v5327_v32 = vpack.c.bf16 %v1940_v29, %v1939_v28  ;;  %v2050_v28 = vld [vmem:[#allocation13 + $0x1b8] sm:$0xff] }
 0x1e2   : > { %v6609_v62 = vadd.f32 %v681_v61, %v602_v50  ;;  %v683_v63 = vpop.f32.mrb[3].mxu1  ;;  %5000 = vmatprep.subr.bf16.mxu1 %v4999_v57 }
 0x1e3   : > { %v6611_v1 = vadd.f32 %v683_v63, %v606_v51 }
 0x1e4   : > { %700 = vst [vmem:[#allocation2 + $0x21] sm:$0xff] %v6609_v62  ;;  %4054 = vmatprep.mubr.f32.mxu1 %v6609_v62 }
 0x1e5   : > { %1713 = vst [vmem:[#allocation3 + $0x10] sm:$0xff] %v6611_v1  ;;  %v687_v4 = vpop.f32.mrb[4].mxu1  ;;  %5002 = vmatpush3.bf16.msra.mxu1 %v4999_v57  ;;  %v924_v57 = vld [vmem:[#allocation10 + $0x128] sm:$0xff] }
 0x1e6   : > { %v6616_v5 = vadd.f32 %v687_v4, %v602_v50  ;;  %v689_v6 = vpop.f32.mrb[5].mxu1  ;;  %5004 = vmatprep.subr.bf16.mxu1 %v5003_v0  ;;  %v5035_v63 = vpack.c.bf16 %v924_v57, %v923_v56  ;;  %v926_v4 = vld [vmem:[#allocation10 + $0x138] sm:$0xff]  ;;  %v1947_v57 = vld [vmem:[#allocation13 + $0x170] sm:$0xff] }
 0x1e7   : > { %v6618_v9 = vadd.f32 %v689_v6, %v606_v51  ;;  %v6640_v54 = vld [vmem:[#allocation2 + $0x10] sm:$0xff]  ;;  %v5039_v10 = vpack.c.bf16 %v926_v4, %v925_v3  ;;  %v1036_v3 = vld [vmem:[#allocation10 + $0x1b8] sm:$0xff] }
 0x1e8   : > { %701 = vst [vmem:[#allocation2 + $0x31] sm:$0xff] %v6616_v5  ;;  %v1736_v13 = vld [vmem:[#allocation3 + $0x1] sm:$0xff]  ;;  %4055 = vmatmul.mubr.f32.gmra.mrb[10].mxu1 %v6616_v5  ;;  %v1933_v6 = vld [vmem:[#allocation13 + $0x100] sm:$0xff] }
 0x1e9   : > { %1714 = vst [vmem:[#allocation3 + $0x20] sm:$0xff] %v6618_v9  ;;  %v693_v16 = vpop.f32.mrb[6].mxu1  ;;  %4393 = vmatprep.mubr.f32.mxu0 %v1736_v13  ;;  %5006 = vmatpush3.bf16.msra.mxu1 %v5003_v0  ;;  %v914_v0 = vld [vmem:[#allocation2 + $0x2] sm:$0xff]  ;;  %v2043_v4 = vld [vmem:[#allocation13 + $0x180] sm:$0xff] }
 0x1ea   : > { %v6623_v17 = vadd.f32 %v693_v16, %v602_v50  ;;  %v695_v18 = vpop.f32.mrb[7].mxu1  ;;  %5008 = vmatprep.subr.bf16.mxu1 %v5007_v7  ;;  %4089 = vmatprep.mubr.f32.mxu1 %v703_v12  ;;  %v1732_v50 = vld [vmem:[#allocation13 + $0x60] sm:$0xff]  ;;  %v1935_v13 = vld [vmem:[#allocation13 + $0x110] sm:$0xff] }
 0x1eb   : > { %v6625_v20 = vadd.f32 %v695_v18, %v606_v51  ;;  %v1733_v51 = vld [vmem:[#allocation13 + $0x68] sm:$0xff]  ;;  %v927_v12 = vld [vmem:[#allocation10 + $0x140] sm:$0xff]  ;;  %v5319_v16 = vpack.c.bf16 %v1936_v14, %v1935_v13  ;;  %v6656_v56 = vld [vmem:[#allocation2 + $0x22] sm:$0xff] }
 0x1ec   : > { %702 = vst [vmem:[#allocation2 + $0x41] sm:$0xff] %v6623_v17  ;;  %v6628_v24 = vld [vmem:[#allocation3 + $0x11] sm:$0xff]  ;;  %v5307_v53 = vpack.c.bf16 %v1733_v51, %v1732_v50  ;;  %v5043_v18 = vpack.c.bf16 %v928_v15, %v927_v12  ;;  %v2045_v12 = vld [vmem:[#allocation13 + $0x190] sm:$0xff]  ;;  %v2046_v13 = vld [vmem:[#allocation13 + $0x198] sm:$0xff] }
 0x1ed   : > { %1715 = vst [vmem:[#allocation3 + $0x30] sm:$0xff] %v6625_v20  ;;  %4394 = vmatmul.mubr.f32.vlgmr.msra.gmra.mrb[0].mxu0 %v6628_v24  ;;  %5010 = vmatpush3.bf16.msra.mxu1 %v5007_v7  ;;  %v1934_v7 = vld [vmem:[#allocation13 + $0x108] sm:$0xff]  ;;  %v5351_v15 = vpack.c.bf16 %v2046_v13, %v2045_v12 }
 0x1ee   : > { %5286 = vmatpush3.bf16.msra.mxu0 %v6596_v44  ;;  %5012 = vmatprep.subr.bf16.mxu1 %v5011_v19  ;;  %v1730_v44 = vld [vmem:[#allocation13 + $0x50] sm:$0xff]  ;;  %v5315_v11 = vpack.c.bf16 %v1934_v7, %v1933_v6  ;;  %v6653_v51 = vld [vmem:[#allocation2 + $0x12] sm:$0xff] }
 0x1ef   : > { %5288 = vmatprep.subr.bf16.mxu0 %v5287_v21  ;;  %v5303_v47 = vpack.c.bf16 %v1731_v45, %v1730_v44  ;;  %v6646_v61 = vld [vmem:[#allocation2 + $0x30] sm:$0xff]  ;;  %v5335_v44 = vpack.c.bf16 %v1944_v43, %v1943_v42  ;;  %v1031_v45 = vld [vmem:[#allocation10 + $0x190] sm:$0xff]  ;;  %v2044_v6 = vld [vmem:[#allocation13 + $0x188] sm:$0xff] }
 0x1f0   : > { %v6633_v30 = vld [vmem:[#allocation3 + $0x21] sm:$0xff]  ;;  %v1038_v14 = vld [vmem:[#allocation10 + $0x1c8] sm:$0xff] }
 0x1f1   : > { %4396 = vmatprep.mubr.f32.mxu0 %v6633_v30  ;;  %5014 = vmatpush3.bf16.msra.mxu1 %v5011_v19  ;;  %v929_v19 = vld [vmem:[#allocation10 + $0x150] sm:$0xff]  ;;  %v1142_v43 = vld [vmem:[#allocation10 + $0x218] sm:$0xff]  ;;  %v1152_v12 = vld [vmem:[#allocation10 + $0x268] sm:$0xff] }
 0x1f2   : > { %5290 = vmatpush3.bf16.msra.mxu0 %v5287_v21  ;;  %5016 = vmatprep.subr.bf16.mxu1 %v5015_v27  ;;  %v1937_v21 = vld [vmem:[#allocation13 + $0x120] sm:$0xff]  ;;  %v5047_v26 = vpack.c.bf16 %v930_v23, %v929_v19  ;;  %v1141_v42 = vld [vmem:[#allocation10 + $0x210] sm:$0xff] }
 0x1f3   : > { %5292 = vmatprep.subr.bf16.mxu0 %v5291_v8  ;;  %v5323_v25 = vpack.c.bf16 %v1938_v22, %v1937_v21  ;;  %v2047_v19 = vld [vmem:[#allocation13 + $0x1a0] sm:$0xff]  ;;  %v2048_v21 = vld [vmem:[#allocation13 + $0x1a8] sm:$0xff]  ;;  %v1040_v22 = vld [vmem:[#allocation10 + $0x1d8] sm:$0xff] }
 0x1f4   : > { %v6636_v37 = vld [vmem:[#allocation3 + $0x31] sm:$0xff]  ;;  %v5355_v23 = vpack.c.bf16 %v2048_v21, %v2047_v19  ;;  %v1252_v21 = vld [vmem:[#allocation10 + $0x298] sm:$0xff] }
 0x1f5   : > { %4397 = vmatmul.mubr.f32.gmra.mrb[2].mxu0 %v6636_v37  ;;  %5018 = vmatpush3.bf16.msra.mxu1 %v5015_v27  ;;  %v931_v27 = vld [vmem:[#allocation10 + $0x160] sm:$0xff]  ;;  %v1250_v19 = vld [vmem:[#allocation10 + $0x288] sm:$0xff] }
 0x1f6   : > { %5294 = vmatpush3.bf16.msra.mxu0 %v5291_v8  ;;  %4431 = vmatprep.mubr.f32.mxu0 %v6604_v58  ;;  %v6643_v58 = vld [vmem:[#allocation2 + $0x20] sm:$0xff]  ;;  %v932_v8 = vld [vmem:[#allocation10 + $0x168] sm:$0xff] }
 0x1f7   : > { %5296 = vmatprep.subr.bf16.mxu0 %v5295_v33  ;;  %5020 = vmatprep.subr.bf16.mxu1 %v5019_v34  ;;  %v5051_v31 = vpack.c.bf16 %v932_v8, %v931_v27  ;;  %v1042_v27 = vld [vmem:[#allocation10 + $0x1e8] sm:$0xff]  ;;  %v2049_v8 = vld [vmem:[#allocation13 + $0x1b0] sm:$0xff] }
 0x1f9   : > { %5022 = vmatpush3.bf16.msra.mxu1 %v5019_v34  ;;  %v934_v34 = vld [vmem:[#allocation10 + $0x178] sm:$0xff] }
 0x1fa   : > { %5298 = vmatpush3.bf16.msra.mxu0 %v5295_v33  ;;  %5024 = vmatprep.subr.bf16.mxu1 %v5023_v40  ;;  %v933_v33 = vld [vmem:[#allocation10 + $0x170] sm:$0xff] }
 0x1fb   : > { %5300 = vmatprep.subr.bf16.mxu0 %v5299_v41  ;;  %v5055_v38 = vpack.c.bf16 %v934_v34, %v933_v33  ;;  %v2052_v33 = vld [vmem:[#allocation13 + $0x1c8] sm:$0xff] }
 0x1fd   : > { %5026 = vmatpush3.bf16.msra.mxu1 %v5023_v40  ;;  %v1029_v40 = vld [vmem:[#allocation10 + $0x180] sm:$0xff] }
 0x1fe   : > { %5302 = vmatpush3.bf16.msra.mxu0 %v5299_v41  ;;  %5028 = vmatprep.subr.bf16.mxu1 %v5027_v46  ;;  %v1030_v41 = vld [vmem:[#allocation10 + $0x188] sm:$0xff] }
 0x1ff   : > { %5304 = vmatprep.subr.bf16.mxu0 %v5303_v47 }
 0x200   : > { %4090 = vmatmul.mubr.f32.vlgmr.msra.gmra.mrb[8].mxu1 %v6640_v54 }
 0x201   : > { %4092 = vmatprep.mubr.f32.mxu1 %v6643_v58  ;;  %5030 = vmatpush3.bf16.msra.mxu1 %v5027_v46  ;;  %v1032_v46 = vld [vmem:[#allocation10 + $0x198] sm:$0xff] }
 0x202   : > { %5306 = vmatpush3.bf16.msra.mxu0 %v5303_v47  ;;  %5032 = vmatprep.subr.bf16.mxu1 %v5031_v52  ;;  %v1945_v47 = vld [vmem:[#allocation13 + $0x160] sm:$0xff]  ;;  %v5063_v49 = vpack.c.bf16 %v1032_v46, %v1031_v45  ;;  %v5095_v45 = vpack.c.bf16 %v1142_v43, %v1141_v42  ;;  %v2198_v43 = vld [vmem:[#allocation14 + $0xc8] sm:$0xff] }
 0x203   : > { %5308 = vmatprep.subr.bf16.mxu0 %v5307_v53  ;;  %v5339_v50 = vpack.c.bf16 %v1946_v48, %v1945_v47  ;;  %v1143_v47 = vld [vmem:[#allocation10 + $0x220] sm:$0xff]  ;;  %v1144_v48 = vld [vmem:[#allocation10 + $0x228] sm:$0xff] }
 0x204   : > { %4093 = vmatmul.mubr.f32.gmra.mrb[10].mxu1 %v6646_v61  ;;  %v2197_v42 = vld [vmem:[#allocation14 + $0xc0] sm:$0xff] }
 0x205   : > { %5034 = vmatpush3.bf16.msra.mxu1 %v5031_v52  ;;  %4127 = vmatprep.mubr.f32.mxu1 %v914_v0  ;;  %v1033_v52 = vld [vmem:[#allocation10 + $0x1a0] sm:$0xff] }
 0x206   : > { %5310 = vmatpush3.bf16.msra.mxu0 %v5307_v53  ;;  %5036 = vmatprep.subr.bf16.mxu1 %v5035_v63  ;;  %v1034_v53 = vld [vmem:[#allocation10 + $0x1a8] sm:$0xff] }
 0x207   : > { %5312 = vmatprep.subr.bf16.mxu0 %v5311_v2  ;;  %v5067_v60 = vpack.c.bf16 %v1034_v53, %v1033_v52  ;;  %v6659_v0 = vld [vmem:[#allocation2 + $0x32] sm:$0xff]  ;;  %v5099_v52 = vpack.c.bf16 %v1144_v48, %v1143_v47  ;;  %v2199_v47 = vld [vmem:[#allocation14 + $0xd0] sm:$0xff]  ;;  %v2200_v48 = vld [vmem:[#allocation14 + $0xd8] sm:$0xff] }
 0x209   : > { %5038 = vmatpush3.bf16.msra.mxu1 %v5035_v63  ;;  %v5343_v63 = vpack.c.bf16 %v1948_v59, %v1947_v57  ;;  %v6668_v57 = vld [vmem:[#allocation2 + $0x40] sm:$0xff] }
 0x20a   : > { %5314 = vmatpush3.bf16.msra.mxu0 %v5311_v2  ;;  %5040 = vmatprep.subr.bf16.mxu1 %v5039_v10  ;;  %v1035_v2 = vld [vmem:[#allocation10 + $0x1b0] sm:$0xff] }
 0x20b   : > { %5316 = vmatprep.subr.bf16.mxu0 %v5315_v11  ;;  %v5071_v7 = vpack.c.bf16 %v1036_v3, %v1035_v2  ;;  %v1145_v59 = vld [vmem:[#allocation10 + $0x230] sm:$0xff]  ;;  %v1147_v2 = vld [vmem:[#allocation10 + $0x240] sm:$0xff]  ;;  %v1148_v3 = vld [vmem:[#allocation10 + $0x248] sm:$0xff] }
 0x20d   : > { %4432 = vmatmul.mubr.f32.vlgmr.msra.gmra.mrb[0].mxu0 %v6611_v1  ;;  %5042 = vmatpush3.bf16.msra.mxu1 %v5039_v10  ;;  %v5347_v10 = vpack.c.bf16 %v2044_v6, %v2043_v4  ;;  %v5107_v4 = vpack.c.bf16 %v1148_v3, %v1147_v2  ;;  %v1149_v6 = vld [vmem:[#allocation10 + $0x250] sm:$0xff]  ;;  %v1361_v2 = vld [vmem:[#allocation10 + $0x308] sm:$0xff] }
 0x20e   : > { %4434 = vmatprep.mubr.f32.mxu0 %v6618_v9  ;;  %5318 = vmatpush3.bf16.msra.mxu0 %v5315_v11  ;;  %v1037_v11 = vld [vmem:[#allocation10 + $0x1c0] sm:$0xff] }
 0x20f   : > { %5320 = vmatprep.subr.bf16.mxu0 %v5319_v16  ;;  %5044 = vmatprep.subr.bf16.mxu1 %v5043_v18 }
 0x211   : > { %4435 = vmatmul.mubr.f32.gmra.mrb[2].mxu0 %v6625_v20  ;;  %5046 = vmatpush3.bf16.msra.mxu1 %v5043_v18  ;;  %v1039_v18 = vld [vmem:[#allocation10 + $0x1d0] sm:$0xff] }
 0x212   : > { %5322 = vmatpush3.bf16.msra.mxu0 %v5319_v16  ;;  %4469 = vmatprep.mubr.f32.mxu0 %v6611_v1  ;;  %v5059_v1 = vpack.c.bf16 %v1030_v41, %v1029_v40  ;;  %v5075_v16 = vpack.c.bf16 %v1038_v14, %v1037_v11  ;;  %v2054_v40 = vld [vmem:[#allocation13 + $0x1d8] sm:$0xff]  ;;  %v1151_v11 = vld [vmem:[#allocation10 + $0x260] sm:$0xff]  ;;  %v1153_v14 = vld [vmem:[#allocation10 + $0x270] sm:$0xff] }
 0x213   : > { %5324 = vmatprep.subr.bf16.mxu0 %v5323_v25  ;;  %5048 = vmatprep.subr.bf16.mxu1 %v5047_v26  ;;  %v5115_v13 = vpack.c.bf16 %v1152_v12, %v1151_v11  ;;  %v1364_v12 = vld [vmem:[#allocation10 + $0x320] sm:$0xff] }
 0x215   : > { %5050 = vmatpush3.bf16.msra.mxu1 %v5047_v26  ;;  %v1041_v26 = vld [vmem:[#allocation10 + $0x1e0] sm:$0xff] }
 0x216   : > { %5326 = vmatpush3.bf16.msra.mxu0 %v5323_v25  ;;  %5052 = vmatprep.subr.bf16.mxu1 %v5051_v31  ;;  %v5079_v25 = vpack.c.bf16 %v1040_v22, %v1039_v18  ;;  %v5083_v29 = vpack.c.bf16 %v1042_v27, %v1041_v26  ;;  %v1249_v18 = vld [vmem:[#allocation10 + $0x280] sm:$0xff]  ;;  %v1255_v26 = vld [vmem:[#allocation10 + $0x2b0] sm:$0xff]  ;;  %v1256_v27 = vld [vmem:[#allocation10 + $0x2b8] sm:$0xff] }
 0x217   : > { %5328 = vmatprep.subr.bf16.mxu0 %v5327_v32 }
 0x219   : > { %5054 = vmatpush3.bf16.msra.mxu1 %v5051_v31  ;;  %v1044_v31 = vld [vmem:[#allocation10 + $0x1f8] sm:$0xff] }
 0x21a   : > { %5330 = vmatpush3.bf16.msra.mxu0 %v5327_v32  ;;  %5056 = vmatprep.subr.bf16.mxu1 %v5055_v38  ;;  %v2051_v32 = vld [vmem:[#allocation13 + $0x1c0] sm:$0xff] }
 0x21b   : > { %5332 = vmatprep.subr.bf16.mxu0 %v5331_v39  ;;  %v5363_v35 = vpack.c.bf16 %v2052_v33, %v2051_v32  ;;  %v2193_v32 = vld [vmem:[#allocation14 + $0xa0] sm:$0xff] }
 0x21c   : > { %v1257_v33 = vld [vmem:[#allocation10 + $0x2c0] sm:$0xff] }
 0x21d   : > { %5058 = vmatpush3.bf16.msra.mxu1 %v5055_v38  ;;  %v1140_v38 = vld [vmem:[#allocation10 + $0x208] sm:$0xff] }
 0x21e   : > { %5334 = vmatpush3.bf16.msra.mxu0 %v5331_v39  ;;  %5060 = vmatprep.subr.bf16.mxu1 %v5059_v1  ;;  %v2053_v39 = vld [vmem:[#allocation13 + $0x1d0] sm:$0xff] }
 0x21f   : > { %5336 = vmatprep.subr.bf16.mxu0 %v5335_v44  ;;  %v5367_v41 = vpack.c.bf16 %v2054_v40, %v2053_v39  ;;  %v2196_v39 = vld [vmem:[#allocation14 + $0xb8] sm:$0xff] }
 0x220   : > { %4128 = vmatmul.mubr.f32.vlgmr.msra.gmra.mrb[8].mxu1 %v6653_v51  ;;  %v1260_v40 = vld [vmem:[#allocation10 + $0x2d8] sm:$0xff] }
 0x221   : > { %4130 = vmatprep.mubr.f32.mxu1 %v6656_v56  ;;  %5062 = vmatpush3.bf16.msra.mxu1 %v5059_v1  ;;  %v2055_v1 = vld [vmem:[#allocation13 + $0x1e0] sm:$0xff] }
 0x222   : > { %5338 = vmatpush3.bf16.msra.mxu0 %v5335_v44  ;;  %5064 = vmatprep.subr.bf16.mxu1 %v5063_v49  ;;  %v2056_v44 = vld [vmem:[#allocation13 + $0x1e8] sm:$0xff] }
 0x223   : > { %5340 = vmatprep.subr.bf16.mxu0 %v5339_v50  ;;  %v5371_v46 = vpack.c.bf16 %v2056_v44, %v2055_v1  ;;  %v1261_v1 = vld [vmem:[#allocation10 + $0x2e0] sm:$0xff]  ;;  %v1262_v44 = vld [vmem:[#allocation10 + $0x2e8] sm:$0xff] }
 0x224   : > { %4131 = vmatmul.mubr.f32.gmra.mrb[10].mxu1 %v6659_v0 }
 0x225   : > { %5066 = vmatpush3.bf16.msra.mxu1 %v5063_v49  ;;  %4165 = vmatprep.mubr.f32.mxu1 %v6640_v54  ;;  %v1931_v54 = vld [vmem:[#allocation3 + $0x40] sm:$0xff] }
 0x226   : > { %5342 = vmatpush3.bf16.msra.mxu0 %v5339_v50  ;;  %5068 = vmatprep.subr.bf16.mxu1 %v5067_v60  ;;  %v2057_v49 = vld [vmem:[#allocation13 + $0x1f0] sm:$0xff]  ;;  %v2058_v50 = vld [vmem:[#allocation13 + $0x1f8] sm:$0xff] }
 0x227   : > { %5344 = vmatprep.subr.bf16.mxu0 %v5343_v63  ;;  %v5375_v53 = vpack.c.bf16 %v2058_v50, %v2057_v49  ;;  %v1263_v49 = vld [vmem:[#allocation10 + $0x2f0] sm:$0xff]  ;;  %v1264_v50 = vld [vmem:[#allocation10 + $0x2f8] sm:$0xff] }
 0x229   : > { %5070 = vmatpush3.bf16.msra.mxu1 %v5067_v60  ;;  %v1146_v60 = vld [vmem:[#allocation10 + $0x238] sm:$0xff] }
 0x22a   : > { %5346 = vmatpush3.bf16.msra.mxu0 %v5343_v63  ;;  %5072 = vmatprep.subr.bf16.mxu1 %v5071_v7  ;;  %v5103_v63 = vpack.c.bf16 %v1146_v60, %v1145_v59  ;;  %v2201_v59 = vld [vmem:[#allocation14 + $0xe0] sm:$0xff]  ;;  %v2202_v60 = vld [vmem:[#allocation14 + $0xe8] sm:$0xff] }
 0x22b   : > { %5348 = vmatprep.subr.bf16.mxu0 %v5347_v10  ;;  %v5403_v3 = vpack.c.bf16 %v2202_v60, %v2201_v59  ;;  %v1475_v59 = vld [vmem:[#allocation10 + $0x3a8] sm:$0xff]  ;;  %v1358_v60 = vld [vmem:[#allocation2 + $0x50] sm:$0xff] }
 0x22d   : > { %4470 = vmatmul.mubr.f32.vlgmr.msra.gmra.mrb[0].mxu0 %v6618_v9  ;;  %5074 = vmatpush3.bf16.msra.mxu1 %v5071_v7  ;;  %v5359_v9 = vpack.c.bf16 %v2050_v28, %v2049_v8  ;;  %v1150_v7 = vld [vmem:[#allocation10 + $0x258] sm:$0xff]  ;;  %v2189_v8 = vld [vmem:[#allocation14 + $0x80] sm:$0xff]  ;;  %v2190_v28 = vld [vmem:[#allocation14 + $0x88] sm:$0xff] }
 0x22e   : > { %4472 = vmatprep.mubr.f32.mxu0 %v6625_v20  ;;  %5350 = vmatpush3.bf16.msra.mxu0 %v5347_v10  ;;  %v1043_v20 = vld [vmem:[#allocation10 + $0x1f0] sm:$0xff] }
 0x22f   : > { %5352 = vmatprep.subr.bf16.mxu0 %v5351_v15  ;;  %5076 = vmatprep.subr.bf16.mxu1 %v5075_v16  ;;  %v5087_v34 = vpack.c.bf16 %v1044_v31, %v1043_v20  ;;  %v2041_v10 = vld [vmem:[#allocation3 + $0x41] sm:$0xff]  ;;  %v5135_v31 = vpack.c.bf16 %v1256_v27, %v1255_v26  ;;  %v2172_v27 = vld [vmem:[#allocation14 + $0x20] sm:$0xff] }
 0x230   : > { %v2192_v20 = vld [vmem:[#allocation14 + $0x98] sm:$0xff] }
 0x231   : > { %4473 = vmatmul.mubr.f32.gmra.mrb[2].mxu0 %v1931_v54  ;;  %5078 = vmatpush3.bf16.msra.mxu1 %v5075_v16  ;;  %v1253_v54 = vld [vmem:[#allocation10 + $0x2a0] sm:$0xff] }
 0x232   : > { %5354 = vmatpush3.bf16.msra.mxu0 %v5351_v15  ;;  %4507 = vmatprep.mubr.f32.mxu0 %v6628_v24  ;;  %v5091_v24 = vpack.c.bf16 %v1140_v38, %v1139_v36  ;;  %v1154_v15 = vld [vmem:[#allocation10 + $0x278] sm:$0xff]  ;;  %v2195_v38 = vld [vmem:[#allocation14 + $0xb0] sm:$0xff] }
 0x233   : > { %5356 = vmatprep.subr.bf16.mxu0 %v5355_v23  ;;  %5080 = vmatprep.subr.bf16.mxu1 %v5079_v25  ;;  %v5119_v16 = vpack.c.bf16 %v1154_v15, %v1153_v14  ;;  %v1365_v14 = vld [vmem:[#allocation10 + $0x328] sm:$0xff]  ;;  %v2168_v15 = vld [vmem:[#allocation14] sm:$0xff] }
 0x235   : > { %5082 = vmatpush3.bf16.msra.mxu1 %v5079_v25 }
 0x236   : > { %5358 = vmatpush3.bf16.msra.mxu0 %v5355_v23  ;;  %5084 = vmatprep.subr.bf16.mxu1 %v5083_v29  ;;  %v1254_v23 = vld [vmem:[#allocation10 + $0x2a8] sm:$0xff] }
 0x237   : > { %5360 = vmatprep.subr.bf16.mxu0 %v5359_v9  ;;  %v5131_v25 = vpack.c.bf16 %v1254_v23, %v1253_v54  ;;  %v1367_v54 = vld [vmem:[#allocation10 + $0x338] sm:$0xff] }
 0x238   : > { %v2185_v23 = vld [vmem:[#allocation4 + $0x12] sm:$0xff] }
 0x239   : > { %5086 = vmatpush3.bf16.msra.mxu1 %v5083_v29  ;;  %v2191_v29 = vld [vmem:[#allocation14 + $0x90] sm:$0xff] }
 0x23a   : > { %5362 = vmatpush3.bf16.msra.mxu0 %v5359_v9  ;;  %5088 = vmatprep.subr.bf16.mxu1 %v5087_v34  ;;  %v5379_v9 = vpack.c.bf16 %v2190_v28, %v2189_v8  ;;  %v2173_v8 = vld [vmem:[#allocation14 + $0x28] sm:$0xff]  ;;  %v1368_v28 = vld [vmem:[#allocation10 + $0x340] sm:$0xff] }
 0x23b   : > { %5364 = vmatprep.subr.bf16.mxu0 %v5363_v35 }
 0x23d   : > { %5090 = vmatpush3.bf16.msra.mxu1 %v5087_v34  ;;  %v1258_v34 = vld [vmem:[#allocation10 + $0x2c8] sm:$0xff] }
 0x23e   : > { %5366 = vmatpush3.bf16.msra.mxu0 %v5363_v35  ;;  %5092 = vmatprep.subr.bf16.mxu1 %v5091_v24  ;;  %v2184_v35 = vld [vmem:[#allocation4 + $0x2] sm:$0xff]  ;;  %v5139_v36 = vpack.c.bf16 %v1258_v34, %v1257_v33 }
 0x23f   : > { %5368 = vmatprep.subr.bf16.mxu0 %v5367_v41  ;;  %v1372_v34 = vld [vmem:[#allocation10 + $0x360] sm:$0xff] }
 0x240   : > { %4166 = vmatmul.mubr.f32.vlgmr.msra.gmra.mrb[8].mxu1 %v6643_v58 }
 0x241   : > { %4168 = vmatprep.mubr.f32.mxu1 %v6646_v61  ;;  %5094 = vmatpush3.bf16.msra.mxu1 %v5091_v24  ;;  %v5391_v24 = vpack.c.bf16 %v2196_v39, %v2195_v38  ;;  %v1375_v38 = vld [vmem:[#allocation10 + $0x378] sm:$0xff]  ;;  %v2176_v39 = vld [vmem:[#allocation14 + $0x40] sm:$0xff] }
 0x242   : > { %5370 = vmatpush3.bf16.msra.mxu0 %v5367_v41  ;;  %5096 = vmatprep.subr.bf16.mxu1 %v5095_v45 }
 0x243   : > { %5372 = vmatprep.subr.bf16.mxu0 %v5371_v46 }
 0x244   : > { %4169 = vmatmul.mubr.f32.gmra.mrb[10].mxu1 %v6668_v57 }
 0x245   : > { %5098 = vmatpush3.bf16.msra.mxu1 %v5095_v45  ;;  %4203 = vmatprep.mubr.f32.mxu1 %v6602_v55  ;;  %v5111_v55 = vpack.c.bf16 %v1150_v7, %v1149_v6  ;;  %v5395_v45 = vpack.c.bf16 %v2198_v43, %v2197_v42  ;;  %v1362_v6 = vld [vmem:[#allocation10 + $0x310] sm:$0xff]  ;;  %v1363_v7 = vld [vmem:[#allocation10 + $0x318] sm:$0xff]  ;;  %v1471_v42 = vld [vmem:[#allocation10 + $0x388] sm:$0xff] }
 0x246   : > { %5374 = vmatpush3.bf16.msra.mxu0 %v5371_v46  ;;  %5100 = vmatprep.subr.bf16.mxu1 %v5099_v52  ;;  %v5147_v46 = vpack.c.bf16 %v1262_v44, %v1261_v1  ;;  %v5159_v11 = vpack.c.bf16 %v1363_v7, %v1362_v6  ;;  %v2178_v43 = vld [vmem:[#allocation14 + $0x50] sm:$0xff]  ;;  %v2179_v1 = vld [vmem:[#allocation14 + $0x58] sm:$0xff] }
 0x247   : > { %5376 = vmatprep.subr.bf16.mxu0 %v5375_v53  ;;  %v1476_v6 = vld [vmem:[#allocation10 + $0x3b0] sm:$0xff]  ;;  %v1477_v7 = vld [vmem:[#allocation10 + $0x3b8] sm:$0xff] }
 0x249   : > { %5102 = vmatpush3.bf16.msra.mxu1 %v5099_v52  ;;  %v5399_v52 = vpack.c.bf16 %v2200_v48, %v2199_v47  ;;  %v1473_v47 = vld [vmem:[#allocation10 + $0x398] sm:$0xff]  ;;  %v2180_v48 = vld [vmem:[#allocation14 + $0x60] sm:$0xff] }
 0x24a   : > { %5378 = vmatpush3.bf16.msra.mxu0 %v5375_v53  ;;  %5104 = vmatprep.subr.bf16.mxu1 %v5103_v63  ;;  %v5151_v53 = vpack.c.bf16 %v1264_v50, %v1263_v49  ;;  %v2181_v49 = vld [vmem:[#allocation14 + $0x68] sm:$0xff] }
 0x24b   : > { %5380 = vmatprep.subr.bf16.mxu0 %v5379_v9 }
 0x24d   : > { %4508 = vmatmul.mubr.f32.vlgmr.msra.gmra.mrb[0].mxu0 %v6633_v30  ;;  %5106 = vmatpush3.bf16.msra.mxu1 %v5103_v63  ;;  %v5123_v30 = vpack.c.bf16 %v1250_v19, %v1249_v18  ;;  %v1360_v63 = vld [vmem:[#allocation10 + $0x300] sm:$0xff]  ;;  %v5163_v18 = vpack.c.bf16 %v1365_v14, %v1364_v12 }
 0x24e   : > { %4510 = vmatprep.mubr.f32.mxu0 %v6636_v37  ;;  %5108 = vmatprep.subr.bf16.mxu1 %v5107_v4  ;;  %v1251_v37 = vld [vmem:[#allocation10 + $0x290] sm:$0xff]  ;;  %v1478_v12 = vld [vmem:[#allocation10 + $0x3c0] sm:$0xff] }
 0x24f   : > { %v5127_v22 = vpack.c.bf16 %v1252_v21, %v1251_v37  ;;  %5382 = vmatpush3.bf16.msra.mxu0 %v5379_v9  ;;  %v2171_v37 = vld [vmem:[#allocation14 + $0x18] sm:$0xff]  ;;  %v5419_v9 = vpack.c.bf16 %v2173_v8, %v2172_v27  ;;  %v1582_v8 = vld [vmem:[#allocation10 + $0x410] sm:$0xff] }
 0x250   : > { %v6680_v21 = vld [vmem:[#allocation2 + $0x42] sm:$0xff] }
 0x251   : > { %4511 = vmatmul.mubr.f32.gmra.mrb[2].mxu0 %v2041_v10  ;;  %5110 = vmatpush3.bf16.msra.mxu1 %v5107_v4  ;;  %v5155_v4 = vpack.c.bf16 %v1361_v2, %v1360_v63  ;;  %v2203_v10 = vld [vmem:[#allocation14 + $0xf0] sm:$0xff]  ;;  %v2183_v2 = vld [vmem:[#allocation14 + $0x78] sm:$0xff] }
 0x252   : > { %5112 = vmatprep.subr.bf16.mxu1 %v5111_v55  ;;  %4545 = vmatprep.mubr.f32.mxu0 %v2184_v35  ;;  %v2182_v63 = vld [vmem:[#allocation14 + $0x70] sm:$0xff] }
 0x255   : > { %5114 = vmatpush3.bf16.msra.mxu1 %v5111_v55  ;;  %v2204_v55 = vld [vmem:[#allocation14 + $0xf8] sm:$0xff] }
 0x256   : > { %5116 = vmatprep.subr.bf16.mxu1 %v5115_v13 }
 0x259   : > { %5118 = vmatpush3.bf16.msra.mxu1 %v5115_v13  ;;  %v5407_v13 = vpack.c.bf16 %v2204_v55, %v2203_v10  ;;  %v5926_v10 = vld [vmem:[#allocation2 + $0x21] sm:$0xff]  ;;  %v2380_v55 = vld [vmem:[#allocation14 + $0x100] sm:$0xff] }
 0x25a   : > { %5120 = vmatprep.subr.bf16.mxu1 %v5119_v16 }
 0x25d   : > { %5122 = vmatpush3.bf16.msra.mxu1 %v5119_v16  ;;  %v2169_v16 = vld [vmem:[#allocation14 + $0x8] sm:$0xff] }
 0x25e   : > { %5124 = vmatprep.subr.bf16.mxu1 %v5123_v30  ;;  %v5411_v19 = vpack.c.bf16 %v2169_v16, %v2168_v15  ;;  %v1480_v15 = vld [vmem:[#allocation10 + $0x3d0] sm:$0xff]  ;;  %v1481_v16 = vld [vmem:[#allocation10 + $0x3d8] sm:$0xff] }
 0x260   : > { %4204 = vmatmul.mubr.f32.vlgmr.msra.gmra.mrb[8].mxu1 %v6609_v62  ;;  %v5383_v62 = vpack.c.bf16 %v2192_v20, %v2191_v29  ;;  %v1369_v29 = vld [vmem:[#allocation10 + $0x348] sm:$0xff] }
 0x261   : > { %4206 = vmatprep.mubr.f32.mxu1 %v6616_v5  ;;  %5126 = vmatpush3.bf16.msra.mxu1 %v5123_v30  ;;  %v2194_v5 = vld [vmem:[#allocation14 + $0xa8] sm:$0xff]  ;;  %v2170_v30 = vld [vmem:[#allocation14 + $0x10] sm:$0xff]  ;;  %v5171_v20 = vpack.c.bf16 %v1369_v29, %v1368_v28  ;;  %v1583_v28 = vld [vmem:[#allocation10 + $0x418] sm:$0xff] }
 0x262   : > { %5128 = vmatprep.subr.bf16.mxu1 %v5127_v22  ;;  %5384 = vmatprep.subr.bf16.mxu0 %v5383_v62  ;;  %v5223_v29 = vpack.c.bf16 %v1583_v28, %v1582_v8  ;;  %v2493_v8 = vld [vmem:[#allocation14 + $0x198] sm:$0xff] }
 0x263   : > { %5386 = vmatpush3.bf16.msra.mxu0 %v5383_v62  ;;  %v2175_v62 = vld [vmem:[#allocation14 + $0x38] sm:$0xff] }
 0x264   : > { %4207 = vmatmul.mubr.f32.gmra.mrb[10].mxu1 %v6623_v17  ;;  %v5387_v17 = vpack.c.bf16 %v2194_v5, %v2193_v32  ;;  %v1370_v32 = vld [vmem:[#allocation10 + $0x350] sm:$0xff]  ;;  %v1371_v5 = vld [vmem:[#allocation10 + $0x358] sm:$0xff] }
 0x265   : > { %5130 = vmatpush3.bf16.msra.mxu1 %v5127_v22  ;;  %4241 = vmatprep.mubr.f32.mxu1 %v6653_v51  ;;  %v1259_v51 = vld [vmem:[#allocation10 + $0x2d0] sm:$0xff]  ;;  %v5175_v33 = vpack.c.bf16 %v1371_v5, %v1370_v32  ;;  %v1468_v32 = vld [vmem:[#allocation2 + $0x51] sm:$0xff] }
 0x266   : > { %5132 = vmatprep.subr.bf16.mxu1 %v5131_v25  ;;  %5388 = vmatprep.subr.bf16.mxu0 %v5387_v17  ;;  %v5143_v41 = vpack.c.bf16 %v1260_v40, %v1259_v51  ;;  %v1366_v22 = vld [vmem:[#allocation10 + $0x330] sm:$0xff]  ;;  %v2177_v51 = vld [vmem:[#allocation14 + $0x48] sm:$0xff] }
 0x267   : > { %5390 = vmatpush3.bf16.msra.mxu0 %v5387_v17  ;;  %v5167_v26 = vpack.c.bf16 %v1367_v54, %v1366_v22  ;;  %v1373_v17 = vld [vmem:[#allocation10 + $0x368] sm:$0xff]  ;;  %v1484_v22 = vld [vmem:[#allocation10 + $0x3f0] sm:$0xff]  ;;  %v1485_v54 = vld [vmem:[#allocation10 + $0x3f8] sm:$0xff] }
 0x268   : > { %5392 = vmatprep.subr.bf16.mxu0 %v5391_v24  ;;  %v5179_v35 = vpack.c.bf16 %v1373_v17, %v1372_v34  ;;  %v1588_v17 = vld [vmem:[#allocation10 + $0x440] sm:$0xff]  ;;  %v2376_v28 = vld [vmem:[#allocation4 + $0x14] sm:$0xff] }
 0x269   : > { %5134 = vmatpush3.bf16.msra.mxu1 %v5131_v25  ;;  %v5415_v25 = vpack.c.bf16 %v2171_v37, %v2170_v30  ;;  %v1483_v30 = vld [vmem:[#allocation10 + $0x3e8] sm:$0xff] }
 0x26a   : > { %5136 = vmatprep.subr.bf16.mxu1 %v5135_v31 }
 0x26b   : > { %5394 = vmatpush3.bf16.msra.mxu0 %v5391_v24  ;;  %v5427_v24 = vpack.c.bf16 %v2177_v51, %v2176_v39  ;;  %v1591_v39 = vld [vmem:[#allocation10 + $0x458] sm:$0xff] }
 0x26c   : > { %5396 = vmatprep.subr.bf16.mxu0 %v5395_v45 }
 0x26d   : > { %5138 = vmatpush3.bf16.msra.mxu1 %v5135_v31  ;;  %v2174_v31 = vld [vmem:[#allocation14 + $0x30] sm:$0xff] }
 0x26e   : > { %5140 = vmatprep.subr.bf16.mxu1 %v5139_v36 }
 0x26f   : > { %5398 = vmatpush3.bf16.msra.mxu0 %v5395_v45  ;;  %v5431_v45 = vpack.c.bf16 %v2179_v1, %v2178_v43  ;;  %v1595_v43 = vld [vmem:[#allocation10 + $0x478] sm:$0xff]  ;;  %v1578_v1 = vld [vmem:[#allocation2 + $0x52] sm:$0xff] }
 0x270   : > { %5400 = vmatprep.subr.bf16.mxu0 %v5399_v52 }
 0x271   : > { %5142 = vmatpush3.bf16.msra.mxu1 %v5139_v36  ;;  %v1374_v36 = vld [vmem:[#allocation10 + $0x370] sm:$0xff] }
 0x272   : > { %5144 = vmatprep.subr.bf16.mxu1 %v5143_v41  ;;  %v5183_v40 = vpack.c.bf16 %v1375_v38, %v1374_v36  ;;  %v1590_v38 = vld [vmem:[#allocation10 + $0x450] sm:$0xff] }
 0x273   : > { %5402 = vmatpush3.bf16.msra.mxu0 %v5399_v52  ;;  %v5435_v52 = vpack.c.bf16 %v2181_v49, %v2180_v48  ;;  %v5239_v51 = vpack.c.bf16 %v1591_v39, %v1590_v38  ;;  %v2164_v49 = vld [vmem:[#allocation4] sm:$0xff]  ;;  %v2501_v38 = vld [vmem:[#allocation14 + $0x1d8] sm:$0xff] }
 0x274   : > { %5404 = vmatprep.subr.bf16.mxu0 %v5403_v3 }
 0x275   : > { %5146 = vmatpush3.bf16.msra.mxu1 %v5143_v41  ;;  %v1470_v41 = vld [vmem:[#allocation10 + $0x380] sm:$0xff] }
 0x276   : > { %5148 = vmatprep.subr.bf16.mxu1 %v5147_v46  ;;  %v5187_v44 = vpack.c.bf16 %v1471_v42, %v1470_v41  ;;  %v1594_v42 = vld [vmem:[#allocation10 + $0x470] sm:$0xff] }
 0x277   : > { %5406 = vmatpush3.bf16.msra.mxu0 %v5403_v3 }
 0x278   : > { %5408 = vmatprep.subr.bf16.mxu0 %v5407_v13 }
 0x279   : > { %5150 = vmatpush3.bf16.msra.mxu1 %v5147_v46  ;;  %v1472_v46 = vld [vmem:[#allocation10 + $0x390] sm:$0xff] }
 0x27a   : > { %5152 = vmatprep.subr.bf16.mxu1 %v5151_v53  ;;  %v5191_v50 = vpack.c.bf16 %v1473_v47, %v1472_v46 }
 0x27b   : > { %5410 = vmatpush3.bf16.msra.mxu0 %v5407_v13  ;;  %v1479_v13 = vld [vmem:[#allocation10 + $0x3c8] sm:$0xff] }
 0x27c   : > { %5412 = vmatprep.subr.bf16.mxu0 %v5411_v19  ;;  %v5203_v14 = vpack.c.bf16 %v1479_v13, %v1478_v12  ;;  %v2388_v12 = vld [vmem:[#allocation14 + $0x140] sm:$0xff]  ;;  %v2389_v13 = vld [vmem:[#allocation14 + $0x148] sm:$0xff] }
 0x27d   : > { %5154 = vmatpush3.bf16.msra.mxu1 %v5151_v53  ;;  %v1474_v53 = vld [vmem:[#allocation10 + $0x3a0] sm:$0xff] }
 0x27e   : > { %5156 = vmatprep.subr.bf16.mxu1 %v5155_v4  ;;  %4546 = vmatmul.mubr.f32.vlgmr.msra.gmra.mrb[4].mxu0 %v2185_v23  ;;  %v5195_v3 = vpack.c.bf16 %v1475_v59, %v1474_v53  ;;  %v5215_v23 = vpack.c.bf16 %v1485_v54, %v1484_v22  ;;  %v2395_v22 = vld [vmem:[#allocation14 + $0x178] sm:$0xff] }
 0x27f   : > { %5414 = vmatpush3.bf16.msra.mxu0 %v5411_v19  ;;  %v1482_v19 = vld [vmem:[#allocation10 + $0x3e0] sm:$0xff] }
 0x280   : > { %4242 = vmatmul.mubr.f32.vlgmr.msra.gmra.mrb[8].mxu1 %v6656_v56  ;;  %5416 = vmatprep.subr.bf16.mxu0 %v5415_v25  ;;  %v5211_v37 = vpack.c.bf16 %v1483_v30, %v1482_v19  ;;  %v2393_v19 = vld [vmem:[#allocation14 + $0x168] sm:$0xff] }
 0x281   : > { %4244 = vmatprep.mubr.f32.mxu1 %v6659_v0  ;;  %5158 = vmatpush3.bf16.msra.mxu1 %v5155_v4  ;;  %v5439_v4 = vpack.c.bf16 %v2183_v2, %v2182_v63  ;;  %v2384_v2 = vld [vmem:[#allocation14 + $0x120] sm:$0xff] }
 0x282   : > { %5160 = vmatprep.subr.bf16.mxu1 %v5159_v11 }
 0x283   : > { %5418 = vmatpush3.bf16.msra.mxu0 %v5415_v25  ;;  %v1580_v25 = vld [vmem:[#allocation10 + $0x400] sm:$0xff] }
 0x284   : > { %4245 = vmatmul.mubr.f32.gmra.mrb[10].mxu1 %v6680_v21  ;;  %5420 = vmatprep.subr.bf16.mxu0 %v5419_v9 }
 0x285   : > { %5162 = vmatpush3.bf16.msra.mxu1 %v5159_v11  ;;  %4279 = vmatprep.mubr.f32.mxu1 %v6643_v58  ;;  %v5423_v58 = vpack.c.bf16 %v2175_v62, %v2174_v31  ;;  %v5199_v11 = vpack.c.bf16 %v1477_v7, %v1476_v6  ;;  %v5927_v31 = vld [vmem:[#allocation2 + $0x31] sm:$0xff]  ;;  %v5928_v62 = vld [vmem:[#allocation2 + $0x41] sm:$0xff] }
 0x286   : > { %5164 = vmatprep.subr.bf16.mxu1 %v5163_v18  ;;  %v2375_v7 = vld [vmem:[#allocation4 + $0x4] sm:$0xff] }
 0x287   : > { %5422 = vmatpush3.bf16.msra.mxu0 %v5419_v9  ;;  %v1584_v9 = vld [vmem:[#allocation10 + $0x420] sm:$0xff] }
 0x288   : > { %5424 = vmatprep.subr.bf16.mxu0 %v5423_v58 }
 0x289   : > { %5166 = vmatpush3.bf16.msra.mxu1 %v5163_v18  ;;  %v5207_v18 = vpack.c.bf16 %v1481_v16, %v1480_v15  ;;  %v2391_v15 = vld [vmem:[#allocation14 + $0x158] sm:$0xff] }
 0x28a   : > { %5168 = vmatprep.subr.bf16.mxu1 %v5167_v26 }
 0x28b   : > { %5426 = vmatpush3.bf16.msra.mxu0 %v5423_v58  ;;  %v1586_v58 = vld [vmem:[#allocation10 + $0x430] sm:$0xff] }
 0x28c   : > { %5428 = vmatprep.subr.bf16.mxu0 %v5427_v24 }
 0x28d   : > { %5170 = vmatpush3.bf16.msra.mxu1 %v5167_v26  ;;  %v1581_v26 = vld [vmem:[#allocation10 + $0x408] sm:$0xff] }
 0x28e   : > { %5172 = vmatprep.subr.bf16.mxu1 %v5171_v20  ;;  %v5219_v27 = vpack.c.bf16 %v1581_v26, %v1580_v25  ;;  %v2491_v25 = vld [vmem:[#allocation14 + $0x188] sm:$0xff] }
 0x28f   : > { %5430 = vmatpush3.bf16.msra.mxu0 %v5427_v24  ;;  %v1593_v24 = vld [vmem:[#allocation10 + $0x468] sm:$0xff] }
 0x290   : > { %5432 = vmatprep.subr.bf16.mxu0 %v5431_v45 }
 0x291   : > { %5174 = vmatpush3.bf16.msra.mxu1 %v5171_v20  ;;  %v1585_v20 = vld [vmem:[#allocation10 + $0x428] sm:$0xff] }
 0x292   : > { %5176 = vmatprep.subr.bf16.mxu1 %v5175_v33  ;;  %v5227_v5 = vpack.c.bf16 %v1585_v20, %v1584_v9  ;;  %v2494_v9 = vld [vmem:[#allocation14 + $0x1a0] sm:$0xff]  ;;  %v2495_v20 = vld [vmem:[#allocation14 + $0x1a8] sm:$0xff] }
 0x293   : > { %5434 = vmatpush3.bf16.msra.mxu0 %v5431_v45 }
 0x294   : > { %5436 = vmatprep.subr.bf16.mxu0 %v5435_v52 }
 0x295   : > { %5178 = vmatpush3.bf16.msra.mxu1 %v5175_v33  ;;  %v1587_v33 = vld [vmem:[#allocation10 + $0x438] sm:$0xff] }
 0x296   : > { %5180 = vmatprep.subr.bf16.mxu1 %v5179_v35  ;;  %v5231_v34 = vpack.c.bf16 %v1587_v33, %v1586_v58  ;;  %v2497_v58 = vld [vmem:[#allocation14 + $0x1b8] sm:$0xff] }
 0x297   : > { %5438 = vmatpush3.bf16.msra.mxu0 %v5435_v52 }
 0x298   : > { %5440 = vmatprep.subr.bf16.mxu0 %v5439_v4 }
 0x299   : > { %5182 = vmatpush3.bf16.msra.mxu1 %v5179_v35  ;;  %v1589_v35 = vld [vmem:[#allocation10 + $0x448] sm:$0xff] }
 0x29a   : > { %5184 = vmatprep.subr.bf16.mxu1 %v5183_v40  ;;  %v5235_v36 = vpack.c.bf16 %v1589_v35, %v1588_v17  ;;  %v2499_v17 = vld [vmem:[#allocation14 + $0x1c8] sm:$0xff] }
 0x29b   : > { %5442 = vmatpush3.bf16.msra.mxu0 %v5439_v4 }
 0x29d   : > { %5186 = vmatpush3.bf16.msra.mxu1 %v5183_v40  ;;  %v1592_v40 = vld [vmem:[#allocation10 + $0x460] sm:$0xff] }
 0x29e   : > { %5188 = vmatprep.subr.bf16.mxu1 %v5187_v44  ;;  %v5243_v41 = vpack.c.bf16 %v1593_v24, %v1592_v40  ;;  %v2503_v40 = vld [vmem:[#allocation14 + $0x1e8] sm:$0xff] }
 0x2a0   : > { %4280 = vmatmul.mubr.f32.vlgmr.msra.gmra.mrb[8].mxu1 %v6646_v61  ;;  %v2381_v61 = vld [vmem:[#allocation14 + $0x108] sm:$0xff] }
 0x2a1   : > { %4282 = vmatprep.mubr.f32.mxu1 %v6668_v57  ;;  %5190 = vmatpush3.bf16.msra.mxu1 %v5187_v44  ;;  %v6686_v57 = vpack.c.bf16 %v2381_v61, %v2380_v55  ;;  %v3529_v44 = vld [vmem:[%s6831_s7] ss:$0 sm:$0xff]  ;;  %v2387_v61 = vld [vmem:[#allocation14 + $0x138] sm:$0xff] }
 0x2a2   : > { %5192 = vmatprep.subr.bf16.mxu1 %v5191_v50  ;;  %v2386_v55 = vld [vmem:[#allocation14 + $0x130] sm:$0xff] }
 0x2a3   : > { %5444 = vmatprep.subr.bf16.mxu0 %v6686_v57 }
 0x2a4   : > { %4283 = vmatmul.mubr.f32.gmra.mrb[10].mxu1 %v1358_v60  ;;  %v2165_v60 = vld [vmem:[#allocation4 + $0x10] sm:$0xff] }
 0x2a5   : > { %5194 = vmatpush3.bf16.msra.mxu1 %v5191_v50  ;;  %4317 = vmatprep.mubr.f32.mxu1 %v5926_v10  ;;  %v2383_v50 = vld [vmem:[#allocation14 + $0x118] sm:$0xff] }
 0x2a6   : > { %5196 = vmatprep.subr.bf16.mxu1 %v5195_v3 }
 0x2a9   : > { %5198 = vmatpush3.bf16.msra.mxu1 %v5195_v3  ;;  %v2385_v3 = vld [vmem:[#allocation14 + $0x128] sm:$0xff] }
 0x2aa   : > { %5200 = vmatprep.subr.bf16.mxu1 %v5199_v11  ;;  %v5451_v6 = vpack.c.bf16 %v2385_v3, %v2384_v2  ;;  %v2607_v2 = vld [vmem:[#allocation14 + $0x238] sm:$0xff] }
 0x2ad   : > { %5202 = vmatpush3.bf16.msra.mxu1 %v5199_v11  ;;  %v5455_v11 = vpack.c.bf16 %v2387_v61, %v2386_v55  ;;  %v2611_v55 = vld [vmem:[#allocation14 + $0x258] sm:$0xff] }
 0x2ae   : > { %5204 = vmatprep.subr.bf16.mxu1 %v5203_v14 }
 0x2b1   : > { %5206 = vmatpush3.bf16.msra.mxu1 %v5203_v14  ;;  %v2390_v14 = vld [vmem:[#allocation14 + $0x150] sm:$0xff] }
 0x2b2   : > { %5208 = vmatprep.subr.bf16.mxu1 %v5207_v18  ;;  %v5463_v16 = vpack.c.bf16 %v2391_v15, %v2390_v14  ;;  %v2615_v14 = vld [vmem:[#allocation14 + $0x278] sm:$0xff]  ;;  %v2710_v15 = vld [vmem:[#allocation14 + $0x280] sm:$0xff] }
 0x2b5   : > { %5210 = vmatpush3.bf16.msra.mxu1 %v5207_v18  ;;  %v2392_v18 = vld [vmem:[#allocation14 + $0x160] sm:$0xff] }
 0x2b6   : > { %5212 = vmatprep.subr.bf16.mxu1 %v5211_v37  ;;  %v5467_v30 = vpack.c.bf16 %v2393_v19, %v2392_v18  ;;  %v2712_v19 = vld [vmem:[#allocation14 + $0x290] sm:$0xff] }
 0x2b9   : > { %5214 = vmatpush3.bf16.msra.mxu1 %v5211_v37  ;;  %v2394_v37 = vld [vmem:[#allocation14 + $0x170] sm:$0xff] }
 0x2ba   : > { %5216 = vmatprep.subr.bf16.mxu1 %v5215_v23  ;;  %v5471_v54 = vpack.c.bf16 %v2395_v22, %v2394_v37  ;;  %v2714_v22 = vld [vmem:[#allocation14 + $0x2a0] sm:$0xff] }
 0x2bd   : > { %5218 = vmatpush3.bf16.msra.mxu1 %v5215_v23  ;;  %v2490_v23 = vld [vmem:[#allocation14 + $0x180] sm:$0xff] }
 0x2be   : > { %5220 = vmatprep.subr.bf16.mxu1 %v5219_v27  ;;  %v5475_v26 = vpack.c.bf16 %v2491_v25, %v2490_v23  ;;  %v2716_v25 = vld [vmem:[#allocation14 + $0x2b0] sm:$0xff] }
 0x2c0   : > { %4318 = vmatmul.mubr.f32.vlgmr.msra.gmra.mrb[8].mxu1 %v5927_v31 }
 0x2c1   : > { %4320 = vmatprep.mubr.f32.mxu1 %v5928_v62  ;;  %5222 = vmatpush3.bf16.msra.mxu1 %v5219_v27  ;;  %v2492_v27 = vld [vmem:[#allocation14 + $0x190] sm:$0xff]  ;;  %v5483_v62 = vpack.c.bf16 %v2495_v20, %v2494_v9  ;;  %v3160_v9 = vld [vmem:[#allocation16 + $0x18] sm:$0xff] }
 0x2c2   : > { %5224 = vmatprep.subr.bf16.mxu1 %v5223_v29 }
 0x2c4   : > { %4321 = vmatmul.mubr.f32.gmra.mrb[10].mxu1 %v1468_v32 }
 0x2c5   : > { %5226 = vmatpush3.bf16.msra.mxu1 %v5223_v29  ;;  %4355 = vmatprep.mubr.f32.mxu1 %v6656_v56  ;;  %v5247_v56 = vpack.c.bf16 %v1595_v43, %v1594_v42  ;;  %v5479_v29 = vpack.c.bf16 %v2493_v8, %v2492_v27  ;;  %v2505_v42 = vld [vmem:[#allocation14 + $0x1f8] sm:$0xff]  ;;  %v3157_v27 = vld [vmem:[#allocation16] sm:$0xff]  ;;  %v3158_v8 = vld [vmem:[#allocation16 + $0x8] sm:$0xff] }
 0x2c6   : > { %5228 = vmatprep.subr.bf16.mxu1 %v5227_v5 }
 0x2c9   : > { %5230 = vmatpush3.bf16.msra.mxu1 %v5227_v5  ;;  %v2496_v5 = vld [vmem:[#allocation14 + $0x1b0] sm:$0xff] }
 0x2ca   : > { %5232 = vmatprep.subr.bf16.mxu1 %v5231_v34  ;;  %v5487_v33 = vpack.c.bf16 %v2497_v58, %v2496_v5  ;;  %v3162_v5 = vld [vmem:[#allocation16 + $0x28] sm:$0xff]  ;;  %v2718_v58 = vld [vmem:[#allocation14 + $0x2c0] sm:$0xff] }
 0x2cd   : > { %5234 = vmatpush3.bf16.msra.mxu1 %v5231_v34  ;;  %v2498_v34 = vld [vmem:[#allocation14 + $0x1c0] sm:$0xff] }
 0x2ce   : > { %5236 = vmatprep.subr.bf16.mxu1 %v5235_v36  ;;  %v5491_v35 = vpack.c.bf16 %v2499_v17, %v2498_v34 }
 0x2d1   : > { %5238 = vmatpush3.bf16.msra.mxu1 %v5235_v36  ;;  %v2500_v36 = vld [vmem:[#allocation14 + $0x1d0] sm:$0xff] }
 0x2d2   : > { %5240 = vmatprep.subr.bf16.mxu1 %v5239_v51  ;;  %v5495_v39 = vpack.c.bf16 %v2501_v38, %v2500_v36  ;;  %v3164_v36 = vld [vmem:[#allocation16 + $0x38] sm:$0xff]  ;;  %v2720_v38 = vld [vmem:[#allocation14 + $0x2d0] sm:$0xff] }
 0x2d5   : > { %5242 = vmatpush3.bf16.msra.mxu1 %v5239_v51  ;;  %v2502_v51 = vld [vmem:[#allocation14 + $0x1e0] sm:$0xff] }
 0x2d6   : > { %5244 = vmatprep.subr.bf16.mxu1 %v5243_v41  ;;  %v5499_v24 = vpack.c.bf16 %v2503_v40, %v2502_v51  ;;  %v3165_v40 = vld [vmem:[#allocation16 + $0x40] sm:$0xff] }
 0x2d9   : > { %5246 = vmatpush3.bf16.msra.mxu1 %v5243_v41  ;;  %v2504_v41 = vld [vmem:[#allocation14 + $0x1f0] sm:$0xff] }
 0x2da   : > { %5248 = vmatprep.subr.bf16.mxu1 %v5247_v56  ;;  %v5503_v43 = vpack.c.bf16 %v2505_v42, %v2504_v41  ;;  %v2722_v41 = vld [vmem:[#allocation14 + $0x2e0] sm:$0xff]  ;;  %v2723_v42 = vld [vmem:[#allocation14 + $0x2e8] sm:$0xff] }
 0x2dd   : > { %5250 = vmatpush3.bf16.msra.mxu1 %v5247_v56  ;;  %v2600_v56 = vld [vmem:[#allocation14 + $0x200] sm:$0xff] }
 0x2e0   : > { %4356 = vmatmul.mubr.f32.vlgmr.msra.gmra.mrb[8].mxu1 %v6659_v0 }
 0x2e1   : > { %4358 = vmatprep.mubr.f32.mxu1 %v6680_v21  ;;  %v2382_v21 = vld [vmem:[#allocation14 + $0x110] sm:$0xff] }
 0x2e2   : > { %v5447_v63 = vpack.c.bf16 %v2383_v50, %v2382_v21  ;;  %v2605_v21 = vld [vmem:[#allocation14 + $0x228] sm:$0xff] }
 0x2e4   : > { %4359 = vmatmul.mubr.f32.gmra.mrb[10].mxu1 %v1578_v1  ;;  %v2601_v1 = vld [vmem:[#allocation14 + $0x208] sm:$0xff] }
 0x320   : > { %v4509_v45 = vpop.f32.mrb[0].mxu0 }
 0x321   : > { %v6695_v46 = vadd.f32 %v4509_v45, %v3529_v44  ;;  %v2125_v47 = vpop.f32.mrb[1].mxu0  ;;  %v2602_v45 = vld [vmem:[#allocation14 + $0x210] sm:$0xff] }
 0x322   : > { %v6697_v48 = vadd.f32 %v3529_v44, %v2125_v47  ;;  %v2603_v47 = vld [vmem:[#allocation14 + $0x218] sm:$0xff] }
 0x323   : > { %2161 = vst [vmem:[#allocation4 + $0x32] sm:$0xff] %v6695_v46 }
 0x324   : > { %2160 = vst [vmem:[#allocation4 + $0x22] sm:$0xff] %v6697_v48  ;;  %v4512_v0 = vpop.f32.mrb[2].mxu0  ;;  %4548 = vmatprep.mubr.f32.mxu0 %v6697_v48 }
 0x325   : > { %v6702_v52 = vadd.f32 %v4512_v0, %v3529_v44  ;;  %v2135_v53 = vpop.f32.mrb[3].mxu0  ;;  %4549 = vmatmul.mubr.f32.gmra.mrb[6].mxu0 %v6695_v46  ;;  %v2604_v0 = vld [vmem:[#allocation14 + $0x220] sm:$0xff] }
 0x326   : > { %v6705_v59 = vadd.f32 %v3529_v44, %v2135_v53  ;;  %4583 = vmatprep.mubr.f32.mxu0 %v2164_v49  ;;  %v5507_v44 = vpack.c.bf16 %v2601_v1, %v2600_v56  ;;  %v5511_v49 = vpack.c.bf16 %v2603_v47, %v2602_v45  ;;  %v5515_v53 = vpack.c.bf16 %v2605_v21, %v2604_v0  ;;  %v3167_v1 = vld [vmem:[#allocation16 + $0x50] sm:$0xff]  ;;  %v2725_v47 = vld [vmem:[#allocation14 + $0x2f8] sm:$0xff]  ;;  %v3169_v21 = vld [vmem:[#allocation16 + $0x60] sm:$0xff] }
 0x327   : > { %2163 = vst [vmem:[#allocation4 + $0x52] sm:$0xff] %v6702_v52  ;;  %v5563_v56 = vpack.c.bf16 %v2723_v42, %v2722_v41  ;;  %v2724_v45 = vld [vmem:[#allocation14 + $0x2f0] sm:$0xff]  ;;  %v2943_v42 = vld [vmem:[#allocation14 + $0x3e0] sm:$0xff] }
 0x328   : > { %2162 = vst [vmem:[#allocation4 + $0x42] sm:$0xff] %v6705_v59  ;;  %v5567_v0 = vpack.c.bf16 %v2725_v47, %v2724_v45  ;;  %v3041_v45 = vld [vmem:[#allocation14 + $0x400] sm:$0xff]  ;;  %v3042_v47 = vld [vmem:[#allocation14 + $0x408] sm:$0xff] }
 0x329   : > { %4584 = vmatmul.mubr.f32.vlgmr.msra.gmra.mrb[4].mxu0 %v2165_v60 }
 0x32a   : > { %5446 = vmatpush3.bf16.msra.mxu0 %v6686_v57  ;;  %v6710_v10 = vld [vmem:[#allocation4 + $0x30] sm:$0xff]  ;;  %v5459_v57 = vpack.c.bf16 %v2389_v13, %v2388_v12  ;;  %v2613_v12 = vld [vmem:[#allocation14 + $0x268] sm:$0xff] }
 0x32b   : > { %v2166_v4 = vld [vmem:[#allocation4 + $0x20] sm:$0xff]  ;;  %5448 = vmatprep.subr.bf16.mxu0 %v5447_v63  ;;  %v6716_v32 = vld [vmem:[#allocation4 + $0x34] sm:$0xff] }
 0x32c   : > { %4586 = vmatprep.mubr.f32.mxu0 %v2166_v4  ;;  %v6713_v31 = vld [vmem:[#allocation4 + $0x24] sm:$0xff] }
 0x32d   : > { %4587 = vmatmul.mubr.f32.gmra.mrb[6].mxu0 %v6710_v10 }
 0x32e   : > { %5450 = vmatpush3.bf16.msra.mxu0 %v5447_v63  ;;  %4621 = vmatprep.mubr.f32.mxu0 %v2375_v7  ;;  %v6723_v60 = vld [vmem:[#allocation4 + $0x50] sm:$0xff] }
 0x32f   : > { %5452 = vmatprep.subr.bf16.mxu0 %v5451_v6  ;;  %v6720_v50 = vld [vmem:[#allocation4 + $0x40] sm:$0xff]  ;;  %v2606_v63 = vld [vmem:[#allocation14 + $0x230] sm:$0xff] }
 0x330   : > { %v5519_v3 = vpack.c.bf16 %v2607_v2, %v2606_v63  ;;  %v2821_v63 = vld [vmem:[#allocation14 + $0x300] sm:$0xff]  ;;  %v2822_v2 = vld [vmem:[#allocation14 + $0x308] sm:$0xff] }
 0x332   : > { %5454 = vmatpush3.bf16.msra.mxu0 %v5451_v6  ;;  %v2609_v6 = vld [vmem:[#allocation14 + $0x248] sm:$0xff] }
 0x333   : > { %5456 = vmatprep.subr.bf16.mxu0 %v5455_v11 }
 0x336   : > { %5458 = vmatpush3.bf16.msra.mxu0 %v5455_v11  ;;  %v2612_v11 = vld [vmem:[#allocation14 + $0x260] sm:$0xff] }
 0x337   : > { %5460 = vmatprep.subr.bf16.mxu0 %v5459_v57  ;;  %v5531_v13 = vpack.c.bf16 %v2613_v12, %v2612_v11  ;;  %v6732_v11 = vld [vmem:[#allocation4 + $0x44] sm:$0xff] }
 0x33a   : > { %5462 = vmatpush3.bf16.msra.mxu0 %v5459_v57  ;;  %v2614_v57 = vld [vmem:[#allocation14 + $0x270] sm:$0xff] }
 0x33b   : > { %5464 = vmatprep.subr.bf16.mxu0 %v5463_v16 }
 0x33e   : > { %5466 = vmatpush3.bf16.msra.mxu0 %v5463_v16  ;;  %v2711_v16 = vld [vmem:[#allocation14 + $0x288] sm:$0xff] }
 0x33f   : > { %5468 = vmatprep.subr.bf16.mxu0 %v5467_v30  ;;  %v5539_v18 = vpack.c.bf16 %v2711_v16, %v2710_v15  ;;  %v2830_v15 = vld [vmem:[#allocation14 + $0x348] sm:$0xff] }
 0x342   : > { %5470 = vmatpush3.bf16.msra.mxu0 %v5467_v30  ;;  %v2713_v30 = vld [vmem:[#allocation14 + $0x298] sm:$0xff] }
 0x343   : > { %5472 = vmatprep.subr.bf16.mxu0 %v5471_v54  ;;  %v5543_v37 = vpack.c.bf16 %v2713_v30, %v2712_v19  ;;  %v2831_v30 = vld [vmem:[#allocation14 + $0x350] sm:$0xff] }
 0x346   : > { %5474 = vmatpush3.bf16.msra.mxu0 %v5471_v54  ;;  %v2715_v54 = vld [vmem:[#allocation14 + $0x2a8] sm:$0xff] }
 0x347   : > { %5476 = vmatprep.subr.bf16.mxu0 %v5475_v26  ;;  %v5547_v23 = vpack.c.bf16 %v2715_v54, %v2714_v22 }
 0x349   : > { %4622 = vmatmul.mubr.f32.vlgmr.msra.gmra.mrb[4].mxu0 %v2376_v28  ;;  %v3159_v28 = vld [vmem:[#allocation16 + $0x10] sm:$0xff] }
 0x34a   : > { %4624 = vmatprep.mubr.f32.mxu0 %v6713_v31  ;;  %5478 = vmatpush3.bf16.msra.mxu0 %v5475_v26  ;;  %v2717_v26 = vld [vmem:[#allocation14 + $0x2b8] sm:$0xff] }
 0x34b   : > { %5480 = vmatprep.subr.bf16.mxu0 %v5479_v29  ;;  %v5551_v20 = vpack.c.bf16 %v2717_v26, %v2716_v25  ;;  %v2834_v25 = vld [vmem:[#allocation14 + $0x368] sm:$0xff] }
 0x34d   : > { %4625 = vmatmul.mubr.f32.gmra.mrb[6].mxu0 %v6716_v32 }
 0x34e   : > { %5482 = vmatpush3.bf16.msra.mxu0 %v5479_v29  ;;  %4659 = vmatprep.mubr.f32.mxu0 %v2166_v4  ;;  %v2608_v4 = vld [vmem:[#allocation14 + $0x240] sm:$0xff]  ;;  %v5667_v29 = vpack.c.bf16 %v3158_v8, %v3157_v27  ;;  %v2835_v27 = vld [vmem:[#allocation14 + $0x370] sm:$0xff]  ;;  %v2836_v8 = vld [vmem:[#allocation14 + $0x378] sm:$0xff] }
 0x34f   : > { %5484 = vmatprep.subr.bf16.mxu0 %v5483_v62  ;;  %v5523_v7 = vpack.c.bf16 %v2609_v6, %v2608_v4  ;;  %v5571_v4 = vpack.c.bf16 %v2822_v2, %v2821_v63  ;;  %v2823_v6 = vld [vmem:[#allocation14 + $0x310] sm:$0xff]  ;;  %v3045_v2 = vld [vmem:[#allocation14 + $0x420] sm:$0xff] }
 0x350   : > { %5668 = vmatprep.subr.bf16.mxu1 %v5667_v29 }
 0x351   : > { %5670 = vmatpush3.bf16.msra.mxu1 %v5667_v29  ;;  %v2931_v29 = vld [vmem:[#allocation14 + $0x380] sm:$0xff] }
 0x352   : > { %5486 = vmatpush3.bf16.msra.mxu0 %v5483_v62  ;;  %v3161_v62 = vld [vmem:[#allocation16 + $0x20] sm:$0xff] }
 0x353   : > { %5488 = vmatprep.subr.bf16.mxu0 %v5487_v33  ;;  %v5675_v34 = vpack.c.bf16 %v3162_v5, %v3161_v62  ;;  %v2934_v62 = vld [vmem:[#allocation14 + $0x398] sm:$0xff]  ;;  %v2818_v5 = vld [vmem:[#allocation4 + $0x60] sm:$0xff] }
 0x356   : > { %5490 = vmatpush3.bf16.msra.mxu0 %v5487_v33  ;;  %v2719_v33 = vld [vmem:[#allocation14 + $0x2c8] sm:$0xff] }
 0x357   : > { %5492 = vmatprep.subr.bf16.mxu0 %v5491_v35  ;;  %v5555_v17 = vpack.c.bf16 %v2719_v33, %v2718_v58  ;;  %v2935_v33 = vld [vmem:[#allocation14 + $0x3a0] sm:$0xff] }
 0x35a   : > { %5494 = vmatpush3.bf16.msra.mxu0 %v5491_v35  ;;  %v3163_v35 = vld [vmem:[#allocation16 + $0x30] sm:$0xff] }
 0x35b   : > { %5496 = vmatprep.subr.bf16.mxu0 %v5495_v39 }
 0x35e   : > { %5498 = vmatpush3.bf16.msra.mxu0 %v5495_v39  ;;  %v5679_v39 = vpack.c.bf16 %v3164_v36, %v3163_v35  ;;  %v2937_v36 = vld [vmem:[#allocation14 + $0x3b0] sm:$0xff] }
 0x35f   : > { %5500 = vmatprep.subr.bf16.mxu0 %v5499_v24 }
 0x362   : > { %5502 = vmatpush3.bf16.msra.mxu0 %v5499_v24  ;;  %v3166_v24 = vld [vmem:[#allocation16 + $0x48] sm:$0xff] }
 0x363   : > { %5504 = vmatprep.subr.bf16.mxu0 %v5503_v43 }
 0x366   : > { %5506 = vmatpush3.bf16.msra.mxu0 %v5503_v43  ;;  %v5683_v43 = vpack.c.bf16 %v3166_v24, %v3165_v40  ;;  %v2941_v24 = vld [vmem:[#allocation14 + $0x3d0] sm:$0xff] }
 0x367   : > { %5508 = vmatprep.subr.bf16.mxu0 %v5507_v44 }
 0x369   : > { %4660 = vmatmul.mubr.f32.vlgmr.msra.gmra.mrb[4].mxu0 %v6710_v10  ;;  %v2610_v10 = vld [vmem:[#allocation14 + $0x250] sm:$0xff] }
 0x36a   : > { %4662 = vmatprep.mubr.f32.mxu0 %v6720_v50  ;;  %5510 = vmatpush3.bf16.msra.mxu0 %v5507_v44  ;;  %v5527_v61 = vpack.c.bf16 %v2611_v55, %v2610_v10  ;;  %v3168_v44 = vld [vmem:[#allocation16 + $0x58] sm:$0xff]  ;;  %v2825_v55 = vld [vmem:[#allocation14 + $0x320] sm:$0xff] }
 0x36b   : > { %5512 = vmatprep.subr.bf16.mxu0 %v5511_v49 }
 0x36d   : > { %4663 = vmatmul.mubr.f32.gmra.mrb[6].mxu0 %v6723_v60 }
 0x36e   : > { %5514 = vmatpush3.bf16.msra.mxu0 %v5511_v49  ;;  %4697 = vmatprep.mubr.f32.mxu0 %v6697_v48  ;;  %v5535_v48 = vpack.c.bf16 %v2615_v14, %v2614_v57  ;;  %v5687_v49 = vpack.c.bf16 %v3168_v44, %v3167_v1  ;;  %v2827_v57 = vld [vmem:[#allocation14 + $0x330] sm:$0xff]  ;;  %v2828_v14 = vld [vmem:[#allocation14 + $0x338] sm:$0xff] }
 0x36f   : > { %5516 = vmatprep.subr.bf16.mxu0 %v5515_v53  ;;  %v2945_v1 = vld [vmem:[#allocation14 + $0x3f0] sm:$0xff]  ;;  %v2946_v44 = vld [vmem:[#allocation14 + $0x3f8] sm:$0xff] }
 0x372   : > { %5518 = vmatpush3.bf16.msra.mxu0 %v5515_v53  ;;  %v3170_v53 = vld [vmem:[#allocation16 + $0x68] sm:$0xff] }
 0x373   : > { %5520 = vmatprep.subr.bf16.mxu0 %v5519_v3 }
 0x376   : > { %5522 = vmatpush3.bf16.msra.mxu0 %v5519_v3  ;;  %v5691_v3 = vpack.c.bf16 %v3170_v53, %v3169_v21  ;;  %v3044_v21 = vld [vmem:[#allocation14 + $0x418] sm:$0xff]  ;;  %v2928_v53 = vld [vmem:[#allocation4 + $0x62] sm:$0xff] }
 0x377   : > { %5524 = vmatprep.subr.bf16.mxu0 %v5523_v7 }
 0x37a   : > { %5526 = vmatpush3.bf16.msra.mxu0 %v5523_v7  ;;  %v2824_v7 = vld [vmem:[#allocation14 + $0x318] sm:$0xff] }
 0x37b   : > { %5528 = vmatprep.subr.bf16.mxu0 %v5527_v61  ;;  %v5575_v10 = vpack.c.bf16 %v2824_v7, %v2823_v6  ;;  %v3047_v7 = vld [vmem:[#allocation14 + $0x430] sm:$0xff] }
 0x37e   : > { %5530 = vmatpush3.bf16.msra.mxu0 %v5527_v61  ;;  %v2826_v61 = vld [vmem:[#allocation14 + $0x328] sm:$0xff] }
 0x37f   : > { %5532 = vmatprep.subr.bf16.mxu0 %v5531_v13  ;;  %v5579_v12 = vpack.c.bf16 %v2826_v61, %v2825_v55  ;;  %v3049_v61 = vld [vmem:[#allocation14 + $0x440] sm:$0xff] }
 0x382   : > { %5534 = vmatpush3.bf16.msra.mxu0 %v5531_v13  ;;  %v6735_v13 = vld [vmem:[#allocation4 + $0x54] sm:$0xff] }
 0x383   : > { %5536 = vmatprep.subr.bf16.mxu0 %v5535_v48 }
 0x386   : > { %5538 = vmatpush3.bf16.msra.mxu0 %v5535_v48  ;;  %v5583_v48 = vpack.c.bf16 %v2828_v14, %v2827_v57  ;;  %v3051_v14 = vld [vmem:[#allocation14 + $0x450] sm:$0xff] }
 0x387   : > { %5540 = vmatprep.subr.bf16.mxu0 %v5539_v18 }
 0x389   : > { %4698 = vmatmul.mubr.f32.vlgmr.msra.gmra.mrb[4].mxu0 %v6695_v46  ;;  %v5671_v46 = vpack.c.bf16 %v3160_v9, %v3159_v28  ;;  %v5599_v28 = vpack.c.bf16 %v2836_v8, %v2835_v27  ;;  %v2932_v9 = vld [vmem:[#allocation14 + $0x388] sm:$0xff]  ;;  %v1696_v8 = vld [vmem:[#allocation11] sm:$0xff] }
 0x38a   : > { %4700 = vmatprep.mubr.f32.mxu0 %v6705_v59  ;;  %5542 = vmatpush3.bf16.msra.mxu0 %v5539_v18 }
 0x38b   : > { %5544 = vmatprep.subr.bf16.mxu0 %v5543_v37  ;;  %5672 = vmatprep.subr.bf16.mxu1 %v5671_v46 }
 0x38c   : > { %5674 = vmatpush3.bf16.msra.mxu1 %v5671_v46  ;;  %v2933_v46 = vld [vmem:[#allocation14 + $0x390] sm:$0xff] }
 0x38d   : > { %4701 = vmatmul.mubr.f32.gmra.mrb[6].mxu0 %v6702_v52  ;;  %5676 = vmatprep.subr.bf16.mxu1 %v5675_v34  ;;  %v5607_v58 = vpack.c.bf16 %v2934_v62, %v2933_v46  ;;  %v1698_v46 = vld [vmem:[#allocation11 + $0x10] sm:$0xff]  ;;  %v1699_v62 = vld [vmem:[#allocation11 + $0x18] sm:$0xff] }
 0x38e   : > { %5546 = vmatpush3.bf16.msra.mxu0 %v5543_v37  ;;  %4735 = vmatprep.mubr.f32.mxu0 %v6713_v31  ;;  %v2721_v31 = vld [vmem:[#allocation14 + $0x2d8] sm:$0xff] }
 0x38f   : > { %5548 = vmatprep.subr.bf16.mxu0 %v5547_v23  ;;  %v5559_v51 = vpack.c.bf16 %v2721_v31, %v2720_v38  ;;  %v2832_v37 = vld [vmem:[#allocation14 + $0x358] sm:$0xff] }
 0x390   : > { %5678 = vmatpush3.bf16.msra.mxu1 %v5675_v34  ;;  %v5591_v54 = vpack.c.bf16 %v2832_v37, %v2831_v30  ;;  %v2936_v34 = vld [vmem:[#allocation14 + $0x3a8] sm:$0xff]  ;;  %v2938_v38 = vld [vmem:[#allocation14 + $0x3b8] sm:$0xff]  ;;  %v3055_v30 = vld [vmem:[#allocation14 + $0x470] sm:$0xff] }
 0x391   : > { %5680 = vmatprep.subr.bf16.mxu1 %v5679_v39  ;;  %v5611_v35 = vpack.c.bf16 %v2936_v34, %v2935_v33  ;;  %v5615_v31 = vpack.c.bf16 %v2938_v38, %v2937_v36  ;;  %v3056_v37 = vld [vmem:[#allocation14 + $0x478] sm:$0xff]  ;;  %v5703_v33 = vpack.c.bf16 %v1699_v62, %v1698_v46  ;;  %v3528_v36 = vld [vmem:[%s6867_s29] ss:$0 sm:$0xff]  ;;  %s6224_s29 = smov [#allocation17]  }
 0x392   : > { %5550 = vmatpush3.bf16.msra.mxu0 %v5547_v23  ;;  %s6135_s20 = sshll.u32 %s6224_s29, 4  ;;  %s6136_s20 = int_to_ptr.vmem [resolvable:$false] %s6135_s20 }
 0x393   : > { %5552 = vmatprep.subr.bf16.mxu0 %v5551_v20  ;;  %s6137_s4 = scalar_lea.vmem %s6136_s20, 1024  ;;  %p6138_p12 = scmp.lt.s32.totalorder %s6777_s17, %s6136_s20 }
 0x394   : > { %5682 = vmatpush3.bf16.msra.mxu1 %v5679_v39  ;;  %v2939_v39 = vld [vmem:[#allocation14 + $0x3c0] sm:$0xff]  ;;  %p6139_p13 = scmp.lt.s32.totalorder %s6137_s4, %s6131_s19 }
 0x395   : > { %5684 = vmatprep.subr.bf16.mxu1 %v5683_v43 }
 0x396   : > { %5554 = vmatpush3.bf16.msra.mxu0 %v5551_v20  ;;  %v5603_v20 = vpack.c.bf16 %v2932_v9, %v2931_v29  ;;  %v3530_v9 = vld [vmem:[%s6866_s26] ss:$0 sm:$0xff]  ;;  %s6869_s26 = sld [smem:[#allocation27_spill]]  ;;  %p6140_p9 = por %p6139_p13, %p6138_p12 }
 0x397   : > { %5556 = vmatprep.subr.bf16.mxu0 %v5555_v17 }
 0x398   : > { %5686 = vmatpush3.bf16.msra.mxu1 %v5683_v43  ;;  %v2944_v43 = vld [vmem:[#allocation14 + $0x3e8] sm:$0xff]  ;;  %p6141_p8 = pnand %p6140_p9, %p6134_p11 }
 0x399   : > { %5688 = vmatprep.subr.bf16.mxu1 %v5687_v49 }
 0x39a   : > { %5558 = vmatpush3.bf16.msra.mxu0 %v5555_v17  ;;  %v2819_v17 = vld [vmem:[#allocation4 + $0x70] sm:$0xff] }
 0x39b   : > { %5560 = vmatprep.subr.bf16.mxu0 %v5559_v51 }
 0x39c   : > { %5690 = vmatpush3.bf16.msra.mxu1 %v5687_v49  ;;  %v5635_v49 = vpack.c.bf16 %v3042_v47, %v3041_v45  ;;  %v1708_v45 = vld [vmem:[#allocation11 + $0x60] sm:$0xff]  ;;  %s6775_s13 = scalar_lea.hbm %s6869_s26, %s3538_s11 }
 0x39d   : > { %5692 = vmatprep.subr.bf16.mxu1 %v5691_v3 }
 0x39e   : > { %5562 = vmatpush3.bf16.msra.mxu0 %v5559_v51  ;;  %v2940_v51 = vld [vmem:[#allocation14 + $0x3c8] sm:$0xff] }
 0x39f   : > { %5564 = vmatprep.subr.bf16.mxu0 %v5563_v56  ;;  %v5619_v40 = vpack.c.bf16 %v2940_v51, %v2939_v39 }
 0x3a0   : > { %5694 = vmatpush3.bf16.msra.mxu1 %v5691_v3  ;;  %v3046_v3 = vld [vmem:[#allocation14 + $0x428] sm:$0xff] }
 0x3a1   : > { %v5643_v6 = vpack.c.bf16 %v3046_v3, %v3045_v2  ;;  %v3531_v3 = vld [vmem:[%s6868_s9] ss:$0 sm:$0xff] }
 0x3a2   : > { %5566 = vmatpush3.bf16.msra.mxu0 %v5563_v56  ;;  %v5627_v56 = vpack.c.bf16 %v2944_v43, %v2943_v42  ;;  %v1704_v42 = vld [vmem:[#allocation11 + $0x40] sm:$0xff]  ;;  %v1705_v43 = vld [vmem:[#allocation11 + $0x48] sm:$0xff] }
 0x3a3   : > { %5568 = vmatprep.subr.bf16.mxu0 %v5567_v0 }
 0x3a6   : > { %5570 = vmatpush3.bf16.msra.mxu0 %v5567_v0  ;;  %v3043_v0 = vld [vmem:[#allocation14 + $0x410] sm:$0xff] }
 0x3a7   : > { %5572 = vmatprep.subr.bf16.mxu0 %v5571_v4  ;;  %v5639_v63 = vpack.c.bf16 %v3044_v21, %v3043_v0  ;;  %v1711_v0 = vld [vmem:[#allocation11 + $0x78] sm:$0xff] }
 0x3a9   : > { %4736 = vmatmul.mubr.f32.vlgmr.msra.gmra.mrb[4].mxu0 %v6716_v32  ;;  %v2829_v32 = vld [vmem:[#allocation14 + $0x340] sm:$0xff] }
 0x3aa   : > { %4738 = vmatprep.mubr.f32.mxu0 %v6732_v11  ;;  %5574 = vmatpush3.bf16.msra.mxu0 %v5571_v4  ;;  %v5587_v18 = vpack.c.bf16 %v2830_v15, %v2829_v32  ;;  %v2929_v4 = vld [vmem:[#allocation4 + $0x72] sm:$0xff]  ;;  %v3053_v32 = vld [vmem:[#allocation14 + $0x460] sm:$0xff]  ;;  %v3054_v15 = vld [vmem:[#allocation14 + $0x468] sm:$0xff] }
 0x3ab   : > { %5576 = vmatprep.subr.bf16.mxu0 %v5575_v10 }
 0x3ad   : > { %4739 = vmatmul.mubr.f32.gmra.mrb[6].mxu0 %v6735_v13 }
 0x3ae   : > { %5578 = vmatpush3.bf16.msra.mxu0 %v5575_v10  ;;  %4773 = vmatprep.mubr.f32.mxu0 %v6720_v50  ;;  %v2833_v50 = vld [vmem:[#allocation14 + $0x360] sm:$0xff]  ;;  %v3048_v10 = vld [vmem:[#allocation14 + $0x438] sm:$0xff] }
 0x3af   : > { %5580 = vmatprep.subr.bf16.mxu0 %v5579_v12  ;;  %v5595_v26 = vpack.c.bf16 %v2834_v25, %v2833_v50  ;;  %v5647_v55 = vpack.c.bf16 %v3048_v10, %v3047_v7  ;;  %v3039_v50 = vld [vmem:[#allocation4 + $0x74] sm:$0xff]  ;;  %v5929_v10 = vld [vmem:[%s6566_s16 + $0x8] sm:$0xff] }
 0x3b0   : > { %v3171_v25 = vld [vmem:[#allocation16 + $0x70] sm:$0xff] }
 0x3b2   : > { %5582 = vmatpush3.bf16.msra.mxu0 %v5579_v12  ;;  %v3050_v12 = vld [vmem:[#allocation14 + $0x448] sm:$0xff] }
 0x3b3   : > { %v6739_v16 = vpop.f32.mrb[8].mxu1  ;;  %5584 = vmatprep.subr.bf16.mxu0 %v5583_v48  ;;  %v5651_v57 = vpack.c.bf16 %v3050_v12, %v3049_v61 }
 0x3b4   : > { %v6741_v19 = vpop.f32.mrb[9].mxu1 }
 0x3b6   : > { %5586 = vmatpush3.bf16.msra.mxu0 %v5583_v48 }
 0x3b7   : > { %v6743_v22 = vpop.f32.mrb[10].mxu1  ;;  %5588 = vmatprep.subr.bf16.mxu0 %v5587_v18 }
 0x3b8   : > { %v6745_v23 = vpop.f32.mrb[11].mxu1  ;;  %v1695_v2 = vadd.f32 %v6743_v22, %v3528_v36 }
 0x3ba   : > { %5590 = vmatpush3.bf16.msra.mxu0 %v5587_v18  ;;  %v5659_v18 = vpack.c.bf16 %v3054_v15, %v3053_v32  ;;  %v5932_v32 = vld [vmem:[%s6566_s16 + $0x10] sm:$0xff] }
 0x3bb   : > { %5592 = vmatprep.subr.bf16.mxu0 %v5591_v54 }
 0x3be   : > { %5594 = vmatpush3.bf16.msra.mxu0 %v5591_v54  ;;  %v3038_v54 = vld [vmem:[#allocation4 + $0x64] sm:$0xff] }
 0x3bf   : > { %5596 = vmatprep.subr.bf16.mxu0 %v5595_v26 }
 0x3c2   : > { %5598 = vmatpush3.bf16.msra.mxu0 %v5595_v26  ;;  %v3172_v26 = vld [vmem:[#allocation16 + $0x78] sm:$0xff] }
 0x3c3   : > { %5600 = vmatprep.subr.bf16.mxu0 %v5599_v28  ;;  %v5695_v27 = vpack.c.bf16 %v3172_v26, %v3171_v25 }
 0x3c5   : > { %5696 = vmatprep.subr.bf16.mxu1 %v5695_v27 }
 0x3c6   : > { %5602 = vmatpush3.bf16.msra.mxu0 %v5599_v28  ;;  %5698 = vmatpush3.bf16.msra.mxu1 %v5695_v27  ;;  %v1697_v28 = vld [vmem:[#allocation11 + $0x8] sm:$0xff] }
 0x3c7   : > { %5604 = vmatprep.subr.bf16.mxu0 %v5603_v20  ;;  %v5699_v29 = vpack.c.bf16 %v1697_v28, %v1696_v8 }
 0x3c9   : > { %4774 = vmatmul.mubr.f32.vlgmr.msra.gmra.mrb[4].mxu0 %v6723_v60  ;;  %v2942_v60 = vld [vmem:[#allocation14 + $0x3d8] sm:$0xff]  ;;  %5700 = vmatprep.subr.bf16.mxu1 %v5699_v29 }
 0x3ca   : > { %5606 = vmatpush3.bf16.msra.mxu0 %v5603_v20  ;;  %4776 = vmatprep.mubr.f32.mxu0 %v2818_v5  ;;  %v5623_v41 = vpack.c.bf16 %v2942_v60, %v2941_v24  ;;  %v1702_v24 = vld [vmem:[#allocation11 + $0x30] sm:$0xff]  ;;  %v1703_v60 = vld [vmem:[#allocation11 + $0x38] sm:$0xff] }
 0x3cb   : > { %5608 = vmatprep.subr.bf16.mxu0 %v5607_v58 }
 0x3cd   : > { %4777 = vmatmul.mubr.f32.gmra.mrb[6].mxu0 %v2819_v17  ;;  %v1700_v17 = vld [vmem:[#allocation11 + $0x20] sm:$0xff] }
 0x3ce   : > { %5610 = vmatpush3.bf16.msra.mxu0 %v5607_v58  ;;  %4811 = vmatprep.mubr.f32.mxu0 %v6705_v59  ;;  %v5631_v59 = vpack.c.bf16 %v2946_v44, %v2945_v1  ;;  %v1706_v1 = vld [vmem:[#allocation11 + $0x50] sm:$0xff]  ;;  %v1707_v44 = vld [vmem:[#allocation11 + $0x58] sm:$0xff] }
 0x3cf   : > { %5612 = vmatprep.subr.bf16.mxu0 %v5611_v35 }
 0x3d2   : > { %5614 = vmatpush3.bf16.msra.mxu0 %v5611_v35  ;;  %v1701_v35 = vld [vmem:[#allocation11 + $0x28] sm:$0xff] }
 0x3d3   : > { %5616 = vmatprep.subr.bf16.mxu0 %v5615_v31  ;;  %v5707_v51 = vpack.c.bf16 %v1701_v35, %v1700_v17 }
 0x3d6   : > { %5618 = vmatpush3.bf16.msra.mxu0 %v5615_v31 }
 0x3d7   : > { %5620 = vmatprep.subr.bf16.mxu0 %v5619_v40 }
 0x3da   : > { %5622 = vmatpush3.bf16.msra.mxu0 %v5619_v40  ;;  %v1692_v40 = vadd.f32 %v3528_v36, %v6741_v19  ;;  %v1709_v19 = vld [vmem:[#allocation11 + $0x68] sm:$0xff] }
 0x3db   : > { %5624 = vmatprep.subr.bf16.mxu0 %v5623_v41  ;;  %v5723_v47 = vpack.c.bf16 %v1709_v19, %v1708_v45 }
 0x3de   : > { %5626 = vmatpush3.bf16.msra.mxu0 %v5623_v41  ;;  %v5711_v41 = vpack.c.bf16 %v1703_v60, %v1702_v24 }
 0x3df   : > { %5628 = vmatprep.subr.bf16.mxu0 %v5627_v56 }
 0x3e2   : > { %5630 = vmatpush3.bf16.msra.mxu0 %v5627_v56  ;;  %v5715_v56 = vpack.c.bf16 %v1705_v43, %v1704_v42 }
 0x3e3   : > { %5632 = vmatprep.subr.bf16.mxu0 %v5631_v59 }
 0x3e6   : > { %5634 = vmatpush3.bf16.msra.mxu0 %v5631_v59  ;;  %v5719_v59 = vpack.c.bf16 %v1707_v44, %v1706_v1 }
 0x3e7   : > { %5636 = vmatprep.subr.bf16.mxu0 %v5635_v49 }
 0x3e9   : > { %4812 = vmatmul.mubr.f32.vlgmr.msra.gmra.mrb[4].mxu0 %v6702_v52  ;;  %v3052_v52 = vld [vmem:[#allocation14 + $0x458] sm:$0xff] }
 0x3ea   : > { %5638 = vmatpush3.bf16.msra.mxu0 %v5635_v49  ;;  %4814 = vmatprep.mubr.f32.mxu0 %v2928_v53  ;;  %v5655_v48 = vpack.c.bf16 %v3052_v52, %v3051_v14  ;;  %v1710_v49 = vld [vmem:[#allocation11 + $0x70] sm:$0xff]  ;;  %v1693_v53 = vadd.f32 %v6739_v16, %v3528_v36  ;;  %v5931_v52 = vld [vmem:[%s6566_s16 + $0x18] sm:$0xff] }
 0x3eb   : > { %5640 = vmatprep.subr.bf16.mxu0 %v5639_v63  ;;  %v5727_v21 = vpack.c.bf16 %v1711_v0, %v1710_v49 }
 0x3ed   : > { %4815 = vmatmul.mubr.f32.gmra.mrb[6].mxu0 %v2929_v4 }
 0x3ee   : > { %5642 = vmatpush3.bf16.msra.mxu0 %v5639_v63  ;;  %4849 = vmatprep.mubr.f32.mxu0 %v6732_v11  ;;  %v5663_v11 = vpack.c.bf16 %v3056_v37, %v3055_v30  ;;  %v1694_v63 = vadd.f32 %v3528_v36, %v6745_v23 }
 0x3ef   : > { %5644 = vmatprep.subr.bf16.mxu0 %v5643_v6 }
 0x3f2   : > { %5646 = vmatpush3.bf16.msra.mxu0 %v5643_v6 }
 0x3f3   : > { %5648 = vmatprep.subr.bf16.mxu0 %v5647_v55 }
 0x3f6   : > { %5650 = vmatpush3.bf16.msra.mxu0 %v5647_v55  ;;  %v5930_v55 = vld [vmem:[%s6566_s16] sm:$0xff] }
 0x3f7   : > { %5652 = vmatprep.subr.bf16.mxu0 %v5651_v57 }
 0x3fa   : > { %5654 = vmatpush3.bf16.msra.mxu0 %v5651_v57 }
 0x3fb   : > { %5656 = vmatprep.subr.bf16.mxu0 %v5655_v48 }
 0x3fe   : > { %5658 = vmatpush3.bf16.msra.mxu0 %v5655_v48 }
 0x3ff   : > { %5660 = vmatprep.subr.bf16.mxu0 %v5659_v18 }
 0x402   : > { %5662 = vmatpush3.bf16.msra.mxu0 %v5659_v18 }
 0x403   : > { %5664 = vmatprep.subr.bf16.mxu0 %v5663_v11 }
 0x406   : > { %5666 = vmatpush3.bf16.msra.mxu0 %v5663_v11 }
 0x409   : > { %4850 = vmatmul.mubr.f32.vlgmr.msra.gmra.mrb[4].mxu0 %v6735_v13 }
 0x40a   : > { %4852 = vmatprep.mubr.f32.mxu0 %v3038_v54 }
 0x40d   : > { %4853 = vmatmul.mubr.f32.gmra.mrb[6].mxu0 %v3039_v50 }
 0x4dc   : > { %v4851_v20 = vpop.f32.mrb[4].mxu0 }
 0x4dd   : > { %v3123_v13 = vpop.f32.mrb[5].mxu0  ;;  %v3154_v58 = vadd.f32 %v4851_v20, %v3530_v9 }
 0x4de   : > { %v3153_v5 = vadd.f32 %v3530_v9, %v3123_v13 }
 0x4e0   : > { %v4854_v34 = vpop.f32.mrb[6].mxu0  ;;  %4887 = vmatprep.mubr.f32.mxu1 %v3153_v5 }
 0x4e1   : > { %v3133_v38 = vpop.f32.mrb[7].mxu0  ;;  %4888 = vmatmul.mubr.f32.vlgmr.msra.gmra.mrb[12].mxu1 %v3154_v58  ;;  %v3156_v39 = vadd.f32 %v4854_v34, %v3530_v9 }
 0x4e2   : > { %v3155_v31 = vadd.f32 %v3530_v9, %v3133_v38  ;;  %5702 = vmatpush3.bf16.msra.mxu1 %v5699_v29 }
 0x4e3   : > { %5704 = vmatprep.subr.bf16.mxu1 %v5703_v33 }
 0x4e4   : > { %4890 = vmatprep.mubr.f32.mxu1 %v3155_v31 }
 0x4e5   : > { %4891 = vmatmul.mubr.f32.gmra.mrb[14].mxu1 %v3156_v39 }
 0x4e6   : > { %5706 = vmatpush3.bf16.msra.mxu1 %v5703_v33  ;;  %4925 = vmatprep.mubr.f32.mxu1 %v1692_v40 }
 0x4e7   : > { %5708 = vmatprep.subr.bf16.mxu1 %v5707_v51 }
 0x4ea   : > { %5710 = vmatpush3.bf16.msra.mxu1 %v5707_v51 }
 0x4eb   : > { %5712 = vmatprep.subr.bf16.mxu1 %v5711_v41 }
 0x4ee   : > { %5714 = vmatpush3.bf16.msra.mxu1 %v5711_v41 }
 0x4ef   : > { %5716 = vmatprep.subr.bf16.mxu1 %v5715_v56 }
 0x4f2   : > { %5718 = vmatpush3.bf16.msra.mxu1 %v5715_v56 }
 0x4f3   : > { %5720 = vmatprep.subr.bf16.mxu1 %v5719_v59 }
 0x4f6   : > { %5722 = vmatpush3.bf16.msra.mxu1 %v5719_v59 }
 0x4f7   : > { %5724 = vmatprep.subr.bf16.mxu1 %v5723_v47 }
 0x4fa   : > { %5726 = vmatpush3.bf16.msra.mxu1 %v5723_v47 }
 0x4fb   : > { %5728 = vmatprep.subr.bf16.mxu1 %v5727_v21 }
 0x4fe   : > { %5730 = vmatpush3.bf16.msra.mxu1 %v5727_v21 }
 0x501   : > { %4926 = vmatmul.mubr.f32.vlgmr.msra.gmra.mrb[12].mxu1 %v1693_v53 }
 0x502   : > { %4928 = vmatprep.mubr.f32.mxu1 %v1694_v63 }
 0x505   : > { %4929 = vmatmul.mubr.f32.gmra.mrb[14].mxu1 %v1695_v2 }
 0x5d4   : > { %v4927_v4 = vpop.f32.mrb[12].mxu1 }
 0x5d5   : > { %v3351_v6 = vadd.f32 %v4927_v4, %v3531_v3  ;;  %v3324_v7 = vpop.f32.mrb[13].mxu1 }
 0x5d6   : > { %v3350_v16 = vadd.f32 %v3531_v3, %v3324_v7 }
 0x5d7   : > { %v3355_v23 = vadd.f32 %v5929_v10, %v3351_v6 }
 0x5d8   : > { %v3354_v61 = vadd.f32 %v5930_v55, %v3350_v16  ;;  %v4930_v12 = vpop.f32.mrb[14].mxu1 }
 0x5d9   : > { %3359 = vst [vmem:[%s6584_s28 + $0x8] sm:$0xff] %v3355_v23  ;;  %v3353_v22 = vadd.f32 %v4930_v12, %v3531_v3  ;;  %v3334_v57 = vpop.f32.mrb[15].mxu1 }
 0x5da   : > { %3358 = vst [vmem:[%s6584_s28] sm:$0xff] %v3354_v61  ;;  %v3352_v14 = vadd.f32 %v3531_v3, %v3334_v57 }
 0x5db   : > { %v3357_v48 = vadd.f32 %v5931_v52, %v3353_v22 }
 0x5dc   : > { %v3356_v15 = vadd.f32 %v5932_v32, %v3352_v14 }
 0x5dd   : > { %3361 = vst [vmem:[%s6584_s28 + $0x18] sm:$0xff] %v3357_v48 }
 0x5de   : > { %3360 = vst [vmem:[%s6584_s28 + $0x10] sm:$0xff] %v3356_v15 }
 0x5df   : > { %6144 = shalt.err (!%p6141_p8)
}
 0x5e0   : > { %s6145_s16 = scalar_lea.hbm %s6775_s13, 512  ;;  %s6149_s11 = scalar_lea.hbm %s6869_s26, 1024 }
 0x5e1   : > { %p6146_p10 = scmp.ne.s32.totalorder %s6775_s13, %s6145_s16  ;;  %p6150_p0 = scmp.lt.u32.totalorder %s6775_s13, %s6869_s26 }
 0x5e2   : > { %p6151_p2 = scmp.lt.u32.totalorder %s6149_s11, %s6145_s16  ;;  %p6153_p6 = scmp.lt.u32.totalorder %s6145_s16, %s6775_s13 }
 0x5e3   : > { %p6147_p3 = pnand %p6146_p10, %p6870_p5 }
 0x5e4   : > { %p6152_p7 = por %p6151_p2, %p6150_p0 }
 0x5e5   : > { %p6148_p4 = pneg %p6147_p3 }
 0x5e6   : > { %p6154_p1 = por %p6153_p6, %p6152_p7 }
 0x5e8   : > { %p6155_p11 = pnand %p6154_p1, %p6148_p4 }
 0x5ea   : > { %6158 = shalt.err (!%p6155_p11)
}
 0x5eb   : > { %s6225_s19 = smov 128   ;;  %s6226_s29 = smov 8  }
 0x5ec   : > { %5837 = dma.vmem_to_hbm [thread:$0]  (%p6870_p5), %s6777_s17, 512, %s6775_s13, %s3363_s27, %s6225_s19, %s6225_s19, %s6226_s29  }
 0x5ed PF: > { %s3391_s20 = sand.u32 1, %s6197_s21   ;;  %p6871_p12 = scmp.ne.s32.totalorder %s6855_s14, 0 }
 0x5ee   : > { %p6872_p13 = scmp.ge.s32.totalorder %s6209_s24, 2  ;;  %s3392_s4 = scalar_lea.sflag [#allocation7], %s3391_s20 }
 0x5f0   : > { %p5863_p9 = pnand %p6872_p13, %p6871_p12 }
 0x5f2   : > { %6192 = dma.done.wait (!%p5863_p9), %s3392_s4, 512  }
 0x5f3   : > { %6194 = vsyncadd (!%p5863_p9), %s3392_s4, 4294966784  ;;  %p28_p8 = scmp.ge.s32.totalorder %s6480_s25, 4   ;;  %s6873_s21 = smov %s6201_s22 }
 0x5f4   : > { %s6874_s22 = smov %s6205_s23  ;;  %s6875_s23 = smov %s6491_s12 }
 0x5f5   : > { %s6876_s24 = smov %s6480_s25  ;;  %30 = sbr.rel (!%p28_p8) target bundleno = 14 (0xe), region = 165 }
 0x5fc   :  { %3397 = vsyncpa [#allocation6], 1 }
 0x5fd   :  { %3399 = vsyncpa [#allocation6 + $0x1], 1 }
 0x5fe   :  { %3400 = vsyncpa [#allocation9], 1 }
 0x5ff   :  { %3401 = vsyncpa [#allocation12], 1 }
 0x600   :  { %3402 = vsyncpa [#allocation15], 1 }
 0x601   :  { %3403 = vsyncpa [#allocation7], 1 }
 0x602   :  { %3405 = vsyncpa [#allocation7 + $0x1], 1 }

</bundles_post_ra>
